<compile_context>
chip_gen: v7x
topology: tpu7x:2x2x1
jax: 0.10.0
libtpu: 0.0.40
codegen_flags: <defaults>
</compile_context>

<pallas_src>
import functools
import math

import numpy as np

import jax
import jax.numpy as jnp
from jax import lax
from jax.experimental import pallas as pl
from jax.experimental.pallas import tpu as pltpu


# -----------------------------------------------------------------------------
# Kernel
# -----------------------------------------------------------------------------
def _basic_block_kernel(xp_ref, res_ref, b1_ref, b2_ref, p_ref, ln_ref, o_ref,
                        *, eps, conv_precision, ln_precision):
    # xp_ref : (1, S+2, fold*(W+2)*C)   zero-padded, lane-flattened whole image
    # res_ref: (1, S,   fold*W*C)       f32 lane-aligned residual (identity)
    # b1_ref : (3, fold*(W+2)*C, fold*W*C)  banded conv1 super-row tap matrices
    # b2_ref : (3, fold*W*C,     fold*W*C)  banded conv2 taps (W zero-pad folded)
    # p_ref  : (fold*W*C, fold*W*C)     block-diag channel-group averaging
    # ln_ref : (4, fold*W*C)            [g1, b1, g2, b2] broadcast over lanes
    # o_ref  : (1, S, fold*W*C)
    s = o_ref.shape[1]
    xs = xp_ref[0]                                       # (S+2, fold*(W+2)*C)

    # ---- conv1: three super-row-tap banded matmuls (f32 accumulate) ---------
    acc1 = jnp.dot(xs[0:s], b1_ref[0],
                   preferred_element_type=jnp.float32, precision=conv_precision)
    for t in (1, 2):
        acc1 = acc1 + jnp.dot(xs[t:t + s], b1_ref[t],
                              preferred_element_type=jnp.float32,
                              precision=conv_precision)

    # ---- LayerNorm 1 over each C-lane channel group + ReLU -------------------
    p = p_ref[...]
    mean1 = jnp.dot(acc1, p, preferred_element_type=jnp.float32,
                    precision=ln_precision)
    d1 = acc1 - mean1
    var1 = jnp.dot(d1 * d1, p, preferred_element_type=jnp.float32,
                   precision=ln_precision)
    z = d1 * lax.rsqrt(var1 + eps)
    z = jnp.maximum(z * ln_ref[0:1, :] + ln_ref[1:2, :], 0.0)

    # ---- conv2: one zero super-row of H padding top/bottom + 3 banded taps ---
    zb = z.astype(b2_ref.dtype)
    zrow = jnp.zeros((1, zb.shape[1]), zb.dtype)
    zp = jnp.concatenate([zrow, zb, zrow], axis=0)       # (S+2, fold*W*C)
    acc2 = jnp.dot(zp[0:s], b2_ref[0],
                   preferred_element_type=jnp.float32, precision=conv_precision)
    for t in (1, 2):
        acc2 = acc2 + jnp.dot(zp[t:t + s], b2_ref[t],
                              preferred_element_type=jnp.float32,
                              precision=conv_precision)

    # ---- LayerNorm 2 ---------------------------------------------------------
    mean2 = jnp.dot(acc2, p, preferred_element_type=jnp.float32,
                    precision=ln_precision)
    d2 = acc2 - mean2
    var2 = jnp.dot(d2 * d2, p, preferred_element_type=jnp.float32,
                   precision=ln_precision)
    y = d2 * lax.rsqrt(var2 + eps) * ln_ref[2:3, :] + ln_ref[3:4, :]

    # ---- residual (separate lane-aligned f32 input) + ReLU -------------------
    o_ref[0] = jnp.maximum(y + res_ref[0], 0.0).astype(o_ref.dtype)


# -----------------------------------------------------------------------------
# One-time weight preparation (wrapper side)
# -----------------------------------------------------------------------------
def _row_banded_mats(w_hwio, w_img, keep_w_pad):
    """Per-kernel-row banded matrices: one (W+2)-wide zero-padded input row ->
    one W-wide output row, lane-flattened (width-major, channel-minor).  With
    keep_w_pad=False the two pad-column blocks are dropped (their data is zero
    anyway), so the matrix maps an unpadded W-wide row instead."""
    kh, kw, ci, co = w_hwio.shape
    mats = []
    for dh in range(kh):
        m = jnp.zeros(((w_img + 2) * ci, w_img * co), jnp.float32)
        for dw in range(kw):
            sel = jnp.zeros((w_img + 2, w_img), jnp.float32)
            sel = sel.at[jnp.arange(w_img) + dw, jnp.arange(w_img)].set(1.0)
            m = m + jnp.kron(sel, w_hwio[dh, dw].astype(jnp.float32))
        if not keep_w_pad:
            m = m[ci:-ci, :]
        mats.append(m)
    return mats


def _super_banded_conv_mats(w_hwio, w_img, fold, keep_w_pad):
    """Fold `fold` image rows into every lane row and return the 3 super-row
    tap matrices of the 3x3 conv.  Convention: the input array carries `fold`
    rows of zero H padding at its top (and bottom), so output super-row r
    reads input super-rows r, r+1, r+2."""
    kh = w_hwio.shape[0]
    rowm = _row_banded_mats(w_hwio, w_img, keep_w_pad)
    seg_in, seg_out = rowm[0].shape
    mats = [jnp.zeros((fold * seg_in, fold * seg_out), jnp.float32)
            for _ in range(3)]
    for j in range(fold):                    # output row inside the super-row
        for dh in range(kh):                 # conv kernel row
            q = j - 1 + dh                   # input-row offset from fold*r
            t = 1 + (q // fold)              # super-row tap in {0, 1, 2}
            pos = q % fold                   # row slot inside that super-row
            mats[t] = mats[t].at[pos * seg_in:(pos + 1) * seg_in,
                                 j * seg_out:(j + 1) * seg_out].add(rowm[dh])
    return jnp.stack(mats)                   # (3, fold*seg_in, fold*seg_out)


def _pick_fold(h_img, row_lanes, lane_multiple=128):
    """Smallest row-fold making the flattened lane width a multiple of
    `lane_multiple` (128; 256 can be used to fill the v6e/v7x MXU)."""
    if row_lanes % lane_multiple == 0:
        return 1
    f = lane_multiple // math.gcd(row_lanes, lane_multiple)
    if f <= h_img and h_img % f == 0:
        return f
    return 1


# -----------------------------------------------------------------------------
# Wrapper
# -----------------------------------------------------------------------------
def basic_block_forward(x_nchw, params, eps=1e-6, matmul_dtype=jnp.bfloat16,
                        lane_fold=None, out_dtype=jnp.float32):
    """Pallas forward of BasicBlock (stride=1, downsample=None).

    matmul_dtype=bfloat16 (default): bf16 MXU operands, f32 accumulation and
    single-pass LayerNorm statistics.  matmul_dtype=float32: exact module
    semantics (HIGHEST-precision matmuls everywhere)."""
    w1, w2 = params["w1"], params["w2"]                        # HWIO
    g1, b1, g2, b2 = params["g1"], params["b1"], params["g2"], params["b2"]
    N, Cin, H, W = x_nchw.shape
    C = w1.shape[3]
    assert Cin == w1.shape[2] and C == Cin, "residual add needs inplanes==planes"

    exact = np.dtype(matmul_dtype) == np.dtype(np.float32)
    conv_precision = lax.Precision.HIGHEST if exact else lax.Precision.DEFAULT
    ln_precision = conv_precision      # no HIGHEST LN stats on the bf16 path

    fold = lane_fold if lane_fold is not None else _pick_fold(H, W * C)
    assert H % fold == 0, "image height must be divisible by the row fold"
    S = H // fold
    lane_out = fold * W * C                    # flattened output lane width
    lane_in = fold * (W + 2) * Cin             # flattened padded-input width

    # ---- one-time weight preparation (exact f32 placement) ------------------
    B1 = _super_banded_conv_mats(w1, W, fold, keep_w_pad=True).astype(matmul_dtype)
    B2 = _super_banded_conv_mats(w2, W, fold, keep_w_pad=False).astype(matmul_dtype)
    P = jnp.kron(jnp.eye(fold * W, dtype=jnp.float32),
                 jnp.ones((C, C), jnp.float32) / C)            # channel-group mean
    ln = jnp.stack([jnp.tile(g1, fold * W), jnp.tile(b1, fold * W),
                    jnp.tile(g2, fold * W), jnp.tile(b2, fold * W)]
                   ).astype(jnp.float32)

    # ---- activations: NCHW -> NHWC, pad, fold rows into the lane axis -------
    x_nhwc = jnp.transpose(x_nchw, (0, 2, 3, 1)).astype(jnp.float32)
    x_pad = jnp.pad(x_nhwc, ((0, 0), (fold, fold), (1, 1), (0, 0)))
    x_sup = x_pad.reshape(N, S + 2, lane_in).astype(matmul_dtype)
    resid = x_nhwc.reshape(N, S, lane_out)     # f32, lane-aligned identity

    # ---- VMEM budget derived from actual block sizes (not hard-coded) -------
    def _nbytes(shape, dt):
        return int(np.prod(shape)) * np.dtype(dt).itemsize
    working = (_nbytes((1, S + 2, lane_in), matmul_dtype)
               + _nbytes((1, S, lane_out), jnp.float32)
               + _nbytes((3, lane_in, lane_out), matmul_dtype)
               + _nbytes((3, lane_out, lane_out), matmul_dtype)
               + _nbytes((lane_out, lane_out), jnp.float32)
               + _nbytes((4, lane_out), jnp.float32)
               + _nbytes((1, S, lane_out), out_dtype))
    vmem_limit = int(min(48 * 2 ** 20, max(16 * 2 ** 20, 4 * working)))

    kernel = functools.partial(_basic_block_kernel, eps=eps,
                               conv_precision=conv_precision,
                               ln_precision=ln_precision)

    # B1/B2/P/ln are grid-constant, so Pallas keeps the same block resident
    # across grid steps (no re-DMA).  On v7x with large W*C, additionally give
    # them pipeline_mode=pl.Buffered(1) / tile the output lanes to stay under
    # the 64 MiB VMEM ceiling.
    out_sup = pl.pallas_call(
        kernel,
        out_shape=jax.ShapeDtypeStruct((N, S, lane_out), out_dtype),
        grid_spec=pltpu.PrefetchScalarGridSpec(
            num_scalar_prefetch=0,
            grid=(N,),                              # whole image per grid step
            in_specs=[
                pl.BlockSpec((1, S + 2, lane_in), lambda b: (b, 0, 0)),
                pl.BlockSpec((1, S, lane_out), lambda b: (b, 0, 0)),
                pl.BlockSpec((3, lane_in, lane_out), lambda b: (0, 0, 0)),
                pl.BlockSpec((3, lane_out, lane_out), lambda b: (0, 0, 0)),
                pl.BlockSpec((lane_out, lane_out), lambda b: (0, 0)),
                pl.BlockSpec((4, lane_out), lambda b: (0, 0)),
            ],
            out_specs=pl.BlockSpec((1, S, lane_out), lambda b: (b, 0, 0)),
        ),
        compiler_params=pltpu.CompilerParams(
            dimension_semantics=("parallel",),
            vmem_limit_bytes=vmem_limit),
    )(x_sup, resid, B1, B2, P, ln)

    out_nhwc = out_sup.reshape(N, H, W, C)
    return jnp.transpose(out_nhwc, (0, 3, 1, 2))


# -----------------------------------------------------------------------------
# Parameters / reference
# -----------------------------------------------------------------------------
def init_params(key, inplanes, planes):
    """kaiming_normal(fan_in, relu) convs; ones/zeros LayerNorm (weight_init)."""
    k1, k2 = jax.random.split(key)
    std1 = (2.0 / (inplanes * 9)) ** 0.5
    std2 = (2.0 / (planes * 9)) ** 0.5
    w1_oihw = std1 * jax.random.normal(k1, (planes, inplanes, 3, 3), jnp.float32)
    w2_oihw = std2 * jax.random.normal(k2, (planes, planes, 3, 3), jnp.float32)
    return dict(
        w1=jnp.transpose(w1_oihw, (2, 3, 1, 0)),   # OIHW -> HWIO
        w2=jnp.transpose(w2_oihw, (2, 3, 1, 0)),
        g1=jnp.ones((planes,), jnp.float32),
        b1=jnp.zeros((planes,), jnp.float32),
        g2=jnp.ones((planes,), jnp.float32),
        b2=jnp.zeros((planes,), jnp.float32),
    )


def reference_forward(x_nchw, params, eps=1e-6, matmul_dtype=jnp.float32):
    """Pure-JAX reference.  matmul_dtype=float32 reproduces the exact PyTorch
    BasicBlock.  matmul_dtype=bfloat16 mirrors the kernel's default path at
    first order (bf16 convolution operands, f32 accumulation, f32 identity);
    the kernel additionally rounds its LayerNorm statistics to one bf16 MXU
    pass, which normalising over only C=4 channels can locally amplify."""
    def conv(x, w_hwio):
        return lax.conv_general_dilated(
            x.astype(matmul_dtype), w_hwio.astype(matmul_dtype),
            window_strides=(1, 1), padding=((1, 1), (1, 1)),
            dimension_numbers=("NCHW", "HWIO", "NCHW"),
            preferred_element_type=jnp.float32,
            precision=lax.Precision.HIGHEST)

    def ln_channels_first(x, g, b):
        u = jnp.mean(x, axis=1, keepdims=True)
        s = jnp.mean((x - u) ** 2, axis=1, keepdims=True)
        xh = (x - u) / jnp.sqrt(s + eps)
        return g[None, :, None, None] * xh + b[None, :, None, None]

    identity = x_nchw.astype(jnp.float32)
    out = conv(x_nchw, params["w1"])
    out = jnp.maximum(ln_channels_first(out, params["g1"], params["b1"]), 0.0)
    out = conv(out, params["w2"])
    out = ln_channels_first(out, params["g2"], params["b2"])
    return jnp.maximum(out + identity, 0.0)


if __name__ == "__main__":
    key = jax.random.PRNGKey(0)
    kx, kp = jax.random.split(key)

    N, C, H, W = 2, 4, 16, 16            # inplanes == planes (downsample=None)
    x = jax.random.normal(kx, (N, C, H, W), jnp.float32)
    params = init_params(kp, C, C)

    # (1) exact f32 MXU path: reproduces the PyTorch module.
    out_f32 = jax.block_until_ready(
        basic_block_forward(x, params, matmul_dtype=jnp.float32))
    ref_f32 = reference_forward(x, params, matmul_dtype=jnp.float32)
    assert out_f32.shape == (N, C, H, W)
    err_f32 = float(jnp.max(jnp.abs(out_f32 - ref_f32)))
    assert jnp.allclose(out_f32, ref_f32, atol=5e-4, rtol=5e-4), err_f32

    # (2) default bf16 MXU path, validated against a reference with bf16
    #     convolution operands (f32 accumulation, f32 identity).  The kernel's
    #     single-pass LayerNorm statistics add extra bf16 rounding that LN over
    #     only C=4 channels can amplify at isolated low-variance pixels, hence
    #     the looser tolerance.
    out_bf16 = jax.block_until_ready(basic_block_forward(x, params))
    ref_bf16 = reference_forward(x, params, matmul_dtype=jnp.bfloat16)
    err_bf16 = float(jnp.max(jnp.abs(out_bf16 - ref_bf16)))
    assert jnp.allclose(out_bf16, ref_bf16, atol=1.5e-1, rtol=5e-2), err_bf16

    print("KERNEL_OK")
</pallas_src>

<mosaic_0001>
module attributes {stable_mosaic.version = 11 : i64} {
  func.func @_basic_block_kernel(%arg0: i32, %arg1: memref<1x10x144xf32, #tpu.memory_space<vmem>>, %arg2: memref<1x8x128xf32, #tpu.memory_space<vmem>>, %arg3: memref<3x144x128xf32, #tpu.memory_space<vmem>>, %arg4: memref<3x128x128xf32, #tpu.memory_space<vmem>>, %arg5: memref<128x128xf32, #tpu.memory_space<vmem>>, %arg6: memref<4x128xf32, #tpu.memory_space<vmem>>, %arg7: memref<1x8x128xf32, #tpu.memory_space<vmem>>) attributes {dimension_semantics = [#tpu.dimension_semantics<parallel>], iteration_bounds = array<i64: 2>, scalar_prefetch = 0 : i64, scratch_operands = 0 : i64, tpu.core_type = #tpu.core_type<tc>, window_params = [{transform_indices = @transform_0, window_bounds = array<i64: 1, 10, 144>}, {transform_indices = @transform_1, window_bounds = array<i64: 1, 8, 128>}, {pipeline_mode = #tpu.pipeline_mode<synchronous>, transform_indices = @transform_2, window_bounds = array<i64: 3, 144, 128>}, {pipeline_mode = #tpu.pipeline_mode<synchronous>, transform_indices = @transform_3, window_bounds = array<i64: 3, 128, 128>}, {pipeline_mode = #tpu.pipeline_mode<synchronous>, transform_indices = @transform_4, window_bounds = array<i64: 128, 128>}, {pipeline_mode = #tpu.pipeline_mode<synchronous>, transform_indices = @transform_5, window_bounds = array<i64: 4, 128>}, {transform_indices = @transform_6, window_bounds = array<i64: 1, 8, 128>}]} {
    %c0 = arith.constant 0 : index
    %c0_0 = arith.constant 0 : index
    %c0_1 = arith.constant 0 : index
    %0 = vector.load %arg1[%c0, %c0_0, %c0_1] : memref<1x10x144xf32, #tpu.memory_space<vmem>>, vector<1x10x144xf32>
    %1 = vector.shape_cast %0 : vector<1x10x144xf32> to vector<10x144xf32>
    %2 = vector.extract_strided_slice %1 {offsets = [0, 0], sizes = [8, 144], strides = [1, 1]} : vector<10x144xf32> to vector<8x144xf32>
    %c0_2 = arith.constant 0 : index
    %c0_3 = arith.constant 0 : index
    %c0_4 = arith.constant 0 : index
    %3 = vector.load %arg3[%c0_2, %c0_3, %c0_4] : memref<3x144x128xf32, #tpu.memory_space<vmem>>, vector<1x144x128xf32>
    %4 = vector.shape_cast %3 : vector<1x144x128xf32> to vector<144x128xf32>
    %cst = arith.constant dense<0.000000e+00> : vector<8x128xf32>
    %5 = tpu.matmul %2, %4, %cst {dimension_numbers = #tpu.dot_dimension_numbers<[1], [0], [0], [1], [0, 0, 1, 1], [], []>, precision = #tpu.contract_precision<fp32>} : vector<8x144xf32>, vector<144x128xf32>, vector<8x128xf32> -> vector<8x128xf32>
    %6 = vector.extract_strided_slice %1 {offsets = [1, 0], sizes = [8, 144], strides = [1, 1]} : vector<10x144xf32> to vector<8x144xf32>
    %c1 = arith.constant 1 : index
    %c0_5 = arith.constant 0 : index
    %c0_6 = arith.constant 0 : index
    %7 = vector.load %arg3[%c1, %c0_5, %c0_6] : memref<3x144x128xf32, #tpu.memory_space<vmem>>, vector<1x144x128xf32>
    %8 = vector.shape_cast %7 : vector<1x144x128xf32> to vector<144x128xf32>
    %cst_7 = arith.constant dense<0.000000e+00> : vector<8x128xf32>
    %9 = tpu.matmul %6, %8, %cst_7 {dimension_numbers = #tpu.dot_dimension_numbers<[1], [0], [0], [1], [0, 0, 1, 1], [], []>, precision = #tpu.contract_precision<fp32>} : vector<8x144xf32>, vector<144x128xf32>, vector<8x128xf32> -> vector<8x128xf32>
    %10 = arith.addf %5, %9 : vector<8x128xf32>
    %11 = vector.extract_strided_slice %1 {offsets = [2, 0], sizes = [8, 144], strides = [1, 1]} : vector<10x144xf32> to vector<8x144xf32>
    %c2 = arith.constant 2 : index
    %c0_8 = arith.constant 0 : index
    %c0_9 = arith.constant 0 : index
    %12 = vector.load %arg3[%c2, %c0_8, %c0_9] : memref<3x144x128xf32, #tpu.memory_space<vmem>>, vector<1x144x128xf32>
    %13 = vector.shape_cast %12 : vector<1x144x128xf32> to vector<144x128xf32>
    %cst_10 = arith.constant dense<0.000000e+00> : vector<8x128xf32>
    %14 = tpu.matmul %11, %13, %cst_10 {dimension_numbers = #tpu.dot_dimension_numbers<[1], [0], [0], [1], [0, 0, 1, 1], [], []>, precision = #tpu.contract_precision<fp32>} : vector<8x144xf32>, vector<144x128xf32>, vector<8x128xf32> -> vector<8x128xf32>
    %15 = arith.addf %10, %14 : vector<8x128xf32>
    %c0_11 = arith.constant 0 : index
    %c0_12 = arith.constant 0 : index
    %16 = vector.load %arg5[%c0_11, %c0_12] : memref<128x128xf32, #tpu.memory_space<vmem>>, vector<128x128xf32>
    %cst_13 = arith.constant dense<0.000000e+00> : vector<8x128xf32>
    %17 = tpu.matmul %15, %16, %cst_13 {dimension_numbers = #tpu.dot_dimension_numbers<[1], [0], [0], [1], [0, 0, 1, 1], [], []>, precision = #tpu.contract_precision<fp32>} : vector<8x128xf32>, vector<128x128xf32>, vector<8x128xf32> -> vector<8x128xf32>
    %18 = arith.subf %15, %17 : vector<8x128xf32>
    %19 = arith.mulf %18, %18 : vector<8x128xf32>
    %cst_14 = arith.constant dense<0.000000e+00> : vector<8x128xf32>
    %20 = tpu.matmul %19, %16, %cst_14 {dimension_numbers = #tpu.dot_dimension_numbers<[1], [0], [0], [1], [0, 0, 1, 1], [], []>, precision = #tpu.contract_precision<fp32>} : vector<8x128xf32>, vector<128x128xf32>, vector<8x128xf32> -> vector<8x128xf32>
    %cst_15 = arith.constant 9.99999997E-7 : f32
    %21 = vector.broadcast %cst_15 : f32 to vector<8x128xf32>
    %22 = arith.addf %20, %21 : vector<8x128xf32>
    %23 = math.rsqrt %22 : vector<8x128xf32>
    %24 = arith.mulf %18, %23 : vector<8x128xf32>
    %c0_16 = arith.constant 0 : index
    %c0_17 = arith.constant 0 : index
    %25 = vector.load %arg6[%c0_16, %c0_17] : memref<4x128xf32, #tpu.memory_space<vmem>>, vector<1x128xf32>
    %26 = vector.broadcast %25 : vector<1x128xf32> to vector<8x128xf32>
    %27 = arith.mulf %24, %26 : vector<8x128xf32>
    %c1_18 = arith.constant 1 : index
    %c0_19 = arith.constant 0 : index
    %28 = vector.load %arg6[%c1_18, %c0_19] : memref<4x128xf32, #tpu.memory_space<vmem>>, vector<1x128xf32>
    %29 = vector.broadcast %28 : vector<1x128xf32> to vector<8x128xf32>
    %30 = arith.addf %27, %29 : vector<8x128xf32>
    %cst_20 = arith.constant 0.000000e+00 : f32
    %31 = vector.broadcast %cst_20 : f32 to vector<8x128xf32>
    %32 = arith.maximumf %30, %31 : vector<8x128xf32>
    %cst_21 = arith.constant 0.000000e+00 : f32
    %33 = vector.broadcast %cst_21 : f32 to vector<1x128xf32>
    %34 = tpu.concatenate %33, %32, %33 in 0 : vector<1x128xf32>, vector<8x128xf32>, vector<1x128xf32> -> vector<10x128xf32>
    %35 = vector.extract_strided_slice %34 {offsets = [0, 0], sizes = [8, 128], strides = [1, 1]} : vector<10x128xf32> to vector<8x128xf32>
    %c0_22 = arith.constant 0 : index
    %c0_23 = arith.constant 0 : index
    %c0_24 = arith.constant 0 : index
    %36 = vector.load %arg4[%c0_22, %c0_23, %c0_24] : memref<3x128x128xf32, #tpu.memory_space<vmem>>, vector<1x128x128xf32>
    %37 = vector.shape_cast %36 : vector<1x128x128xf32> to vector<128x128xf32>
    %cst_25 = arith.constant dense<0.000000e+00> : vector<8x128xf32>
    %38 = tpu.matmul %35, %37, %cst_25 {dimension_numbers = #tpu.dot_dimension_numbers<[1], [0], [0], [1], [0, 0, 1, 1], [], []>, precision = #tpu.contract_precision<fp32>} : vector<8x128xf32>, vector<128x128xf32>, vector<8x128xf32> -> vector<8x128xf32>
    %39 = vector.extract_strided_slice %34 {offsets = [1, 0], sizes = [8, 128], strides = [1, 1]} : vector<10x128xf32> to vector<8x128xf32>
    %c1_26 = arith.constant 1 : index
    %c0_27 = arith.constant 0 : index
    %c0_28 = arith.constant 0 : index
    %40 = vector.load %arg4[%c1_26, %c0_27, %c0_28] : memref<3x128x128xf32, #tpu.memory_space<vmem>>, vector<1x128x128xf32>
    %41 = vector.shape_cast %40 : vector<1x128x128xf32> to vector<128x128xf32>
    %cst_29 = arith.constant dense<0.000000e+00> : vector<8x128xf32>
    %42 = tpu.matmul %39, %41, %cst_29 {dimension_numbers = #tpu.dot_dimension_numbers<[1], [0], [0], [1], [0, 0, 1, 1], [], []>, precision = #tpu.contract_precision<fp32>} : vector<8x128xf32>, vector<128x128xf32>, vector<8x128xf32> -> vector<8x128xf32>
    %43 = arith.addf %38, %42 : vector<8x128xf32>
    %44 = vector.extract_strided_slice %34 {offsets = [2, 0], sizes = [8, 128], strides = [1, 1]} : vector<10x128xf32> to vector<8x128xf32>
    %c2_30 = arith.constant 2 : index
    %c0_31 = arith.constant 0 : index
    %c0_32 = arith.constant 0 : index
    %45 = vector.load %arg4[%c2_30, %c0_31, %c0_32] : memref<3x128x128xf32, #tpu.memory_space<vmem>>, vector<1x128x128xf32>
    %46 = vector.shape_cast %45 : vector<1x128x128xf32> to vector<128x128xf32>
    %cst_33 = arith.constant dense<0.000000e+00> : vector<8x128xf32>
    %47 = tpu.matmul %44, %46, %cst_33 {dimension_numbers = #tpu.dot_dimension_numbers<[1], [0], [0], [1], [0, 0, 1, 1], [], []>, precision = #tpu.contract_precision<fp32>} : vector<8x128xf32>, vector<128x128xf32>, vector<8x128xf32> -> vector<8x128xf32>
    %48 = arith.addf %43, %47 : vector<8x128xf32>
    %cst_34 = arith.constant dense<0.000000e+00> : vector<8x128xf32>
    %49 = tpu.matmul %48, %16, %cst_34 {dimension_numbers = #tpu.dot_dimension_numbers<[1], [0], [0], [1], [0, 0, 1, 1], [], []>, precision = #tpu.contract_precision<fp32>} : vector<8x128xf32>, vector<128x128xf32>, vector<8x128xf32> -> vector<8x128xf32>
    %50 = arith.subf %48, %49 : vector<8x128xf32>
    %51 = arith.mulf %50, %50 : vector<8x128xf32>
    %cst_35 = arith.constant dense<0.000000e+00> : vector<8x128xf32>
    %52 = tpu.matmul %51, %16, %cst_35 {dimension_numbers = #tpu.dot_dimension_numbers<[1], [0], [0], [1], [0, 0, 1, 1], [], []>, precision = #tpu.contract_precision<fp32>} : vector<8x128xf32>, vector<128x128xf32>, vector<8x128xf32> -> vector<8x128xf32>
    %cst_36 = arith.constant 9.99999997E-7 : f32
    %53 = vector.broadcast %cst_36 : f32 to vector<8x128xf32>
    %54 = arith.addf %52, %53 : vector<8x128xf32>
    %55 = math.rsqrt %54 : vector<8x128xf32>
    %56 = arith.mulf %50, %55 : vector<8x128xf32>
    %c2_37 = arith.constant 2 : index
    %c0_38 = arith.constant 0 : index
    %57 = vector.load %arg6[%c2_37, %c0_38] : memref<4x128xf32, #tpu.memory_space<vmem>>, vector<1x128xf32>
    %58 = vector.broadcast %57 : vector<1x128xf32> to vector<8x128xf32>
    %59 = arith.mulf %56, %58 : vector<8x128xf32>
    %c3 = arith.constant 3 : index
    %c0_39 = arith.constant 0 : index
    %60 = vector.load %arg6[%c3, %c0_39] : memref<4x128xf32, #tpu.memory_space<vmem>>, vector<1x128xf32>
    %61 = vector.broadcast %60 : vector<1x128xf32> to vector<8x128xf32>
    %62 = arith.addf %59, %61 : vector<8x128xf32>
    %c0_40 = arith.constant 0 : index
    %c0_41 = arith.constant 0 : index
    %c0_42 = arith.constant 0 : index
    %63 = vector.load %arg2[%c0_40, %c0_41, %c0_42] : memref<1x8x128xf32, #tpu.memory_space<vmem>>, vector<1x8x128xf32>
    %64 = vector.shape_cast %63 : vector<1x8x128xf32> to vector<8x128xf32>
    %65 = arith.addf %62, %64 : vector<8x128xf32>
    %cst_43 = arith.constant 0.000000e+00 : f32
    %66 = vector.broadcast %cst_43 : f32 to vector<8x128xf32>
    %67 = arith.maximumf %65, %66 : vector<8x128xf32>
    %c0_44 = arith.constant 0 : index
    %c0_45 = arith.constant 0 : index
    %c0_46 = arith.constant 0 : index
    %68 = vector.load %arg7[%c0_44, %c0_45, %c0_46] : memref<1x8x128xf32, #tpu.memory_space<vmem>>, vector<1x8x128xf32>
    %69 = vector.shape_cast %68 : vector<1x8x128xf32> to vector<8x128xf32>
    %70 = vector.shape_cast %67 : vector<8x128xf32> to vector<1x8x128xf32>
    tpu.vector_store %arg7[%c0_44, %c0_45, %c0_46], %70 {strides = array<i32>} : memref<1x8x128xf32, #tpu.memory_space<vmem>>, vector<1x8x128xf32>,
    return
  }
  func.func @transform_0(%arg0: i32) -> (i32, i32, i32) {
    %c0_i32 = arith.constant 0 : i32
    %c0_i32_0 = arith.constant 0 : i32
    %c0_i32_1 = arith.constant 0 : i32
    return %arg0, %c0_i32, %c0_i32_0 : i32, i32, i32
  }
  func.func @transform_1(%arg0: i32) -> (i32, i32, i32) {
    %c0_i32 = arith.constant 0 : i32
    %c0_i32_0 = arith.constant 0 : i32
    %c0_i32_1 = arith.constant 0 : i32
    return %arg0, %c0_i32, %c0_i32_0 : i32, i32, i32
  }
  func.func @transform_2(%arg0: i32) -> (i32, i32, i32) {
    %c0_i32 = arith.constant 0 : i32
    %c0_i32_0 = arith.constant 0 : i32
    %c0_i32_1 = arith.constant 0 : i32
    %c0_i32_2 = arith.constant 0 : i32
    return %c0_i32, %c0_i32_0, %c0_i32_1 : i32, i32, i32
  }
  func.func @transform_3(%arg0: i32) -> (i32, i32, i32) {
    %c0_i32 = arith.constant 0 : i32
    %c0_i32_0 = arith.constant 0 : i32
    %c0_i32_1 = arith.constant 0 : i32
    %c0_i32_2 = arith.constant 0 : i32
    return %c0_i32, %c0_i32_0, %c0_i32_1 : i32, i32, i32
  }
  func.func @transform_4(%arg0: i32) -> (i32, i32) {
    %c0_i32 = arith.constant 0 : i32
    %c0_i32_0 = arith.constant 0 : i32
    %c0_i32_1 = arith.constant 0 : i32
    return %c0_i32, %c0_i32_0 : i32, i32
  }
  func.func @transform_5(%arg0: i32) -> (i32, i32) {
    %c0_i32 = arith.constant 0 : i32
    %c0_i32_0 = arith.constant 0 : i32
    %c0_i32_1 = arith.constant 0 : i32
    return %c0_i32, %c0_i32_0 : i32, i32
  }
  func.func @transform_6(%arg0: i32) -> (i32, i32, i32) {
    %c0_i32 = arith.constant 0 : i32
    %c0_i32_0 = arith.constant 0 : i32
    %c0_i32_1 = arith.constant 0 : i32
    return %arg0, %c0_i32, %c0_i32_0 : i32, i32, i32
  }
}

</mosaic_0001>

<bundles_post_ra>
// kernel: tpu_custom_call.1
= control target key start
LH: loop header
LB: loop body
LE: loop exit
PB: predicated region body
PF: predicated region fallthrough
CT: control target
= control target key end

     0   :  { %11 = vsyncpa [#allocation3], 0  ;;  %s14288_s0 = inlined_call_operand.vmem [shape: f32[2,10,144], index: 0, kind: input, shape index: {}]   ;;  %s14289_s1 = inlined_call_operand.vmem [shape: f32[2,8,128], index: 1, kind: input, shape index: {}]   ;;  %s14290_s2 = inlined_call_operand.hbm [shape: f32[3,144,128], index: 2, kind: input, shape index: {}]   ;;  %s14291_s3 = inlined_call_operand.hbm [shape: f32[3,128,128], index: 3, kind: input, shape index: {}]   ;;  %s14292_s4 = inlined_call_operand.hbm [shape: f32[128,128], index: 4, kind: input, shape index: {}]   ;;  %s14293_s5 = inlined_call_operand.vmem [shape: f32[4,128], index: 5, kind: input, shape index: {}]   ;;  %s14294_s6 = inlined_call_operand.hbm [shape: f32[2,8,128], index: 6, kind: output, shape index: {}]  }
   0x1   :  { %12 = vsyncpa [#allocation6], 0 }
   0x2   :  { %13 = vsyncpa [#allocation4], 0 }
   0x3   :  { %15 = vsyncpa [#allocation4 + $0x1], 0  ;;  %s11251_s21 = smov 0   ;;  %s11253_s22 = smov 0  }
   0x4   :  { %s11255_s23 = smov 0   ;;  %s11257_s24 = smov 0  }
   0x5 LB: > { %14427 = sst [smem:[#allocation12_spill]] %s11201_s23  ;;  %s11272_s25 = sadd.s32 4294967295, %s11205_s24   ;;  %s11205_s24 = sphi %s11257_s24, %s14576_s24   ;;  %s11201_s23 = sphi %s11255_s23, %s14573_s23   ;;  %s11197_s22 = sphi %s11253_s22, %s14575_s22   ;;  %s11193_s21 = sphi %s11251_s21, %s14574_s21  }
   0x6   : > { %s7162_s26 = sadd.s32 4294967294, %s11205_s24   ;;  %s11276_s27 = sadd.s32 1, %s11205_s24  }
   0x7   : > { %s164_s28 = sadd.s32 1, %s11201_s23  ;;  %s161_s29 = ssub.s32 %s11205_s24, %s11276_s27 }
   0x8   : > { %p174_p0 = scmp.ne.s32.totalorder %s11201_s23, %s11197_s22  ;;  %p162_p1 = scmp.eq.s32.totalorder %s161_s29, 0 }
   0x9   : > { %p175_p2 = scmp.eq.s32.totalorder %s11272_s25, 1  ;;  %p180_p3 = scmp.ne.s32.totalorder %s11197_s22, %s11193_s21 }
   0xa   : > { %p181_p4 = scmp.eq.s32.totalorder %s7162_s26, 1  ;;  %p7163_p7 = scmp.ge.s32.totalorder %s11205_s24, 1 }
   0xb   : > { %s11287_s30 = scalar_select %p162_p1, %s11201_s23, %s164_s28  }
   0xc   : > { %p11289_p5 = por %p175_p2, %p174_p0  ;;  %p11293_p6 = por %p181_p4, %p180_p3 }
   0xd   : > { %14428 = sst [smem:[#allocation13_spill]] %s11287_s30  ;;  %p188_p8 = scmp.lt.s32.totalorder %s11205_s24, 3 }
   0xe   : > { %s14429_s7 = scalar_select %p11289_p5, 1, 0 }
   0xf   : > { %s14430_s8 = scalar_select %p11293_p6, 1, 0 }
  0x10   : > { %p14295_p9 = scmp.eq.s32.totalorder %s11272_s25, 0  ;;  %p11300_p10 = pnand %p7163_p7, %p188_p8 }
  0x11   : > { %s11207_s10 = smov [#allocation5]   ;;  %s11208_s13 = smov [#allocation2]  }
  0x12   : > { %s14431_s9 = scalar_select %p11300_p10, 1, 0 }
  0x13   : > { %p10986_p11 = pneg %p11300_p10  ;;  %s213_s11 = sshll.u32 %s11207_s10, 4  ;;  %s11306_s11 = int_to_ptr.vmem [resolvable:$true] %s213_s11 }
  0x14   : > { %s200_s14 = sshll.u32 %s11208_s13, 4  ;;  %s11209_s15 = smov [#allocation7]   ;;  %s11314_s14 = int_to_ptr.vmem [resolvable:$true] %s200_s14 }
  0x15   : > { %p11310_p12 = pnand %p14295_p9, %p10986_p11  ;;  %s11316_s16 = sshll.u32 %s11209_s15, 4  ;;  %s227_s16 = int_to_ptr.vmem [resolvable:$true] %s11316_s16 }
  0x16   : > { %s11051_s19 = scalar_lea.hbm %s14291_s3, 6144 }
  0x17   : > { %p11052_p13 = scmp.ne.s32.totalorder %s14291_s3, %s11051_s19  ;;  %p11326_p0 = pneg %p11310_p12 }
  0x18   : > { %p11058_p3 = scmp.lt.u32.totalorder %s11051_s19, %s14291_s3 }
  0x19   : > { %p11054_p1 = pnand %p11326_p0, %p11052_p13 }
  0x1b   : > { %p11055_p2 = pneg %p11054_p1 }
  0x1d   : > { %p11060_p4 = pnand %p11058_p3, %p11055_p2 }
  0x1f   : > { %11063 = shalt.err (!%p11060_p4)
}
  0x20   : > { %s11064_s13 = scalar_lea.vmem %s11306_s11, 6144  ;;  %p11072_p9 = scmp.lt.s32.totalorder %s11306_s11, %s11306_s11 }
  0x21   : > { %p11065_p7 = scmp.ne.s32.totalorder %s11306_s11, %s11064_s13  ;;  %p11073_p6 = scmp.lt.s32.totalorder %s11064_s13, %s11064_s13 }
  0x23   : > { %p11067_p8 = pnand %p11065_p7, %p11326_p0  ;;  %p11074_p13 = por %p11073_p6, %p11072_p9 }
  0x25   : > { %p11068_p11 = pneg %p11067_p8 }
  0x27   : > { %p11075_p1 = pnand %p11074_p13, %p11068_p11 }
  0x29   : > { %11078 = shalt.err (!%p11075_p1)
}
  0x2a   : > { %s11210_s15 = smov 128   ;;  %s11211_s17 = smov 8  }
  0x2b   : > { %10992 = dma.hbm_to_vmem [thread:$0]  (!%p11310_p12), %s14291_s3, 6144, %s11306_s11, [#allocation6], %s11210_s15, %s11210_s15, %s11211_s17  }
  0x2c   : > { %s11079_s29 = scalar_lea.hbm %s14290_s2, 6912 }
  0x2d   : > { %p11080_p6 = scmp.ne.s32.totalorder %s14290_s2, %s11079_s29  ;;  %p11086_p3 = scmp.lt.u32.totalorder %s11079_s29, %s14290_s2 }
  0x2f   : > { %p11082_p9 = pnand %p11080_p6, %p11326_p0 }
  0x31   : > { %p11083_p2 = pneg %p11082_p9 }
  0x33   : > { %p11088_p4 = pnand %p11086_p3, %p11083_p2 }
  0x35   : > { %11091 = shalt.err (!%p11088_p4)
}
  0x36   : > { %s11092_s11 = scalar_lea.vmem %s11314_s14, 6912  ;;  %p11100_p13 = scmp.lt.s32.totalorder %s11314_s14, %s11314_s14 }
  0x37   : > { %p11093_p7 = scmp.ne.s32.totalorder %s11314_s14, %s11092_s11  ;;  %p11101_p1 = scmp.lt.s32.totalorder %s11092_s11, %s11092_s11 }
  0x39   : > { %p11095_p8 = pnand %p11093_p7, %p11326_p0  ;;  %p11102_p6 = por %p11101_p1, %p11100_p13 }
  0x3b   : > { %p11096_p11 = pneg %p11095_p8 }
  0x3d   : > { %p11103_p9 = pnand %p11102_p6, %p11096_p11 }
  0x3f   : > { %11106 = shalt.err (!%p11103_p9)
}
  0x40   : > { %10989 = dma.hbm_to_vmem [thread:$0]  (!%p11310_p12), %s14290_s2, 6912, %s11314_s14, [#allocation3], %s11210_s15, %s11210_s15, %s11211_s17  }
  0x41   : > { %s11107_s20 = scalar_lea.hbm %s14292_s4, 2048 }
  0x42   : > { %p11108_p2 = scmp.ne.s32.totalorder %s14292_s4, %s11107_s20  ;;  %p11114_p7 = scmp.lt.u32.totalorder %s11107_s20, %s14292_s4 }
  0x44   : > { %p11110_p3 = pnand %p11108_p2, %p11326_p0 }
  0x46   : > { %p11111_p4 = pneg %p11110_p3 }
  0x48   : > { %p11116_p8 = pnand %p11114_p7, %p11111_p4 }
  0x4a   : > { %11119 = shalt.err (!%p11116_p8)
}
  0x4b   : > { %s11120_s11 = scalar_lea.vmem %s227_s16, 2048  ;;  %p11128_p6 = scmp.lt.s32.totalorder %s227_s16, %s227_s16 }
  0x4c   : > { %p11121_p11 = scmp.ne.s32.totalorder %s227_s16, %s11120_s11  ;;  %p11129_p9 = scmp.lt.s32.totalorder %s11120_s11, %s11120_s11 }
  0x4e   : > { %p11123_p13 = pnand %p11121_p11, %p11326_p0  ;;  %p11130_p5 = por %p11129_p9, %p11128_p6 }
  0x50   : > { %p11124_p1 = pneg %p11123_p13 }
  0x52   : > { %p11131_p10 = pnand %p11130_p5, %p11124_p1 }
  0x54   : > { %11134 = shalt.err (!%p11131_p10)
}
  0x55   : > { %10995 = dma.hbm_to_vmem [thread:$0]  (!%p11310_p12), %s14292_s4, 2048, %s227_s16, [#allocation6], %s11210_s15, %s11210_s15, %s11211_s17  }
  0x56   : > { %p14434_p2 = scmp.ne.s32.totalorder %s14431_s9, 0 }
  0x58   : > { %260 = sbr.rel (%p14434_p2) target bundleno = 3305 (0xce9), region = 44 }
  0x5f   : > { %p14435_p0 = scmp.eq.s32.totalorder %s11272_s25, 0 }
  0x61   : > { %11180 = dma.done.wait (%p14435_p0), [#allocation3], 6912   ;;  %p14436_p3 = pmov %p14435_p0 }
  0x62   : > { %p14437_p5 = pmov %p14435_p0 }
  0x63   : > { %11182 = vsyncadd (%p14436_p3), [#allocation3], 4294960384 }
  0x64   : > { %11184 = dma.done.wait (%p14437_p5), [#allocation6], 8192   ;;  %p14438_p10 = pmov %p14435_p0 }
  0x65   : > { %v14326_v0 = vmov 0.0|0.0   ;;  %v11410_v1 = vld [vmem:[#allocation2 + $0x90] sm:$0xff]  ;;  %v11412_v2 = vld [vmem:[#allocation2 + $0x98] sm:$0xff]  ;;  %v11414_v3 = vld [vmem:[#allocation2 + $0xa0] sm:$0xff]  ;;  %p302_p12 = scmp.lt.s32.totalorder %s11272_s25, 1  ;;  %vm356_vm0 = vcmask 1046528  }
  0x66   : > { %11186 = vsyncadd (%p14438_p10), [#allocation6], 4294959104  ;;  %9396 = vmatprep.subr.bf16.mxu0 %v14326_v0  ;;  %9369 = vmatprep.subr.bf16.mxu1 %v14326_v0  ;;  %v368_v4 = vand.u32 4294901760, %v11410_v1  ;;  %v371_v5 = vand.u32 4294901760, %v11412_v2  ;;  %v11418_v6 = vld [vmem:[#allocation2 + $0xa8] sm:$0xff]  ;;  %v374_v7 = vand.u32 4294901760, %v11414_v3 }
  0x67   : > { %v11421_v8 = vld [vmem:[#allocation2 + $0xb0] sm:$0xff]  ;;  %v11423_v9 = vld [vmem:[#allocation2 + $0xb8] sm:$0xff]  ;;  %v377_v10 = vand.u32 4294901760, %v11418_v6  ;;  %v11428_v13 = vld [vmem:[#allocation2 + $0xc0] sm:$0xff]  ;;  %s11517_s9 = scalar_select %p302_p12, %s11272_s25, 1  ;;  %vm364_vm1 = vcmask 130048  }
  0x68   : > { %v14308_v11 = vand.u32 4294901760, %v11421_v8  ;;  %v14307_v12 = vand.u32 4294901760, %v11423_v9  ;;  %v11430_v14 = vld [vmem:[#allocation2 + $0xc8] sm:$0xff]  ;;  %v11435_v15 = vsub.f32 %v11410_v1, %v368_v4  ;;  %v11440_v16 = vsub.f32 %v11412_v2, %v371_v5  ;;  %v11501_v39 = vld [vmem:[#allocation2 + $0xd0] sm:$0xff]  ;;  %v11503_v40 = vld [vmem:[#allocation2 + $0xd8] sm:$0xff]  ;;  %s299_s20 = sand.u32 1, %s11197_s22  }
  0x69   : > { %v11445_v17 = vsub.f32 %v11414_v3, %v374_v7  ;;  %v14306_v18 = vand.u32 4294901760, %v11428_v13  ;;  %v11451_v19 = vsub.f32 %v11418_v6, %v377_v10  ;;  %v14305_v22 = vand.u32 4294901760, %v11430_v14  ;;  %v11505_v44 = vld [vmem:[#allocation2 + $0xe0] sm:$0xff]  ;;  %v11510_v47 = vld [vmem:[#allocation2 + $0xe8] sm:$0xff]  ;;  %v11512_v48 = vld [vmem:[#allocation2 + $0xf0] sm:$0xff]  ;;  %s7184_s12 = sshll.u32 %s11517_s9, 5 }
  0x6a   : > { %v11456_v20 = vsub.f32 %v11421_v8, %v14308_v11  ;;  %v11461_v21 = vsub.f32 %v11423_v9, %v14307_v12  ;;  %v14324_v23 = vand.u32 4294901760, %v11435_v15  ;;  %v14322_v24 = vand.u32 4294901760, %v11440_v16  ;;  %v11521_v53 = vld [vmem:[#allocation2 + $0xf8] sm:$0xff]  ;;  %v11523_v54 = vld [vmem:[#allocation2 + $0x100] sm:$0xff]  ;;  %v11541_v63 = vld [vmem:[#allocation2 + $0x108] sm:$0xff]  ;;  %s11581_s15 = scalar_lea.vmem %s14288_s0, %s7184_s12  ;;  %s7175_s26 = sshll.u32 %s11517_s9, 3 }
  0x6b   : > { %v14320_v25 = vand.u32 4294901760, %v11445_v17  ;;  %v11470_v26 = vsub.f32 %v11428_v13, %v14306_v18  ;;  %v14319_v27 = vand.u32 4294901760, %v11451_v19  ;;  %v11478_v30 = vsub.f32 %v11430_v14, %v14305_v22  ;;  %v11604_v11 = vld [vmem:[%s11581_s15 + $0x8] sm:$0xff]  ;;  %v11662_v1 = vld [vmem:[%s11581_s15 + $0x10] sm:$0x3]  ;;  %s7172_s13 = sshll.u32 %s299_s20, 3  ;;  %s310_s23 = scalar_lea.vmem %s14289_s1, %s7175_s26 }
  0x6c   : > { %v14318_v28 = vand.u32 4294901760, %v11456_v20  ;;  %v14317_v29 = vand.u32 4294901760, %v11461_v21  ;;  %v469_v31 = vsub.f32 %v11435_v15, %v14324_v23  ;;  %v476_v32 = vsub.f32 %v11440_v16, %v14322_v24  ;;  %14439 = vst [vmem:[#allocation14_spill] sm:$0xff] %v11604_v11  ;;  %s7181_s9 = sshll.u32 %s11272_s25, 7  ;;  %s301_s28 = scalar_lea.vmem [#allocation8], %s7172_s13 }
  0x6d   : > { %v483_v33 = vsub.f32 %v11445_v17, %v14320_v25  ;;  %v14316_v34 = vand.u32 4294901760, %v11470_v26  ;;  %v490_v35 = vsub.f32 %v11451_v19, %v14319_v27  ;;  %v14314_v38 = vand.u32 4294901760, %v11478_v30  ;;  %s14246_s18 = scalar_lea.hbm %s14294_s6, %s7181_s9  ;;  %s7047_s19 = scalar_lea.sflag [#allocation4], %s299_s20 }
  0x6e   : > { %v497_v36 = vsub.f32 %v11456_v20, %v14318_v28  ;;  %v504_v37 = vsub.f32 %v11461_v21, %v14317_v29  ;;  %v470_v41 = vand.u32 4294901760, %v469_v31  ;;  %v477_v42 = vand.u32 4294901760, %v476_v32  ;;  %p14570_p7 = scmp.ne.s32.totalorder %s14429_s7, 0  ;;  %s11215_s25 = smov [#allocation8]  }
  0x6f   : > { %v484_v43 = vand.u32 4294901760, %v483_v33  ;;  %v491_v45 = vand.u32 4294901760, %v490_v35  ;;  %v511_v46 = vsub.f32 %v11470_v26, %v14316_v34  ;;  %v14304_v51 = vand.u32 4294901760, %v11501_v39  ;;  %s11139_s29 = sshll.u32 %s11215_s25, 4  ;;  %s11140_s29 = int_to_ptr.vmem [resolvable:$false] %s11139_s29 }
  0x70   : > { %v9397_v49 = vpack.c.bf16 %v477_v42, %v470_v41  ;;  %v498_v50 = vand.u32 4294901760, %v497_v36  ;;  %v14303_v52 = vand.u32 4294901760, %v11503_v40  ;;  %v505_v56 = vand.u32 4294901760, %v504_v37  ;;  %s11141_s10 = scalar_lea.vmem %s11140_s29, 256 }
  0x71   : > { %v9400_v55 = vpack.c.bf16 %v491_v45, %v484_v43  ;;  %v518_v57 = vsub.f32 %v11478_v30, %v14314_v38  ;;  %v14299_v58 = vand.u32 4294901760, %v11505_v44  ;;  %v11532_v59 = vsub.f32 %v11501_v39, %v14304_v51 }
  0x72   : > { %9398 = vmatpush1.bf16.msra.mxu0 %v9397_v49  ;;  %v11537_v60 = vsub.f32 %v11503_v40, %v14303_v52  ;;  %v14300_v61 = vand.u32 4294901760, %v11510_v47  ;;  %v14301_v62 = vand.u32 4294901760, %v11512_v48  ;;  %v512_v31 = vand.u32 4294901760, %v511_v46  ;;  %v11595_v52 = vld [vmem:[#allocation2 + $0x118] sm:$0xff] }
  0x73   : > { %9399 = vmatprep.subr.bf16.mxu0 %v14326_v0  ;;  %v11547_v32 = vsub.f32 %v11505_v44, %v14299_v58  ;;  %v14302_v33 = vand.u32 4294901760, %v11521_v53  ;;  %v14311_v35 = vand.u32 4294901760, %v11523_v54  ;;  %v14313_v36 = vand.u32 4294901760, %v11532_v59 }
  0x74   : > { %v14310_v37 = vand.u32 4294901760, %v11537_v60  ;;  %v11557_v41 = vsub.f32 %v11510_v47, %v14300_v61  ;;  %v11562_v42 = vsub.f32 %v11512_v48, %v14301_v62  ;;  %v9403_v43 = vpack.c.bf16 %v505_v56, %v498_v50 }
  0x75   : > { %v14309_v45 = vand.u32 4294901760, %v11547_v32  ;;  %v11568_v46 = vsub.f32 %v11521_v53, %v14302_v33  ;;  %v14312_v49 = vand.u32 4294901760, %v11541_v63  ;;  %v519_v58 = vand.u32 4294901760, %v518_v57 }
  0x76   : > { %9401 = vmatpush1.bf16.msra.mxu0 %v9400_v55  ;;  %v525_v61 = vsub.f32 %v11532_v59, %v14313_v36  ;;  %v532_v62 = vsub.f32 %v11537_v60, %v14310_v37  ;;  %v14315_v50 = vand.u32 4294901760, %v11557_v41  ;;  %v11584_v55 = vld [vmem:[#allocation2 + $0x110] sm:$0xff]  ;;  %v552_v57 = vand.u32 4294901760, %v11562_v42 }
  0x77   : > { %9402 = vmatprep.subr.bf16.mxu0 %v14326_v0  ;;  %v539_v56 = vsub.f32 %v11547_v32, %v14309_v45  ;;  %v11593_v33 = vsub.f32 %v11523_v54, %v14311_v35  ;;  %v559_v18 = vand.u32 4294901760, %v11568_v46  ;;  %v11601_v12 = vsub.f32 %v11541_v63, %v14312_v49  ;;  %v11607_v45 = vld [vmem:[%s11581_s15 + $0x18] sm:$0x3] }
  0x78   : > { %v526_v51 = vand.u32 4294901760, %v525_v61  ;;  %v533_v22 = vand.u32 4294901760, %v532_v62  ;;  %14440 = vst [vmem:[#allocation15_spill] sm:$0xff] %v11607_v45  ;;  %v9406_v37 = vpack.c.bf16 %v519_v58, %v512_v31  ;;  %v546_v35 = vsub.f32 %v11557_v41, %v14315_v50 }
  0x79   : > { %v14321_v61 = vand.u32 4294901760, %v11584_v55  ;;  %v14323_v62 = vand.u32 4294901760, %v11595_v52  ;;  %v553_v49 = vsub.f32 %v11562_v42, %v552_v57  ;;  %v566_v36 = vand.u32 4294901760, %v11593_v33 }
  0x7a   : > { %9404 = vmatpush1.bf16.msra.mxu0 %v9403_v43  ;;  %v360_v38 = vrot.slane %v11604_v11, 1  ;;  %v361_v58 = vrot.slane %v11607_v45, 1  ;;  %v9409_v31 = vpack.c.bf16 %v533_v22, %v526_v51  ;;  %v540_v43 = vand.u32 4294901760, %v539_v56 }
  0x7b   : > { %9405 = vmatprep.subr.bf16.mxu0 %v14326_v0  ;;  %v560_v50 = vsub.f32 %v11568_v46, %v559_v18  ;;  %v573_v34 = vand.u32 4294901760, %v11601_v12  ;;  %v547_v29 = vand.u32 4294901760, %v546_v35  ;;  %v11624_v28 = vsub.f32 %v11584_v55, %v14321_v61 }
  0x7c   : > { %v11629_v27 = vsub.f32 %v11595_v52, %v14323_v62  ;;  %v362_v25 = vsel %vm356_vm0, %v360_v38, %v361_v58  ;;  %v567_v56 = vsub.f32 %v11593_v33, %v566_v36  ;;  %v11657_v23 = vpack.c.bf16 %v377_v10, %v374_v7 }
  0x7d   : > { %v365_v22 = vsel %vm364_vm1, %v362_v25, 0  ;;  %v561_v35 = vand.u32 4294901760, %v560_v50  ;;  %v9412_v61 = vpack.c.bf16 %v547_v29, %v540_v43  ;;  %v574_v24 = vsub.f32 %v11601_v12, %v573_v34  ;;  %v11651_v43 = vld [vmem:[%s11581_s15] sm:$0xff]  ;;  %s7060_s15 = sshll.u32 %s301_s28, 4  ;;  %s14248_s15 = int_to_ptr.vmem [resolvable:$true] %s7060_s15 }
  0x7e   : > { %9407 = vmatpush1.bf16.msra.mxu0 %v9406_v37  ;;  %v11634_v51 = vand.u32 4294901760, %v365_v22  ;;  %v554_v37 = vand.u32 4294901760, %v553_v49  ;;  %v580_v62 = vand.u32 4294901760, %v11624_v28  ;;  %v587_v38 = vand.u32 4294901760, %v11629_v27  ;;  %s11135_s26 = scalar_lea.vmem %s14248_s15, 128  ;;  %p11142_p13 = scmp.lt.s32.totalorder %s14248_s15, %s11140_s29 }
  0x7f   : > { %9408 = vmatprep.subr.bf16.mxu0 %v14326_v0  ;;  %v11646_v25 = vpack.c.bf16 %v371_v5, %v368_v4  ;;  %v568_v50 = vand.u32 4294901760, %v567_v56  ;;  %v575_v29 = vand.u32 4294901760, %v574_v24  ;;  %v14441_v2 = vand.u32 4294901760, %v11435_v15  ;;  %p11136_p4 = scmp.ne.s32.totalorder %s14248_s15, %s11135_s26  ;;  %p11143_p1 = scmp.lt.s32.totalorder %s11141_s10, %s11135_s26 }
  0x80   : > { %620 = vmatprep.mubr.f32.mxu0 %v11634_v51  ;;  %v9415_v49 = vpack.c.bf16 %v561_v35, %v554_v37  ;;  %v581_v58 = vsub.f32 %v11624_v28, %v580_v62  ;;  %v14442_v4 = vand.u32 4294901760, %v11440_v16  ;;  %v14443_v24 = vand.u32 4294901760, %v11445_v17 }
  0x81   : > { %9371 = vmatpush1.bf16.msra.mxu1 %v11646_v25  ;;  %v14444_v3 = vand.u32 4294901760, %v11451_v19  ;;  %v14445_v6 = vand.u32 4294901760, %v11456_v20  ;;  %v14446_v7 = vand.u32 4294901760, %v11461_v21  ;;  %v14448_v37 = vand.u32 4294901760, %v11470_v26  ;;  %p11137_p8 = pnand %p11136_p4, %p14570_p7  ;;  %p11144_p6 = por %p11143_p1, %p11142_p13 }
  0x82   : > { %9410 = vmatpush1.bf16.msra.mxu0 %v9409_v31  ;;  %v588_v31 = vsub.f32 %v11629_v27, %v587_v38  ;;  %v11668_v5 = vpack.c.bf16 %v14442_v4, %v14441_v2  ;;  %9372 = vmatprep.subr.bf16.mxu1 %v14326_v0  ;;  %v14449_v35 = vand.u32 4294901760, %v11478_v30  ;;  %v14451_v2 = vand.u32 4294901760, %v11532_v59 }
  0x83   : > { %9411 = vmatprep.subr.bf16.mxu0 %v14326_v0  ;;  %v11680_v10 = vpack.c.bf16 %v14446_v7, %v14445_v6  ;;  %v14452_v4 = vand.u32 4294901760, %v11537_v60  ;;  %v14454_v45 = vand.u32 4294901760, %v11557_v41  ;;  %v11701_v7 = vpack.c.bf16 %v559_v18, %v552_v57  ;;  %p11138_p11 = pneg %p11137_p8 }
  0x84   : > { %v11687_v56 = vpack.c.bf16 %v14449_v35, %v14448_v37  ;;  %v11704_v11 = vpack.c.bf16 %v573_v34, %v566_v36  ;;  %v11706_v37 = vpack.c.bf16 %v587_v38, %v580_v62  ;;  %v9418_v35 = vpack.c.bf16 %v575_v29, %v568_v50 }
  0x85   : > { %14447 = vst [vmem:[#allocation16_spill] sm:$0xff] %v11680_v10  ;;  %v589_v10 = vand.u32 4294901760, %v588_v31  ;;  %9374 = vmatpush1.bf16.msra.mxu1 %v11657_v23  ;;  %v14456_v18 = vand.u32 4294901760, %v11421_v8  ;;  %v14458_v62 = vand.u32 4294901760, %v11428_v13  ;;  %v14459_v38 = vand.u32 4294901760, %v11430_v14  ;;  %v317_v31 = vld [vmem:[#allocation2 + $0x10] sm:$0xff]  ;;  %p11145_p9 = pnand %p11144_p6, %p11138_p11 }
  0x86   : > { %9413 = vmatpush1.bf16.msra.mxu0 %v9412_v61  ;;  %v11674_v61 = vpack.c.bf16 %v14444_v3, %v14443_v24  ;;  %14450 = vst [vmem:[#allocation17_spill] sm:$0xff] %v11687_v56  ;;  %v11693_v24 = vpack.c.bf16 %v14452_v4, %v14451_v2  ;;  %v14453_v3 = vand.u32 4294901760, %v11547_v32  ;;  %v582_v56 = vand.u32 4294901760, %v581_v58 }
  0x87   : > { %9414 = vmatprep.subr.bf16.mxu0 %v14326_v0  ;;  %v357_v0 = vrot.slane %v11651_v43, 1  ;;  %v358_v2 = vrot.slane %v11662_v1, 1  ;;  %v14455_v4 = vmov 0.0|0.0   ;;  %v14460_v13 = vand.u32 4294901760, %v11501_v39 }
  0x88   : > { %v11699_v6 = vpack.c.bf16 %v14454_v45, %v14453_v3  ;;  %9375 = vmatprep.subr.bf16.mxu1 %v14455_v4  ;;  %v14457_v45 = vand.u32 4294901760, %v11423_v9  ;;  %v9421_v36 = vpack.c.bf16 %v589_v10, %v582_v56  ;;  %v9424_v9 = vpack.c.bf16 %v11440_v16, %v11435_v15  ;;  %v319_v3 = vld [vmem:[#allocation2 + $0x20] sm:$0xff] }
  0x89   : > { %v359_v57 = vsel %vm356_vm0, %v357_v0, %v358_v2  ;;  %v11733_v0 = vsub.f32 %v365_v22, %v11634_v51  ;;  %v14461_v14 = vand.u32 4294901760, %v11503_v40  ;;  %v9427_v15 = vpack.c.bf16 %v11451_v19, %v11445_v17  ;;  %v321_v2 = vld [vmem:[#allocation2 + $0x30] sm:$0xff] }
  0x8a   : > { %9416 = vmatpush1.bf16.msra.mxu0 %v9415_v49  ;;  %v11716_v34 = vpack.c.bf16 %v14457_v45, %v14456_v18  ;;  %v11726_v49 = vpack.c.bf16 %v14459_v38, %v14458_v62  ;;  %v11728_v8 = vand.u32 4294901760, %v359_v57  ;;  %v14462_v16 = vand.u32 4294901760, %v11505_v44  ;;  %v322_v18 = vld [vmem:[#allocation2 + $0x38] sm:$0xff]  ;;  %v11894_v62 = vld [vmem:[#allocation2 + $0x48] sm:$0xff] }
  0x8b   : > { %9417 = vmatprep.subr.bf16.mxu0 %v14455_v4  ;;  %v11743_v50 = vpack.c.bf16 %v14461_v14, %v14460_v13  ;;  %v14463_v39 = vand.u32 4294901760, %v11510_v47  ;;  %v9430_v40 = vpack.c.bf16 %v11461_v21, %v11456_v20  ;;  %v14464_v17 = vand.u32 4294901760, %v11512_v48  ;;  %v11903_v13 = vld [vmem:[#allocation2 + $0x58] sm:$0xff] }
  0x8c   : > { %9377 = vmatpush1.bf16.msra.mxu1 %v11716_v34  ;;  %v14465_v19 = vand.u32 4294901760, %v11521_v53  ;;  %v9433_v44 = vpack.c.bf16 %v11478_v30, %v11470_v26  ;;  %v14466_v20 = vand.u32 4294901760, %v11523_v54  ;;  %v14467_v21 = vand.u32 4294901760, %v11541_v63 }
  0x8d   : > { %9378 = vmatprep.subr.bf16.mxu1 %v14455_v4  ;;  %v11755_v22 = vpack.c.bf16 %v14463_v39, %v14462_v16  ;;  %v9436_v48 = vpack.c.bf16 %v11537_v60, %v11532_v59  ;;  %v14468_v26 = vand.u32 4294901760, %v11584_v55  ;;  %v14469_v30 = vand.u32 4294901760, %v11595_v52  ;;  %v316_v55 = vld [vmem:[#allocation2 + $0x8] sm:$0xff]  ;;  %v11913_v16 = vld [vmem:[#allocation2 + $0x60] sm:$0xff] }
  0x8e   : > { %9419 = vmatpush1.bf16.msra.mxu0 %v9418_v35  ;;  %v11766_v29 = vpack.c.bf16 %v14465_v19, %v14464_v17  ;;  %v11777_v47 = vpack.c.bf16 %v14467_v21, %v14466_v20  ;;  %v9439_v54 = vpack.c.bf16 %v11557_v41, %v11547_v32  ;;  %v9442_v59 = vpack.c.bf16 %v11568_v46, %v11562_v42  ;;  %v315_v46 = vld [vmem:[#allocation2] sm:$0xff]  ;;  %v11915_v39 = vld [vmem:[#allocation2 + $0x68] sm:$0xff]  ;;  %v11933_v20 = vld [vmem:[#allocation2 + $0x70] sm:$0xff] }
  0x8f   : > { %9420 = vmatprep.subr.bf16.mxu0 %v14455_v4  ;;  %v11788_v53 = vpack.c.bf16 %v14469_v30, %v14468_v26  ;;  %v9445_v52 = vpack.c.bf16 %v11601_v12, %v11593_v33  ;;  %v9448_v60 = vpack.c.bf16 %v11629_v27, %v11624_v28  ;;  %v11805_v63 = vsub.f32 %v359_v57, %v11728_v8  ;;  %v14470_v27 = vld [vmem:[#allocation16_spill] sm:$0xff]  ;;  %v14471_v28 = vld [vmem:[#allocation17_spill] sm:$0xff]  ;;  %v323_v57 = vld [vmem:[#allocation2 + $0x40] sm:$0xff] }
  0x90   : > { %9380 = vmatpush1.bf16.msra.mxu1 %v11726_v49  ;;  %v14331_v32 = vand.u32 4294901760, %v11733_v0  ;;  %v1056_v10 = vand.u32 4294901760, %v317_v31  ;;  %v11935_v21 = vld [vmem:[#allocation2 + $0x78] sm:$0xff]  ;;  %v1092_v30 = vand.u32 4294901760, %v11933_v20  ;;  %vm1748_vm2 = vcmask 1045504  }
  0x91   : > { %9381 = vmatprep.subr.bf16.mxu1 %v14455_v4  ;;  %v14330_v12 = vand.u32 4294901760, %v11805_v63  ;;  %vm11213_vm3 = vmmov 0   ;;  %vm3757_vm4 = vcmask 1040384  }
  0x92   : > { %9422 = vmatpush1.bf16.msra.mxu0 %v9421_v36  ;;  %v1071_v36 = vand.u32 4294901760, %v322_v18 }
  0x93   : > { %9423 = vmatprep.subr.bf16.mxu0 %v14455_v4 }
  0x94   : > { %9383 = vmatpush1.bf16.msra.mxu1 %v11743_v50 }
  0x95   : > { %622 = vmatmul.mubr.f32.vlgmr.msra.gmra.mrb[0].mxu0 %v11728_v8  ;;  %9384 = vmatprep.subr.bf16.mxu1 %v14455_v4 }
  0x96   : > { %9425 = vmatpush1.bf16.msra.mxu0 %v9424_v9  ;;  %729 = vmatprep.mubr.f32.mxu0 %v11733_v0  ;;  %v11901_v9 = vld [vmem:[#allocation2 + $0x50] sm:$0xff] }
  0x97   : > { %9426 = vmatprep.subr.bf16.mxu0 %v14455_v4 }
  0x98   : > { %9386 = vmatpush1.bf16.msra.mxu1 %v11755_v22 }
  0x99   : > { %9387 = vmatprep.subr.bf16.mxu1 %v14455_v4 }
  0x9a   : > { %9428 = vmatpush1.bf16.msra.mxu0 %v9427_v15  ;;  %v1083_v15 = vand.u32 4294901760, %v11903_v13 }
  0x9b   : > { %9429 = vmatprep.subr.bf16.mxu0 %v14455_v4 }
  0x9c   : > { %9389 = vmatpush1.bf16.msra.mxu1 %v11766_v29 }
  0x9d   : > { %9390 = vmatprep.subr.bf16.mxu1 %v14455_v4 }
  0x9e   : > { %9431 = vmatpush1.bf16.msra.mxu0 %v9430_v40 }
  0x9f   : > { %9432 = vmatprep.subr.bf16.mxu0 %v14455_v4 }
  0xa0   : > { %9392 = vmatpush1.bf16.msra.mxu1 %v11777_v47 }
  0xa1   : > { %9393 = vmatprep.subr.bf16.mxu1 %v14455_v4 }
  0xa2   : > { %9434 = vmatpush1.bf16.msra.mxu0 %v9433_v44  ;;  %v1089_v44 = vand.u32 4294901760, %v11915_v39 }
  0xa3   : > { %9435 = vmatprep.subr.bf16.mxu0 %v14455_v4 }
  0xa4   : > { %9395 = vmatpush1.bf16.msra.mxu1 %v11788_v53 }
  0xa5   : > { %9855 = vmatprep.subr.bf16.mxu1 %v14455_v4 }
  0xa6   : > { %9437 = vmatpush1.bf16.msra.mxu0 %v9436_v48  ;;  %v11942_v48 = vsub.f32 %v317_v31, %v1056_v10 }
  0xa7   : > { %9438 = vmatprep.subr.bf16.mxu0 %v14455_v4 }
  0xaa   : > { %9440 = vmatpush1.bf16.msra.mxu0 %v9439_v54 }
  0xab   : > { %9441 = vmatprep.subr.bf16.mxu0 %v14455_v4 }
  0xae   : > { %9443 = vmatpush1.bf16.msra.mxu0 %v9442_v59 }
  0xaf   : > { %9444 = vmatprep.subr.bf16.mxu0 %v14455_v4 }
  0xb2   : > { %9446 = vmatpush1.bf16.msra.mxu0 %v9445_v52 }
  0xb3   : > { %9447 = vmatprep.subr.bf16.mxu0 %v14455_v4 }
  0xb6   : > { %9449 = vmatpush1.bf16.msra.mxu0 %v9448_v60  ;;  %v11958_v60 = vld [vmem:[#allocation2 + $0x80] sm:$0xff] }
  0xb7   : > { %9450 = vmatprep.subr.bf16.mxu0 %v14455_v4 }
  0xb9   : > { %732 = vmatmul.mubr.f32.vlgmr.msra.gmra.mrb[0].mxu0 %v11805_v63 }
  0xba   : > { %9452 = vmatpush1.bf16.msra.mxu0 %v11646_v25  ;;  %822 = vmatprep.mubr.f32.mxu0 %v14331_v32 }
  0xbb   : > { %9453 = vmatprep.subr.bf16.mxu0 %v14455_v4 }
  0xbe   : > { %9455 = vmatpush1.bf16.msra.mxu0 %v11657_v23 }
  0xbf   : > { %9456 = vmatprep.subr.bf16.mxu0 %v14455_v4 }
  0xc2   : > { %9458 = vmatpush1.bf16.msra.mxu0 %v11716_v34 }
  0xc3   : > { %9459 = vmatprep.subr.bf16.mxu0 %v14455_v4 }
  0xc6   : > { %9461 = vmatpush1.bf16.msra.mxu0 %v11726_v49 }
  0xc7   : > { %9462 = vmatprep.subr.bf16.mxu0 %v14455_v4 }
  0xca   : > { %9464 = vmatpush1.bf16.msra.mxu0 %v11743_v50 }
  0xcb   : > { %9465 = vmatprep.subr.bf16.mxu0 %v14455_v4 }
  0xce   : > { %9467 = vmatpush1.bf16.msra.mxu0 %v11755_v22 }
  0xcf   : > { %9468 = vmatprep.subr.bf16.mxu0 %v14455_v4 }
  0xd2   : > { %9470 = vmatpush1.bf16.msra.mxu0 %v11766_v29 }
  0xd3   : > { %9471 = vmatprep.subr.bf16.mxu0 %v14455_v4 }
  0xd6   : > { %9473 = vmatpush1.bf16.msra.mxu0 %v11777_v47 }
  0xd7   : > { %9474 = vmatprep.subr.bf16.mxu0 %v14455_v4 }
  0xda   : > { %9476 = vmatpush1.bf16.msra.mxu0 %v11788_v53 }
  0xdb   : > { %9477 = vmatprep.subr.bf16.mxu0 %v14455_v4 }
  0xdd   : > { %826 = vmatmul.mubr.f32.vlgmr.msra.gmra.mrb[0].mxu0 %v14330_v12  ;;  %v11998_v12 = vsub.f32 %v322_v18, %v1071_v36 }
  0xde   : > { %9479 = vmatpush1.bf16.msra.mxu0 %v11668_v5  ;;  %950 = vmatprep.mubr.f32.mxu0 %v11634_v51  ;;  %v318_v5 = vld [vmem:[#allocation2 + $0x18] sm:$0xff] }
  0xdf   : > { %9480 = vmatprep.subr.bf16.mxu0 %v14455_v4  ;;  %v1059_v56 = vand.u32 4294901760, %v318_v5 }
  0xe1   : > { %v11944_v26 = vsub.f32 %v318_v5, %v1059_v56 }
  0xe2   : > { %9482 = vmatpush1.bf16.msra.mxu0 %v11674_v61 }
  0xe3   : > { %9483 = vmatprep.subr.bf16.mxu0 %v14455_v4 }
  0xe6   : > { %9485 = vmatpush1.bf16.msra.mxu0 %v14470_v27  ;;  %v11960_v27 = vld [vmem:[#allocation2 + $0x88] sm:$0xff] }
  0xe7   : > { %9486 = vmatprep.subr.bf16.mxu0 %v14455_v4  ;;  %v1101_v31 = vand.u32 4294901760, %v11960_v27 }
  0xea   : > { %9488 = vmatpush1.bf16.msra.mxu0 %v14471_v28 }
  0xeb   : > { %9489 = vmatprep.subr.bf16.mxu0 %v14455_v4 }
  0xee   : > { %9491 = vmatpush1.bf16.msra.mxu0 %v11693_v24 }
  0xef   : > { %9492 = vmatprep.subr.bf16.mxu0 %v14455_v4 }
  0xf2   : > { %9494 = vmatpush1.bf16.msra.mxu0 %v11699_v6  ;;  %v320_v6 = vld [vmem:[#allocation2 + $0x28] sm:$0xff] }
  0xf3   : > { %9495 = vmatprep.subr.bf16.mxu0 %v14455_v4  ;;  %v1065_v35 = vand.u32 4294901760, %v320_v6 }
  0xf6   : > { %9497 = vmatpush1.bf16.msra.mxu0 %v11701_v7  ;;  %v11887_v7 = vpack.c.bf16 %v1059_v56, %v1056_v10 }
  0xf7   : > { %9498 = vmatprep.subr.bf16.mxu0 %v14455_v4 }
  0xfa   : > { %9500 = vmatpush1.bf16.msra.mxu0 %v11704_v11  ;;  %v14472_v11 = vld [vmem:[#allocation14_spill] sm:$0xff] }
  0xfb   : > { %9501 = vmatprep.subr.bf16.mxu0 %v14455_v4  ;;  %v1047_v33 = vsel %vm364_vm1, %v14472_v11, 0 }
  0xfc   : > { %v11865_v41 = vand.u32 4294901760, %v1047_v33 }
  0xfe   : > { %9503 = vmatpush1.bf16.msra.mxu0 %v11706_v37  ;;  %v1062_v37 = vand.u32 4294901760, %v319_v3 }
  0xff   : > { %9504 = vmatprep.subr.bf16.mxu0 %v14455_v4 }
 0x100   : > { %v11891_v45 = vpack.c.bf16 %v1065_v35, %v1062_v37  ;;  %v11962_v28 = vsub.f32 %v319_v3, %v1062_v37 }
 0x101   : > { %952 = vmatmul.mubr.f32.vlgmr.msra.gmra.mrb[0].mxu0 %v11728_v8 }
 0x102   : > { %9506 = vmatpush1.bf16.msra.mxu0 %v11646_v25  ;;  %1040 = vmatprep.mubr.f32.mxu0 %v11634_v51  ;;  %v1050_v51 = vand.u32 4294901760, %v315_v46  ;;  %v1053_v25 = vand.u32 4294901760, %v316_v55  ;;  %v1178_v37 = vand.u32 4294901760, %v11962_v28 }
 0x103   : > { %9507 = vmatprep.subr.bf16.mxu0 %v14455_v4 }
 0x104   : > { %v11882_v61 = vpack.c.bf16 %v1053_v25, %v1050_v51  ;;  %v11920_v40 = vsub.f32 %v315_v46, %v1050_v51  ;;  %v11922_v17 = vsub.f32 %v316_v55, %v1053_v25  ;;  %v11965_v46 = vsub.f32 %v320_v6, %v1065_v35 }
 0x105   : > { %v14332_v51 = vand.u32 4294901760, %v11942_v48  ;;  %v14333_v25 = vand.u32 4294901760, %v11944_v26  ;;  %v1179_v18 = vsub.f32 %v11962_v28, %v1178_v37 }
 0x106   : > { %9509 = vmatpush1.bf16.msra.mxu0 %v11657_v23  ;;  %v11870_v23 = vsub.f32 %v1047_v33, %v11865_v41  ;;  %v1150_v59 = vand.u32 4294901760, %v11920_v40  ;;  %v14335_v52 = vand.u32 4294901760, %v11922_v17  ;;  %v1185_v35 = vand.u32 4294901760, %v11965_v46 }
 0x107   : > { %9510 = vmatprep.subr.bf16.mxu0 %v14455_v4  ;;  %v1165_v3 = vsub.f32 %v11942_v48, %v14332_v51  ;;  %v1172_v6 = vsub.f32 %v11944_v26, %v14333_v25 }
 0x108   : > { %v1133_v42 = vand.u32 4294901760, %v11870_v23  ;;  %v1151_v5 = vsub.f32 %v11920_v40, %v1150_v59  ;;  %v1158_v10 = vsub.f32 %v11922_v17, %v14335_v52 }
 0x109   : > { %v1173_v52 = vand.u32 4294901760, %v1172_v6 }
 0x10a   : > { %9512 = vmatpush1.bf16.msra.mxu0 %v11716_v34  ;;  %v1134_v58 = vsub.f32 %v11870_v23, %v1133_v42  ;;  %v1068_v34 = vand.u32 4294901760, %v321_v2  ;;  %v1159_v32 = vand.u32 4294901760, %v1158_v10  ;;  %v1199_v10 = vand.u32 4294901760, %v11998_v12 }
 0x10b   : > { %9513 = vmatprep.subr.bf16.mxu0 %v14455_v4 }
 0x10c   : > { %v1135_v24 = vand.u32 4294901760, %v1134_v58  ;;  %v11897_v38 = vpack.c.bf16 %v1071_v36, %v1068_v34  ;;  %v1098_v58 = vand.u32 4294901760, %v11958_v60  ;;  %v11985_v56 = vsub.f32 %v321_v2, %v1068_v34 }
 0x10d   : > { %v1152_v34 = vand.u32 4294901760, %v1151_v5  ;;  %v1186_v36 = vsub.f32 %v11965_v46, %v1185_v35 }
 0x10e   : > { %9515 = vmatpush1.bf16.msra.mxu0 %v11726_v49  ;;  %v1074_v49 = vand.u32 4294901760, %v323_v57  ;;  %v12005_v2 = vpack.c.bf16 %v1101_v31, %v1098_v58 }
 0x10f   : > { %9516 = vmatprep.subr.bf16.mxu0 %v14455_v4 }
 0x110   : > { %v12008_v51 = vsub.f32 %v323_v57, %v1074_v49  ;;  %v9559_v57 = vpack.c.bf16 %v1159_v32, %v1152_v34  ;;  %v1187_v32 = vand.u32 4294901760, %v1186_v36  ;;  %v1200_v34 = vsub.f32 %v11998_v12, %v1199_v10 }
 0x112   : > { %9518 = vmatpush1.bf16.msra.mxu0 %v11743_v50  ;;  %v1080_v50 = vand.u32 4294901760, %v11901_v9  ;;  %v1201_v36 = vand.u32 4294901760, %v1200_v34  ;;  %v12086_v34 = vsub.f32 %v11958_v60, %v1098_v58 }
 0x113   : > { %9519 = vmatprep.subr.bf16.mxu0 %v14455_v4 }
 0x114   : > { %v11929_v19 = vpack.c.bf16 %v1083_v15, %v1080_v50 }
 0x116   : > { %9521 = vmatpush1.bf16.msra.mxu0 %v11755_v22  ;;  %v11918_v22 = vand.u32 4294901760, %v11651_v43 }
 0x117   : > { %9522 = vmatprep.subr.bf16.mxu0 %v14455_v4 }
 0x11a   : > { %9524 = vmatpush1.bf16.msra.mxu0 %v11766_v29  ;;  %v1086_v29 = vand.u32 4294901760, %v11913_v16 }
 0x11b   : > { %9525 = vmatprep.subr.bf16.mxu0 %v14455_v4 }
 0x11c   : > { %v11953_v54 = vpack.c.bf16 %v1089_v44, %v1086_v29 }
 0x11e   : > { %9527 = vmatpush1.bf16.msra.mxu0 %v11777_v47  ;;  %v11940_v47 = vsub.f32 %v11651_v43, %v11918_v22 }
 0x11f   : > { %9528 = vmatprep.subr.bf16.mxu0 %v14455_v4 }
 0x120   : > { %v14334_v33 = vand.u32 4294901760, %v11940_v47 }
 0x122   : > { %9530 = vmatpush1.bf16.msra.mxu0 %v11788_v53  ;;  %v1095_v53 = vand.u32 4294901760, %v11935_v21 }
 0x123   : > { %9531 = vmatprep.subr.bf16.mxu0 %v14455_v4 }
 0x124   : > { %v11971_v55 = vpack.c.bf16 %v1095_v53, %v1092_v30 }
 0x125   : > { %1042 = vmatmul.mubr.f32.vlgmr.msra.gmra.mrb[0].mxu0 %v11728_v8  ;;  %v1077_v8 = vand.u32 4294901760, %v11894_v62 }
 0x126   : > { %9533 = vmatpush1.bf16.msra.mxu0 %v11882_v61  ;;  %1136 = vmatprep.mubr.f32.mxu0 %v1135_v24  ;;  %v1140_v24 = vsub.f32 %v11940_v47, %v14334_v33  ;;  %v1166_v33 = vand.u32 4294901760, %v1165_v3  ;;  %v12033_v3 = vsub.f32 %v11903_v13, %v1083_v15  ;;  %v12048_v13 = vsub.f32 %v11913_v16, %v1086_v29 }
 0x127   : > { %9534 = vmatprep.subr.bf16.mxu0 %v14455_v4  ;;  %v11908_v14 = vpack.c.bf16 %v1077_v8, %v1074_v49  ;;  %v12019_v5 = vsub.f32 %v11894_v62, %v1077_v8  ;;  %v1192_v49 = vand.u32 4294901760, %v11985_v56  ;;  %v1180_v8 = vand.u32 4294901760, %v1179_v18 }
 0x128   : > { %v1141_v25 = vand.u32 4294901760, %v1140_v24  ;;  %v12028_v24 = vsub.f32 %v11901_v9, %v1080_v50  ;;  %v9562_v62 = vpack.c.bf16 %v1173_v52, %v1166_v33  ;;  %v1206_v9 = vand.u32 4294901760, %v12008_v51 }
 0x129   : > { %v1193_v6 = vsub.f32 %v11985_v56, %v1192_v49  ;;  %v14338_v50 = vand.u32 4294901760, %v12019_v5  ;;  %v12053_v15 = vsub.f32 %v11915_v39, %v1089_v44  ;;  %v9565_v52 = vpack.c.bf16 %v1187_v32, %v1180_v8 }
 0x12a   : > { %9536 = vmatpush1.bf16.msra.mxu0 %v11887_v7  ;;  %v14337_v33 = vand.u32 4294901760, %v12028_v24  ;;  %v12067_v39 = vsub.f32 %v11933_v20, %v1092_v30  ;;  %v12080_v32 = vsub.f32 %v11935_v21, %v1095_v53  ;;  %v12097_v53 = vsub.f32 %v11960_v27, %v1101_v31 }
 0x12b   : > { %9537 = vmatprep.subr.bf16.mxu0 %v14455_v4  ;;  %v1194_v18 = vand.u32 4294901760, %v1193_v6  ;;  %v1214_v16 = vsub.f32 %v12019_v5, %v14338_v50  ;;  %v1241_v8 = vand.u32 4294901760, %v12053_v15  ;;  %v1262_v31 = vand.u32 4294901760, %v12086_v34 }
 0x12c   : > { %v1221_v29 = vsub.f32 %v12028_v24, %v14337_v33  ;;  %v1248_v60 = vand.u32 4294901760, %v12067_v39  ;;  %v1255_v58 = vand.u32 4294901760, %v12080_v32 }
 0x12d   : > { %v9568_v20 = vpack.c.bf16 %v1201_v36, %v1194_v18  ;;  %v1215_v6 = vand.u32 4294901760, %v1214_v16  ;;  %v1242_v21 = vsub.f32 %v12053_v15, %v1241_v8 }
 0x12e   : > { %9539 = vmatpush1.bf16.msra.mxu0 %v11891_v45  ;;  %v1249_v16 = vsub.f32 %v12067_v39, %v1248_v60  ;;  %v1256_v27 = vsub.f32 %v12080_v32, %v1255_v58 }
 0x12f   : > { %9540 = vmatprep.subr.bf16.mxu0 %v14455_v4 }
 0x132   : > { %9542 = vmatpush1.bf16.msra.mxu0 %v11897_v38 }
 0x133   : > { %9543 = vmatprep.subr.bf16.mxu0 %v14455_v4 }
 0x136   : > { %9545 = vmatpush1.bf16.msra.mxu0 %v11908_v14 }
 0x137   : > { %9546 = vmatprep.subr.bf16.mxu0 %v14455_v4 }
 0x13a   : > { %9548 = vmatpush1.bf16.msra.mxu0 %v11929_v19 }
 0x13b   : > { %9549 = vmatprep.subr.bf16.mxu0 %v14455_v4 }
 0x13e   : > { %9551 = vmatpush1.bf16.msra.mxu0 %v11953_v54 }
 0x13f   : > { %9552 = vmatprep.subr.bf16.mxu0 %v14455_v4 }
 0x142   : > { %9554 = vmatpush1.bf16.msra.mxu0 %v11971_v55 }
 0x143   : > { %9555 = vmatprep.subr.bf16.mxu0 %v14455_v4 }
 0x146   : > { %9557 = vmatpush1.bf16.msra.mxu0 %v12005_v2 }
 0x147   : > { %9558 = vmatprep.subr.bf16.mxu0 %v14455_v4 }
 0x149   : > { %1142 = vmatmul.mubr.f32.vlgmr.msra.gmra.mrb[0].mxu0 %v1141_v25  ;;  %v14336_v25 = vand.u32 4294901760, %v12033_v3 }
 0x14a   : > { %9560 = vmatpush1.bf16.msra.mxu0 %v9559_v57  ;;  %1302 = vmatprep.mubr.f32.mxu0 %v11865_v41  ;;  %v1207_v57 = vsub.f32 %v12008_v51, %v1206_v9 }
 0x14b   : > { %9561 = vmatprep.subr.bf16.mxu0 %v14455_v4  ;;  %v1228_v44 = vsub.f32 %v12033_v3, %v14336_v25  ;;  %v1222_v25 = vand.u32 4294901760, %v1221_v29  ;;  %v1269_v29 = vand.u32 4294901760, %v12097_v53 }
 0x14c   : > { %v1208_v30 = vand.u32 4294901760, %v1207_v57  ;;  %v1243_v57 = vand.u32 4294901760, %v1242_v21 }
 0x14d   : > { %v1229_v33 = vand.u32 4294901760, %v1228_v44 }
 0x14e   : > { %9563 = vmatpush1.bf16.msra.mxu0 %v9562_v62  ;;  %v1234_v62 = vand.u32 4294901760, %v12048_v13 }
 0x14f   : > { %9564 = vmatprep.subr.bf16.mxu0 %v14455_v4  ;;  %v9574_v18 = vpack.c.bf16 %v1229_v33, %v1222_v25  ;;  %v1250_v33 = vand.u32 4294901760, %v1249_v16  ;;  %v1263_v25 = vsub.f32 %v12086_v34, %v1262_v31  ;;  %v9595_v16 = vpack.c.bf16 %v11998_v12, %v11985_v56 }
 0x150   : > { %v1235_v50 = vsub.f32 %v12048_v13, %v1234_v62  ;;  %v9658_v12 = vpack.c.bf16 %v1241_v8, %v1234_v62  ;;  %v1752_v56 = vrot.slane %v14472_v11, 2 }
 0x152   : > { %9566 = vmatpush1.bf16.msra.mxu0 %v9565_v52  ;;  %v9571_v52 = vpack.c.bf16 %v1215_v6, %v1208_v30  ;;  %v1236_v36 = vand.u32 4294901760, %v1235_v50  ;;  %v1257_v50 = vand.u32 4294901760, %v1256_v27  ;;  %v1264_v6 = vand.u32 4294901760, %v1263_v25 }
 0x153   : > { %9567 = vmatprep.subr.bf16.mxu0 %v14455_v4  ;;  %v9598_v27 = vpack.c.bf16 %v12019_v5, %v12008_v51  ;;  %v9610_v25 = vpack.c.bf16 %v12097_v53, %v12086_v34  ;;  %v9664_v51 = vpack.c.bf16 %v1269_v29, %v1262_v31  ;;  %v1750_v31 = vrot.slane %v11662_v1, 2 }
 0x154   : > { %v9577_v44 = vpack.c.bf16 %v1243_v57, %v1236_v36  ;;  %v9580_v30 = vpack.c.bf16 %v1257_v50, %v1250_v33  ;;  %v9589_v36 = vpack.c.bf16 %v11944_v26, %v11942_v48  ;;  %v9592_v57 = vpack.c.bf16 %v11965_v46, %v11962_v28 }
 0x155   : > { %v9604_v33 = vpack.c.bf16 %v12053_v15, %v12048_v13  ;;  %v9607_v50 = vpack.c.bf16 %v12080_v32, %v12067_v39  ;;  %v9661_v46 = vpack.c.bf16 %v1255_v58, %v1248_v60  ;;  %v1735_v15 = vld [vmem:[#allocation2 + $0x148] sm:$0xff]  ;;  %v12259_v32 = vld [vmem:[#allocation2 + $0x158] sm:$0xff] }
 0x156   : > { %9569 = vmatpush1.bf16.msra.mxu0 %v9568_v20  ;;  %v1270_v20 = vsub.f32 %v12097_v53, %v1269_v29  ;;  %v1774_v8 = vand.u32 4294901760, %v1735_v15  ;;  %v1780_v60 = vand.u32 4294901760, %v12259_v32  ;;  %v12268_v58 = vld [vmem:[#allocation2 + $0x168] sm:$0xff]  ;;  %v1749_v29 = vrot.slane %v11651_v43, 2 }
 0x157   : > { %9570 = vmatprep.subr.bf16.mxu0 %v14455_v4 }
 0x158   : > { %v1271_v21 = vand.u32 4294901760, %v1270_v20  ;;  %v14474_v20 = vand.u32 4294901760, %v11940_v47 }
 0x15a   : > { %9572 = vmatpush1.bf16.msra.mxu0 %v9571_v52  ;;  %v9583_v52 = vpack.c.bf16 %v1271_v21, %v1264_v6  ;;  %v14476_v6 = vand.u32 4294901760, %v11944_v26  ;;  %v14478_v26 = vand.u32 4294901760, %v12028_v24 }
 0x15b   : > { %9573 = vmatprep.subr.bf16.mxu0 %v14455_v4 }
 0x15e   : > { %9575 = vmatpush1.bf16.msra.mxu0 %v9574_v18  ;;  %v9586_v18 = vpack.c.bf16 %v11922_v17, %v11920_v40  ;;  %v9646_v40 = vpack.c.bf16 %v1185_v35, %v1178_v37  ;;  %v14480_v37 = vld [vmem:[#allocation15_spill] sm:$0xff] }
 0x15f   : > { %9576 = vmatprep.subr.bf16.mxu0 %v14455_v4  ;;  %v1753_v35 = vrot.slane %v14480_v37, 2 }
 0x162   : > { %9578 = vmatpush1.bf16.msra.mxu0 %v9577_v44  ;;  %v9601_v44 = vpack.c.bf16 %v12033_v3, %v12028_v24  ;;  %v1733_v24 = vld [vmem:[#allocation2 + $0x138] sm:$0xff] }
 0x163   : > { %9579 = vmatprep.subr.bf16.mxu0 %v14455_v4 }
 0x166   : > { %9581 = vmatpush1.bf16.msra.mxu0 %v9580_v30  ;;  %v14475_v30 = vand.u32 4294901760, %v11942_v48 }
 0x167   : > { %9582 = vmatprep.subr.bf16.mxu0 %v14455_v4 }
 0x168   : > { %v9643_v21 = vpack.c.bf16 %v14476_v6, %v14475_v30 }
 0x16a   : > { %9584 = vmatpush1.bf16.msra.mxu0 %v9583_v52 }
 0x16b   : > { %9585 = vmatprep.subr.bf16.mxu0 %v14455_v4 }
 0x16d   : > { %1304 = vmatmul.mubr.f32.vlgmr.msra.gmra.mrb[0].mxu0 %v11918_v22 }
 0x16e   : > { %9587 = vmatpush1.bf16.msra.mxu0 %v9586_v18  ;;  %1411 = vmatprep.mubr.f32.mxu0 %v11870_v23  ;;  %v14473_v23 = vand.u32 4294901760, %v11922_v17  ;;  %v9649_v17 = vpack.c.bf16 %v1199_v10, %v1192_v49  ;;  %v1732_v10 = vld [vmem:[#allocation2 + $0x130] sm:$0xff] }
 0x16f   : > { %9588 = vmatprep.subr.bf16.mxu0 %v14455_v4 }
 0x172   : > { %9590 = vmatpush1.bf16.msra.mxu0 %v9589_v36  ;;  %v1786_v36 = vand.u32 4294901760, %v12268_v58 }
 0x173   : > { %9591 = vmatprep.subr.bf16.mxu0 %v14455_v4 }
 0x176   : > { %9593 = vmatpush1.bf16.msra.mxu0 %v9592_v57  ;;  %v12278_v57 = vld [vmem:[#allocation2 + $0x170] sm:$0xff] }
 0x177   : > { %9594 = vmatprep.subr.bf16.mxu0 %v14455_v4  ;;  %v1789_v1 = vand.u32 4294901760, %v12278_v57 }
 0x17a   : > { %9596 = vmatpush1.bf16.msra.mxu0 %v9595_v16  ;;  %v12280_v16 = vld [vmem:[#allocation2 + $0x178] sm:$0xff] }
 0x17b   : > { %9597 = vmatprep.subr.bf16.mxu0 %v14455_v4 }
 0x17e   : > { %9599 = vmatpush1.bf16.msra.mxu0 %v9598_v27  ;;  %v1751_v27 = vsel %vm1748_vm2, %v1749_v29, %v1750_v31 }
 0x17f   : > { %9600 = vmatprep.subr.bf16.mxu0 %v14455_v4 }
 0x182   : > { %9602 = vmatpush1.bf16.msra.mxu0 %v9601_v44  ;;  %v1792_v44 = vand.u32 4294901760, %v12280_v16 }
 0x183   : > { %9603 = vmatprep.subr.bf16.mxu0 %v14455_v4 }
 0x186   : > { %9605 = vmatpush1.bf16.msra.mxu0 %v9604_v33  ;;  %v12291_v33 = vld [vmem:[#allocation2 + $0x180] sm:$0xff] }
 0x187   : > { %9606 = vmatprep.subr.bf16.mxu0 %v14455_v4  ;;  %v1795_v30 = vand.u32 4294901760, %v12291_v33 }
 0x18a   : > { %9608 = vmatpush1.bf16.msra.mxu0 %v9607_v50  ;;  %v12293_v50 = vld [vmem:[#allocation2 + $0x188] sm:$0xff] }
 0x18b   : > { %9609 = vmatprep.subr.bf16.mxu0 %v14455_v4  ;;  %v1798_v6 = vand.u32 4294901760, %v12293_v50 }
 0x18e   : > { %9611 = vmatpush1.bf16.msra.mxu0 %v9610_v25  ;;  %v12295_v25 = vand.u32 4294901760, %v1751_v27 }
 0x18f   : > { %9612 = vmatprep.subr.bf16.mxu0 %v14455_v4 }
 0x191   : > { %1414 = vmatmul.mubr.f32.vlgmr.msra.gmra.mrb[0].mxu0 %v11940_v47  ;;  %v14477_v47 = vand.u32 4294901760, %v12019_v5  ;;  %v1754_v5 = vsel %vm1748_vm2, %v1752_v56, %v1753_v35  ;;  %v12336_v56 = vld [vmem:[#allocation2 + $0x1a8] sm:$0xff] }
 0x192   : > { %9614 = vmatpush1.bf16.msra.mxu0 %v11882_v61  ;;  %1504 = vmatprep.mubr.f32.mxu0 %v1133_v42  ;;  %v9640_v42 = vpack.c.bf16 %v14473_v23, %v1150_v59  ;;  %v14479_v59 = vand.u32 4294901760, %v12033_v3  ;;  %v1765_v3 = vand.u32 4294901760, %v1732_v10 }
 0x193   : > { %9615 = vmatprep.subr.bf16.mxu0 %v14455_v4  ;;  %v9652_v48 = vpack.c.bf16 %v14477_v47, %v1206_v9  ;;  %v1768_v9 = vand.u32 4294901760, %v1733_v24 }
 0x194   : > { %v9655_v28 = vpack.c.bf16 %v14479_v59, %v14478_v26  ;;  %v12318_v47 = vsub.f32 %v1732_v10, %v1765_v3 }
 0x195   : > { %v12256_v39 = vpack.c.bf16 %v1768_v9, %v1765_v3 }
 0x196   : > { %9617 = vmatpush1.bf16.msra.mxu0 %v11887_v7 }
 0x197   : > { %9618 = vmatprep.subr.bf16.mxu0 %v14455_v4 }
 0x19a   : > { %9620 = vmatpush1.bf16.msra.mxu0 %v11891_v45 }
 0x19b   : > { %9621 = vmatprep.subr.bf16.mxu0 %v14455_v4 }
 0x19e   : > { %9623 = vmatpush1.bf16.msra.mxu0 %v11897_v38 }
 0x19f   : > { %9624 = vmatprep.subr.bf16.mxu0 %v14455_v4 }
 0x1a2   : > { %9626 = vmatpush1.bf16.msra.mxu0 %v11908_v14 }
 0x1a3   : > { %9627 = vmatprep.subr.bf16.mxu0 %v14455_v4 }
 0x1a6   : > { %9629 = vmatpush1.bf16.msra.mxu0 %v11929_v19 }
 0x1a7   : > { %9630 = vmatprep.subr.bf16.mxu0 %v14455_v4 }
 0x1aa   : > { %9632 = vmatpush1.bf16.msra.mxu0 %v11953_v54 }
 0x1ab   : > { %9633 = vmatprep.subr.bf16.mxu0 %v14455_v4 }
 0x1ae   : > { %9635 = vmatpush1.bf16.msra.mxu0 %v11971_v55 }
 0x1af   : > { %9636 = vmatprep.subr.bf16.mxu0 %v14455_v4 }
 0x1b2   : > { %9638 = vmatpush1.bf16.msra.mxu0 %v12005_v2 }
 0x1b3   : > { %9639 = vmatprep.subr.bf16.mxu0 %v14455_v4 }
 0x1b5   : > { %1508 = vmatmul.mubr.f32.vlgmr.msra.gmra.mrb[0].mxu0 %v14474_v20  ;;  %v12306_v20 = vpack.c.bf16 %v1792_v44, %v1789_v1 }
 0x1b6   : > { %9641 = vmatpush1.bf16.msra.mxu0 %v9640_v42  ;;  %1632 = vmatprep.mubr.f32.mxu0 %v11865_v41 }
 0x1b7   : > { %9642 = vmatprep.subr.bf16.mxu0 %v14455_v4 }
 0x1ba   : > { %9644 = vmatpush1.bf16.msra.mxu0 %v9643_v21  ;;  %v12310_v21 = vld [vmem:[#allocation2 + $0x190] sm:$0xff] }
 0x1bb   : > { %9645 = vmatprep.subr.bf16.mxu0 %v14455_v4  ;;  %v1801_v26 = vand.u32 4294901760, %v12310_v21 }
 0x1be   : > { %9647 = vmatpush1.bf16.msra.mxu0 %v9646_v40  ;;  %v12312_v40 = vld [vmem:[#allocation2 + $0x198] sm:$0xff] }
 0x1bf   : > { %9648 = vmatprep.subr.bf16.mxu0 %v14455_v4  ;;  %v1804_v59 = vand.u32 4294901760, %v12312_v40 }
 0x1c2   : > { %9650 = vmatpush1.bf16.msra.mxu0 %v9649_v17  ;;  %v12316_v17 = vsub.f32 %v1751_v27, %v12295_v25 }
 0x1c3   : > { %9651 = vmatprep.subr.bf16.mxu0 %v14455_v4 }
 0x1c4   : > { %v1848_v35 = vand.u32 4294901760, %v12316_v17 }
 0x1c6   : > { %9653 = vmatpush1.bf16.msra.mxu0 %v9652_v48  ;;  %v12320_v48 = vsub.f32 %v1733_v24, %v1768_v9  ;;  %v1849_v3 = vsub.f32 %v12316_v17, %v1848_v35 }
 0x1c7   : > { %9654 = vmatprep.subr.bf16.mxu0 %v14455_v4 }
 0x1c8   : > { %v1850_v29 = vand.u32 4294901760, %v1849_v3  ;;  %v12406_v3 = vsub.f32 %v12278_v57, %v1789_v1 }
 0x1ca   : > { %9656 = vmatpush1.bf16.msra.mxu0 %v9655_v28  ;;  %v12329_v28 = vpack.c.bf16 %v1798_v6, %v1795_v30 }
 0x1cb   : > { %9657 = vmatprep.subr.bf16.mxu0 %v14455_v4 }
 0x1ce   : > { %9659 = vmatpush1.bf16.msra.mxu0 %v9658_v12 }
 0x1cf   : > { %9660 = vmatprep.subr.bf16.mxu0 %v14455_v4 }
 0x1d2   : > { %9662 = vmatpush1.bf16.msra.mxu0 %v9661_v46 }
 0x1d3   : > { %9663 = vmatprep.subr.bf16.mxu0 %v14455_v4 }
 0x1d6   : > { %9665 = vmatpush1.bf16.msra.mxu0 %v9664_v51  ;;  %v12334_v51 = vld [vmem:[#allocation2 + $0x1a0] sm:$0xff] }
 0x1d7   : > { %9666 = vmatprep.subr.bf16.mxu0 %v14455_v4 }
 0x1d9   : > { %1634 = vmatmul.mubr.f32.vlgmr.msra.gmra.mrb[0].mxu0 %v11918_v22 }
 0x1da   : > { %9668 = vmatpush1.bf16.msra.mxu0 %v11882_v61  ;;  %1722 = vmatprep.mubr.f32.mxu0 %v11865_v41  ;;  %v1756_v41 = vsel %vm364_vm1, %v1754_v5, 0  ;;  %v12341_v5 = vsub.f32 %v1735_v15, %v1774_v8 }
 0x1db   : > { %9669 = vmatprep.subr.bf16.mxu0 %v14455_v4  ;;  %v12234_v61 = vand.u32 4294901760, %v1756_v41 }
 0x1dc   : > { %v1894_v15 = vand.u32 4294901760, %v12341_v5 }
 0x1dd   : > { %v12239_v11 = vsub.f32 %v1756_v41, %v12234_v61  ;;  %v12347_v41 = vpack.c.bf16 %v1804_v59, %v1801_v26 }
 0x1de   : > { %9671 = vmatpush1.bf16.msra.mxu0 %v11887_v7 }
 0x1df   : > { %9672 = vmatprep.subr.bf16.mxu0 %v14455_v4  ;;  %v1842_v7 = vand.u32 4294901760, %v12239_v11 }
 0x1e2   : > { %9674 = vmatpush1.bf16.msra.mxu0 %v11891_v45  ;;  %v1730_v45 = vld [vmem:[#allocation2 + $0x120] sm:$0xff] }
 0x1e3   : > { %9675 = vmatprep.subr.bf16.mxu0 %v14455_v4 }
 0x1e6   : > { %9677 = vmatpush1.bf16.msra.mxu0 %v11897_v38  ;;  %v1731_v38 = vld [vmem:[#allocation2 + $0x128] sm:$0xff] }
 0x1e7   : > { %9678 = vmatprep.subr.bf16.mxu0 %v14455_v4  ;;  %v1762_v49 = vand.u32 4294901760, %v1731_v38 }
 0x1e9   : > { %v12299_v42 = vsub.f32 %v1731_v38, %v1762_v49  ;;  %v14339_v38 = vand.u32 4294901760, %v12320_v48 }
 0x1ea   : > { %9680 = vmatpush1.bf16.msra.mxu0 %v11908_v14  ;;  %v1759_v14 = vand.u32 4294901760, %v1730_v45 }
 0x1eb   : > { %9681 = vmatprep.subr.bf16.mxu0 %v14455_v4  ;;  %v1866_v46 = vand.u32 4294901760, %v12299_v42 }
 0x1ec   : > { %v12297_v23 = vsub.f32 %v1730_v45, %v1759_v14  ;;  %v1873_v45 = vand.u32 4294901760, %v12318_v47 }
 0x1ed   : > { %v1867_v10 = vsub.f32 %v12299_v42, %v1866_v46 }
 0x1ee   : > { %9683 = vmatpush1.bf16.msra.mxu0 %v11929_v19  ;;  %v1843_v19 = vsub.f32 %v12239_v11, %v1842_v7  ;;  %v1859_v12 = vand.u32 4294901760, %v12297_v23  ;;  %v1874_v9 = vsub.f32 %v12318_v47, %v1873_v45 }
 0x1ef   : > { %9684 = vmatprep.subr.bf16.mxu0 %v14455_v4 }
 0x1f0   : > { %v1844_v13 = vand.u32 4294901760, %v1843_v19  ;;  %v1860_v19 = vsub.f32 %v12297_v23, %v1859_v12  ;;  %v1875_v27 = vand.u32 4294901760, %v1874_v9  ;;  %v12411_v9 = vsub.f32 %v12280_v16, %v1792_v44 }
 0x1f1   : > { %v12426_v16 = vsub.f32 %v12291_v33, %v1795_v30  ;;  %v12431_v44 = vsub.f32 %v12293_v50, %v1798_v6  ;;  %v12445_v50 = vsub.f32 %v12310_v21, %v1801_v26 }
 0x1f2   : > { %9686 = vmatpush1.bf16.msra.mxu0 %v11953_v54  ;;  %v12251_v54 = vpack.c.bf16 %v1762_v49, %v1759_v14  ;;  %v1807_v14 = vand.u32 4294901760, %v12334_v51  ;;  %v1810_v49 = vand.u32 4294901760, %v12336_v56 }
 0x1f3   : > { %9687 = vmatprep.subr.bf16.mxu0 %v14455_v4 }
 0x1f6   : > { %9689 = vmatpush1.bf16.msra.mxu0 %v11971_v55  ;;  %v1734_v55 = vld [vmem:[#allocation2 + $0x140] sm:$0xff] }
 0x1f7   : > { %9690 = vmatprep.subr.bf16.mxu0 %v14455_v4  ;;  %v1771_v62 = vand.u32 4294901760, %v1734_v55 }
 0x1f9   : > { %v12262_v34 = vpack.c.bf16 %v1774_v8, %v1771_v62  ;;  %v12338_v37 = vsub.f32 %v1734_v55, %v1771_v62  ;;  %v12375_v62 = vsub.f32 %v12259_v32, %v1780_v60  ;;  %v12382_v8 = vpack.c.bf16 %v1810_v49, %v1807_v14 }
 0x1fa   : > { %9692 = vmatpush1.bf16.msra.mxu0 %v12005_v2  ;;  %v1736_v2 = vld [vmem:[#allocation2 + $0x150] sm:$0xff] }
 0x1fb   : > { %9693 = vmatprep.subr.bf16.mxu0 %v14455_v4  ;;  %v1777_v53 = vand.u32 4294901760, %v1736_v2  ;;  %v1887_v55 = vand.u32 4294901760, %v12338_v37 }
 0x1fd   : > { %1724 = vmatmul.mubr.f32.vlgmr.msra.gmra.mrb[0].mxu0 %v11918_v22  ;;  %v12266_v22 = vld [vmem:[#allocation2 + $0x160] sm:$0xff]  ;;  %v12273_v52 = vpack.c.bf16 %v1780_v60, %v1777_v53  ;;  %v12361_v24 = vsub.f32 %v1736_v2, %v1777_v53  ;;  %v1861_v2 = vand.u32 4294901760, %v1860_v19  ;;  %v1868_v53 = vand.u32 4294901760, %v1867_v10 }
 0x1fe   : > { %9695 = vmatpush1.bf16.msra.mxu0 %v12251_v54  ;;  %1845 = vmatprep.mubr.f32.mxu0 %v1844_v13  ;;  %v1783_v18 = vand.u32 4294901760, %v12266_v22  ;;  %v1881_v13 = vsub.f32 %v12320_v48, %v14339_v38  ;;  %v1888_v32 = vsub.f32 %v12338_v37, %v1887_v55  ;;  %v1895_v60 = vsub.f32 %v12341_v5, %v1894_v15 }
 0x1ff   : > { %9696 = vmatprep.subr.bf16.mxu0 %v14455_v4  ;;  %v12397_v19 = vsub.f32 %v12268_v58, %v1786_v36  ;;  %v1908_v10 = vand.u32 4294901760, %v12375_v62 }
 0x200   : > { %v12286_v43 = vpack.c.bf16 %v1786_v36, %v1783_v18  ;;  %v12386_v31 = vsub.f32 %v12266_v22, %v1783_v18  ;;  %v1882_v38 = vand.u32 4294901760, %v1881_v13  ;;  %v9721_v22 = vpack.c.bf16 %v1868_v53, %v1861_v2 }
 0x201   : > { %v1901_v18 = vand.u32 4294901760, %v12361_v24  ;;  %v1889_v36 = vand.u32 4294901760, %v1888_v32  ;;  %v1896_v13 = vand.u32 4294901760, %v1895_v60  ;;  %v1909_v53 = vsub.f32 %v12375_v62, %v1908_v10 }
 0x202   : > { %9698 = vmatpush1.bf16.msra.mxu0 %v12256_v39  ;;  %v9724_v58 = vpack.c.bf16 %v1882_v38, %v1875_v27  ;;  %v1915_v57 = vand.u32 4294901760, %v12386_v31  ;;  %v14342_v1 = vand.u32 4294901760, %v12397_v19  ;;  %v14340_v27 = vand.u32 4294901760, %v12411_v9 }
 0x203   : > { %9699 = vmatprep.subr.bf16.mxu0 %v14455_v4  ;;  %v1902_v2 = vsub.f32 %v12361_v24, %v1901_v18  ;;  %v9727_v38 = vpack.c.bf16 %v1896_v13, %v1889_v36  ;;  %v1910_v60 = vand.u32 4294901760, %v1909_v53  ;;  %v1950_v36 = vand.u32 4294901760, %v12431_v44 }
 0x204   : > { %v1923_v33 = vsub.f32 %v12397_v19, %v14342_v1  ;;  %v1937_v6 = vsub.f32 %v12411_v9, %v14340_v27  ;;  %v12458_v13 = vsub.f32 %v12312_v40, %v1804_v59  ;;  %v12464_v53 = vsub.f32 %v12334_v51, %v1807_v14 }
 0x205   : > { %v1903_v32 = vand.u32 4294901760, %v1902_v2  ;;  %v1951_v40 = vsub.f32 %v12431_v44, %v1950_v36  ;;  %v12475_v59 = vsub.f32 %v12336_v56, %v1810_v49  ;;  %v14352_v51 = vand.u32 4294901760, %v12445_v50 }
 0x206   : > { %9701 = vmatpush1.bf16.msra.mxu0 %v12262_v34  ;;  %v1924_v2 = vand.u32 4294901760, %v1923_v33  ;;  %v14349_v14 = vand.u32 4294901760, %v12458_v13  ;;  %v14348_v49 = vand.u32 4294901760, %v12464_v53 }
 0x207   : > { %9702 = vmatprep.subr.bf16.mxu0 %v14455_v4  ;;  %v9730_v21 = vpack.c.bf16 %v1910_v60, %v1903_v32  ;;  %v1958_v33 = vsub.f32 %v12445_v50, %v14352_v51 }
 0x208   : > { %v1965_v56 = vsub.f32 %v12458_v13, %v14349_v14  ;;  %v9772_v14 = vpack.c.bf16 %v12475_v59, %v12464_v53 }
 0x20a   : > { %9704 = vmatpush1.bf16.msra.mxu0 %v12273_v52 }
 0x20b   : > { %9705 = vmatprep.subr.bf16.mxu0 %v14455_v4 }
 0x20e   : > { %9707 = vmatpush1.bf16.msra.mxu0 %v12286_v43 }
 0x20f   : > { %9708 = vmatprep.subr.bf16.mxu0 %v14455_v4 }
 0x212   : > { %9710 = vmatpush1.bf16.msra.mxu0 %v12306_v20 }
 0x213   : > { %9711 = vmatprep.subr.bf16.mxu0 %v14455_v4 }
 0x216   : > { %9713 = vmatpush1.bf16.msra.mxu0 %v12329_v28 }
 0x217   : > { %9714 = vmatprep.subr.bf16.mxu0 %v14455_v4 }
 0x21a   : > { %9716 = vmatpush1.bf16.msra.mxu0 %v12347_v41 }
 0x21b   : > { %9717 = vmatprep.subr.bf16.mxu0 %v14455_v4 }
 0x21e   : > { %9719 = vmatpush1.bf16.msra.mxu0 %v12382_v8 }
 0x21f   : > { %9720 = vmatprep.subr.bf16.mxu0 %v14455_v4 }
 0x221   : > { %1851 = vmatmul.mubr.f32.vlgmr.msra.gmra.mrb[0].mxu0 %v1850_v29  ;;  %v14341_v29 = vand.u32 4294901760, %v12406_v3 }
 0x222   : > { %9722 = vmatpush1.bf16.msra.mxu0 %v9721_v22  ;;  %2011 = vmatprep.mubr.f32.mxu0 %v12234_v61  ;;  %v1916_v22 = vsub.f32 %v12386_v31, %v1915_v57 }
 0x223   : > { %9723 = vmatprep.subr.bf16.mxu0 %v14455_v4  ;;  %v1930_v30 = vsub.f32 %v12406_v3, %v14341_v29  ;;  %v1938_v29 = vand.u32 4294901760, %v1937_v6 }
 0x224   : > { %v1917_v26 = vand.u32 4294901760, %v1916_v22  ;;  %v1952_v22 = vand.u32 4294901760, %v1951_v40 }
 0x225   : > { %v1931_v27 = vand.u32 4294901760, %v1930_v30  ;;  %v14347_v30 = vand.u32 4294901760, %v12475_v59 }
 0x226   : > { %9725 = vmatpush1.bf16.msra.mxu0 %v9724_v58  ;;  %v1943_v58 = vand.u32 4294901760, %v12426_v16 }
 0x227   : > { %9726 = vmatprep.subr.bf16.mxu0 %v14455_v4  ;;  %v9736_v32 = vpack.c.bf16 %v1938_v29, %v1931_v27  ;;  %v1959_v29 = vand.u32 4294901760, %v1958_v33  ;;  %v1972_v27 = vsub.f32 %v12464_v53, %v14348_v49  ;;  %v9757_v33 = vpack.c.bf16 %v12375_v62, %v12361_v24  ;;  %v12578_v49 = vld [vmem:[#allocation7 + $0x48] sm:$0xff] }
 0x228   : > { %v1944_v1 = vsub.f32 %v12426_v16, %v1943_v58  ;;  %v2483_v51 = vand.u32 4294901760, %v12578_v49  ;;  %v14494_v24 = vand.u32 4294901760, %v12464_v53 }
 0x22a   : > { %9728 = vmatpush1.bf16.msra.mxu0 %v9727_v38  ;;  %v9733_v38 = vpack.c.bf16 %v1924_v2, %v1917_v26  ;;  %v1945_v60 = vand.u32 4294901760, %v1944_v1  ;;  %v1966_v1 = vand.u32 4294901760, %v1965_v56  ;;  %v1973_v2 = vand.u32 4294901760, %v1972_v27 }
 0x22b   : > { %9729 = vmatprep.subr.bf16.mxu0 %v14455_v4  ;;  %v14481_v56 = vand.u32 4294901760, %v11733_v0 }
 0x22c   : > { %v9739_v6 = vpack.c.bf16 %v1952_v22, %v1945_v60  ;;  %v9742_v26 = vpack.c.bf16 %v1966_v1, %v1959_v29  ;;  %v9751_v60 = vpack.c.bf16 %v12320_v48, %v12318_v47  ;;  %v9754_v22 = vpack.c.bf16 %v12341_v5, %v12338_v37 }
 0x22d   : > { %v14482_v29 = vand.u32 4294901760, %v11805_v63  ;;  %v9820_v37 = vpack.c.bf16 %v1950_v36, %v1943_v58  ;;  %v14493_v5 = vand.u32 4294901760, %v12458_v13 }
 0x22e   : > { %9731 = vmatpush1.bf16.msra.mxu0 %v9730_v21  ;;  %v1979_v21 = vsub.f32 %v12475_v59, %v14347_v30 }
 0x22f   : > { %9732 = vmatprep.subr.bf16.mxu0 %v14455_v4  ;;  %v458_v1 = vsub.f32 %v11805_v63, %v14482_v29 }
 0x230   : > { %v1980_v40 = vand.u32 4294901760, %v1979_v21  ;;  %v9760_v21 = vpack.c.bf16 %v12397_v19, %v12386_v31  ;;  %v2453_v31 = vld [vmem:[#allocation7 + $0x70] sm:$0xff] }
 0x232   : > { %9734 = vmatpush1.bf16.msra.mxu0 %v9733_v38  ;;  %v9745_v38 = vpack.c.bf16 %v1980_v40, %v1973_v2  ;;  %v12521_v2 = vld [vmem:[#allocation7] sm:$0xff]  ;;  %v12523_v40 = vld [vmem:[#allocation7 + $0x8] sm:$0xff] }
 0x233   : > { %9735 = vmatprep.subr.bf16.mxu0 %v14455_v4  ;;  %v14344_v63 = vand.u32 4294901760, %v12521_v2 }
 0x236   : > { %9737 = vmatpush1.bf16.msra.mxu0 %v9736_v32  ;;  %v9748_v32 = vpack.c.bf16 %v12299_v42, %v12297_v23  ;;  %v9808_v23 = vpack.c.bf16 %v1894_v15, %v1887_v55  ;;  %v9811_v42 = vpack.c.bf16 %v1908_v10, %v1901_v18  ;;  %v14495_v55 = vand.u32 4294901760, %v12475_v59 }
 0x237   : > { %9738 = vmatprep.subr.bf16.mxu0 %v14455_v4  ;;  %v2498_v18 = vand.u32 4294901760, %v2453_v31 }
 0x238   : > { %v9826_v15 = vpack.c.bf16 %v14495_v55, %v14494_v24 }
 0x23a   : > { %9740 = vmatpush1.bf16.msra.mxu0 %v9739_v6  ;;  %v452_v6 = vsub.f32 %v11733_v0, %v14481_v56  ;;  %v9763_v0 = vpack.c.bf16 %v12411_v9, %v12406_v3  ;;  %v12536_v56 = vld [vmem:[#allocation7 + $0x20] sm:$0xff] }
 0x23b   : > { %9741 = vmatprep.subr.bf16.mxu0 %v14455_v4 }
 0x23c   : > { %v453_v27 = vand.u32 4294901760, %v452_v6  ;;  %v12538_v6 = vld [vmem:[#allocation7 + $0x28] sm:$0xff] }
 0x23e   : > { %9743 = vmatpush1.bf16.msra.mxu0 %v9742_v26  ;;  %v459_v26 = vand.u32 4294901760, %v458_v1  ;;  %454 = vmatprep.mubr.f32.mxu1 %v453_v27  ;;  %v9766_v1 = vpack.c.bf16 %v12431_v44, %v12426_v16 }
 0x23f   : > { %9744 = vmatprep.subr.bf16.mxu0 %v14455_v4 }
 0x240   : > { %460 = vmatmul.mubr.f32.vlgmr.msra.gmra.mrb[0].mxu1 %v459_v26  ;;  %v14350_v26 = vand.u32 4294901760, %v12538_v6 }
 0x242   : > { %9746 = vmatpush1.bf16.msra.mxu0 %v9745_v38  ;;  %v12525_v38 = vld [vmem:[#allocation7 + $0x10] sm:$0xff] }
 0x243   : > { %9747 = vmatprep.subr.bf16.mxu0 %v14455_v4 }
 0x245   : > { %2013 = vmatmul.mubr.f32.vlgmr.msra.gmra.mrb[0].mxu0 %v12295_v25 }
 0x246   : > { %9749 = vmatpush1.bf16.msra.mxu0 %v9748_v32  ;;  %2120 = vmatprep.mubr.f32.mxu0 %v12239_v11  ;;  %v14343_v32 = vand.u32 4294901760, %v12523_v40  ;;  %v9802_v11 = vpack.c.bf16 %v1866_v46, %v1859_v12  ;;  %v14491_v12 = vand.u32 4294901760, %v12411_v9  ;;  %v14354_v9 = vmov 0.0  }
 0x247   : > { %9750 = vmatprep.subr.bf16.mxu0 %v14455_v4  ;;  %7931 = vmatprep.mubr.msk.f32.mxu1 %vm11213_vm3, %v14354_v9 }
 0x248   : > { %v12544_v29 = vpack.c.bf16 %v14343_v32, %v14344_v63  ;;  %v12561_v32 = vld [vmem:[#allocation7 + $0x38] sm:$0xff]  ;;  %v9769_v63 = vpack.c.bf16 %v12458_v13, %v12445_v50 }
 0x249   : > { %v2477_v30 = vand.u32 4294901760, %v12561_v32 }
 0x24a   : > { %9752 = vmatpush1.bf16.msra.mxu0 %v9751_v60  ;;  %v12531_v60 = vld [vmem:[#allocation7 + $0x18] sm:$0xff]  ;;  %14483 = vst [vmem:[#allocation16_spill] sm:$0xff] %v12544_v29  ;;  %9857 = vmatpush3.bf16.msra.mxu1 %v12544_v29 }
 0x24b   : > { %9753 = vmatprep.subr.bf16.mxu0 %v14455_v4  ;;  %9858 = vmatprep.subr.bf16.mxu1 %v14455_v4 }
 0x24e   : > { %9755 = vmatpush1.bf16.msra.mxu0 %v9754_v22  ;;  %v14346_v22 = vand.u32 4294901760, %v12525_v38 }
 0x24f   : > { %9756 = vmatprep.subr.bf16.mxu0 %v14455_v4 }
 0x252   : > { %9758 = vmatpush1.bf16.msra.mxu0 %v9757_v33  ;;  %v14345_v33 = vand.u32 4294901760, %v12531_v60 }
 0x253   : > { %9759 = vmatprep.subr.bf16.mxu0 %v14455_v4 }
 0x254   : > { %v12553_v27 = vpack.c.bf16 %v14345_v33, %v14346_v22 }
 0x256   : > { %9761 = vmatpush1.bf16.msra.mxu0 %v9760_v21  ;;  %14484 = vst [vmem:[#allocation17_spill] sm:$0xff] %v12553_v27  ;;  %v14351_v21 = vand.u32 4294901760, %v12536_v56  ;;  %9860 = vmatpush3.bf16.msra.mxu1 %v12553_v27 }
 0x257   : > { %9762 = vmatprep.subr.bf16.mxu0 %v14455_v4  ;;  %9861 = vmatprep.subr.bf16.mxu1 %v14455_v4 }
 0x258   : > { %v12570_v33 = vpack.c.bf16 %v14350_v26, %v14351_v21 }
 0x25a   : > { %9764 = vmatpush1.bf16.msra.mxu0 %v9763_v0  ;;  %v12559_v0 = vld [vmem:[#allocation7 + $0x30] sm:$0xff]  ;;  %14485 = vst [vmem:[#allocation14_spill] sm:$0xff] %v12570_v33  ;;  %9863 = vmatpush3.bf16.msra.mxu1 %v12570_v33 }
 0x25b   : > { %9765 = vmatprep.subr.bf16.mxu0 %v14455_v4  ;;  %v2474_v22 = vand.u32 4294901760, %v12559_v0  ;;  %9864 = vmatprep.subr.bf16.mxu1 %v14455_v4 }
 0x25d   : > { %v12587_v26 = vpack.c.bf16 %v2477_v30, %v2474_v22 }
 0x25e   : > { %9767 = vmatpush1.bf16.msra.mxu0 %v9766_v1  ;;  %v12576_v1 = vld [vmem:[#allocation7 + $0x40] sm:$0xff] }
 0x25f   : > { %9768 = vmatprep.subr.bf16.mxu0 %v14455_v4  ;;  %14486 = vst [vmem:[#allocation15_spill] sm:$0xff] %v12587_v26  ;;  %v2480_v21 = vand.u32 4294901760, %v12576_v1  ;;  %9866 = vmatpush3.bf16.msra.mxu1 %v12587_v26 }
 0x260   : > { %9867 = vmatprep.subr.bf16.mxu1 %v14455_v4 }
 0x262   : > { %9770 = vmatpush1.bf16.msra.mxu0 %v9769_v63  ;;  %v12600_v63 = vpack.c.bf16 %v2483_v51, %v2480_v21 }
 0x263   : > { %9771 = vmatprep.subr.bf16.mxu0 %v14455_v4 }
 0x264   : > { %14487 = vst [vmem:[#allocation18_spill] sm:$0xff] %v12600_v63  ;;  %9869 = vmatpush3.bf16.msra.mxu1 %v12600_v63 }
 0x265   : > { %9870 = vmatprep.subr.bf16.mxu1 %v14455_v4 }
 0x266   : > { %9773 = vmatpush1.bf16.msra.mxu0 %v9772_v14 }
 0x267   : > { %9774 = vmatprep.subr.bf16.mxu0 %v14455_v4 }
 0x269   : > { %2123 = vmatmul.mubr.f32.vlgmr.msra.gmra.mrb[0].mxu0 %v12316_v17  ;;  %v14489_v17 = vand.u32 4294901760, %v12397_v19  ;;  %v2454_v19 = vld [vmem:[#allocation7 + $0x78] sm:$0xff] }
 0x26a   : > { %9776 = vmatpush1.bf16.msra.mxu0 %v12251_v54  ;;  %2213 = vmatprep.mubr.f32.mxu0 %v1842_v7  ;;  %v14488_v7 = vand.u32 4294901760, %v12320_v48  ;;  %v14490_v48 = vand.u32 4294901760, %v12406_v3  ;;  %v2501_v10 = vand.u32 4294901760, %v2454_v19 }
 0x26b   : > { %9777 = vmatprep.subr.bf16.mxu0 %v14455_v4  ;;  %v9814_v47 = vpack.c.bf16 %v14489_v17, %v1915_v57  ;;  %v12752_v17 = vsub.f32 %v2453_v31, %v2498_v18 }
 0x26c   : > { %v9805_v14 = vpack.c.bf16 %v14488_v7, %v1873_v45  ;;  %v9817_v46 = vpack.c.bf16 %v14491_v12, %v14490_v48  ;;  %v12718_v3 = vpack.c.bf16 %v2501_v10, %v2498_v18 }
 0x26e   : > { %9779 = vmatpush1.bf16.msra.mxu0 %v12256_v39  ;;  %14498 = vst [vmem:[#allocation21_spill] sm:$0xff] %v12718_v3 }
 0x26f   : > { %9780 = vmatprep.subr.bf16.mxu0 %v14455_v4 }
 0x272   : > { %9782 = vmatpush1.bf16.msra.mxu0 %v12262_v34 }
 0x273   : > { %9783 = vmatprep.subr.bf16.mxu0 %v14455_v4 }
 0x276   : > { %9785 = vmatpush1.bf16.msra.mxu0 %v12273_v52 }
 0x277   : > { %9786 = vmatprep.subr.bf16.mxu0 %v14455_v4 }
 0x27a   : > { %9788 = vmatpush1.bf16.msra.mxu0 %v12286_v43 }
 0x27b   : > { %9789 = vmatprep.subr.bf16.mxu0 %v14455_v4 }
 0x27e   : > { %9791 = vmatpush1.bf16.msra.mxu0 %v12306_v20 }
 0x27f   : > { %9792 = vmatprep.subr.bf16.mxu0 %v14455_v4 }
 0x282   : > { %9794 = vmatpush1.bf16.msra.mxu0 %v12329_v28 }
 0x283   : > { %9795 = vmatprep.subr.bf16.mxu0 %v14455_v4 }
 0x286   : > { %9797 = vmatpush1.bf16.msra.mxu0 %v12347_v41 }
 0x287   : > { %9798 = vmatprep.subr.bf16.mxu0 %v14455_v4 }
 0x28a   : > { %9800 = vmatpush1.bf16.msra.mxu0 %v12382_v8 }
 0x28b   : > { %9801 = vmatprep.subr.bf16.mxu0 %v14455_v4 }
 0x28d   : > { %2217 = vmatmul.mubr.f32.vlgmr.msra.gmra.mrb[0].mxu0 %v1848_v35  ;;  %v14492_v35 = vand.u32 4294901760, %v12445_v50 }
 0x28e   : > { %9803 = vmatpush1.bf16.msra.mxu0 %v9802_v11  ;;  %2341 = vmatprep.mubr.f32.mxu0 %v12234_v61 }
 0x28f   : > { %9804 = vmatprep.subr.bf16.mxu0 %v14455_v4  ;;  %v9823_v45 = vpack.c.bf16 %v14493_v5, %v14492_v35 }
 0x292   : > { %9806 = vmatpush1.bf16.msra.mxu0 %v9805_v14 }
 0x293   : > { %9807 = vmatprep.subr.bf16.mxu0 %v14455_v4 }
 0x296   : > { %9809 = vmatpush1.bf16.msra.mxu0 %v9808_v23 }
 0x297   : > { %9810 = vmatprep.subr.bf16.mxu0 %v14455_v4 }
 0x29a   : > { %9812 = vmatpush1.bf16.msra.mxu0 %v9811_v42 }
 0x29b   : > { %9813 = vmatprep.subr.bf16.mxu0 %v14455_v4 }
 0x29e   : > { %9815 = vmatpush1.bf16.msra.mxu0 %v9814_v47  ;;  %v12754_v47 = vsub.f32 %v2454_v19, %v2501_v10  ;;  %v14505_v19 = vand.u32 4294901760, %v12525_v38  ;;  %v14506_v10 = vand.u32 4294901760, %v12531_v60 }
 0x29f   : > { %9816 = vmatprep.subr.bf16.mxu0 %v14455_v4 }
 0x2a0   : > { %v14353_v35 = vand.u32 4294901760, %v12754_v47  ;;  %v12797_v18 = vsub.f32 %v12525_v38, %v14505_v19  ;;  %v12848_v19 = vsub.f32 %v12561_v32, %v2477_v30 }
 0x2a2   : > { %9818 = vmatpush1.bf16.msra.mxu0 %v9817_v46  ;;  %v2655_v24 = vsub.f32 %v12754_v47, %v14353_v35  ;;  %v2598_v32 = vand.u32 4294901760, %v12848_v19 }
 0x2a3   : > { %9819 = vmatprep.subr.bf16.mxu0 %v14455_v4 }
 0x2a6   : > { %9821 = vmatpush1.bf16.msra.mxu0 %v9820_v37  ;;  %v2647_v37 = vand.u32 4294901760, %v12752_v17 }
 0x2a7   : > { %9822 = vmatprep.subr.bf16.mxu0 %v14455_v4 }
 0x2aa   : > { %9824 = vmatpush1.bf16.msra.mxu0 %v9823_v45  ;;  %v2648_v45 = vsub.f32 %v12752_v17, %v2647_v37 }
 0x2ab   : > { %9825 = vmatprep.subr.bf16.mxu0 %v14455_v4 }
 0x2ac   : > { %v2649_v55 = vand.u32 4294901760, %v2648_v45 }
 0x2ae   : > { %9827 = vmatpush1.bf16.msra.mxu0 %v9826_v15  ;;  %v2656_v15 = vand.u32 4294901760, %v2655_v24 }
 0x2af   : > { %9828 = vmatprep.subr.bf16.mxu0 %v14455_v4 }
 0x2b1   : > { %2343 = vmatmul.mubr.f32.vlgmr.msra.gmra.mrb[0].mxu0 %v12295_v25 }
 0x2b2   : > { %9830 = vmatpush1.bf16.msra.mxu0 %v12251_v54  ;;  %2431 = vmatprep.mubr.f32.mxu0 %v12234_v61  ;;  %v2449_v61 = vld [vmem:[#allocation7 + $0x50] sm:$0xff]  ;;  %v2450_v54 = vld [vmem:[#allocation7 + $0x58] sm:$0xff] }
 0x2b3   : > { %9831 = vmatprep.subr.bf16.mxu0 %v14455_v4 }
 0x2b6   : > { %9833 = vmatpush1.bf16.msra.mxu0 %v12256_v39  ;;  %v2486_v39 = vand.u32 4294901760, %v2449_v61 }
 0x2b7   : > { %9834 = vmatprep.subr.bf16.mxu0 %v14455_v4 }
 0x2b8   : > { %v12728_v57 = vsub.f32 %v2449_v61, %v2486_v39  ;;  %v12768_v61 = vpack.c.bf16 %v2656_v15, %v2649_v55 }
 0x2ba   : > { %9836 = vmatpush1.bf16.msra.mxu0 %v12262_v34  ;;  %v2489_v34 = vand.u32 4294901760, %v2450_v54  ;;  %v2619_v44 = vand.u32 4294901760, %v12728_v57  ;;  %14499 = vst [vmem:[#allocation22_spill] sm:$0xff] %v12768_v61 }
 0x2bb   : > { %9837 = vmatprep.subr.bf16.mxu0 %v14455_v4 }
 0x2bc   : > { %v12730_v16 = vsub.f32 %v2450_v54, %v2489_v34  ;;  %v2620_v58 = vsub.f32 %v12728_v57, %v2619_v44 }
 0x2be   : > { %9839 = vmatpush1.bf16.msra.mxu0 %v12273_v52  ;;  %v2626_v50 = vand.u32 4294901760, %v12730_v16  ;;  %v2621_v59 = vand.u32 4294901760, %v2620_v58  ;;  %v12772_v54 = vpack.c.bf16 %v12730_v16, %v12728_v57  ;;  %v12802_v58 = vsub.f32 %v12531_v60, %v14506_v10 }
 0x2bf   : > { %9840 = vmatprep.subr.bf16.mxu0 %v14455_v4  ;;  %v14507_v60 = vand.u32 4294901760, %v12536_v56  ;;  %v14521_v57 = vand.u32 4294901760, %v12754_v47 }
 0x2c0   : > { %v2627_v53 = vsub.f32 %v12730_v16, %v2626_v50  ;;  %14500 = vst [vmem:[#allocation23_spill] sm:$0xff] %v12772_v54 }
 0x2c1   : > { %v13035_v16 = vpack.c.bf16 %v14521_v57, %v2647_v37  ;;  %v3785_v57 = vld [vmem:[#allocation5 + $0xc0] sm:$0xff] }
 0x2c2   : > { %9842 = vmatpush1.bf16.msra.mxu0 %v12286_v43  ;;  %v12706_v43 = vpack.c.bf16 %v2489_v34, %v2486_v39  ;;  %v2628_v14 = vand.u32 4294901760, %v2627_v53  ;;  %v12780_v34 = vpack.c.bf16 %v12754_v47, %v12752_v17 }
 0x2c3   : > { %9843 = vmatprep.subr.bf16.mxu0 %v14455_v4  ;;  %14522 = vst [vmem:[#allocation38_spill] sm:$0xff] %v13035_v16 }
 0x2c4   : > { %14496 = vst [vmem:[#allocation19_spill] sm:$0xff] %v12706_v43  ;;  %9872 = vmatpush3.bf16.msra.mxu1 %v12706_v43  ;;  %v12756_v48 = vpack.c.bf16 %v2628_v14, %v2621_v59  ;;  %14502 = vst [vmem:[#allocation25_spill] sm:$0xff] %v12780_v34  ;;  %v2563_v59 = vand.u32 4294901760, %v12797_v18 }
 0x2c5   : > { %9873 = vmatprep.subr.bf16.mxu1 %v14455_v4 }
 0x2c6   : > { %9845 = vmatpush1.bf16.msra.mxu0 %v12306_v20  ;;  %v2451_v20 = vld [vmem:[#allocation7 + $0x60] sm:$0xff] }
 0x2c7   : > { %9846 = vmatprep.subr.bf16.mxu0 %v14455_v4 }
 0x2ca   : > { %9848 = vmatpush1.bf16.msra.mxu0 %v12329_v28  ;;  %v2452_v28 = vld [vmem:[#allocation7 + $0x68] sm:$0xff] }
 0x2cb   : > { %9849 = vmatprep.subr.bf16.mxu0 %v14455_v4  ;;  %v2495_v62 = vand.u32 4294901760, %v2452_v28 }
 0x2cd   : > { %v12739_v13 = vsub.f32 %v2452_v28, %v2495_v62  ;;  %v14504_v28 = vand.u32 4294901760, %v12523_v40 }
 0x2ce   : > { %9851 = vmatpush1.bf16.msra.mxu0 %v12347_v41  ;;  %v2492_v41 = vand.u32 4294901760, %v2451_v20 }
 0x2cf   : > { %9852 = vmatprep.subr.bf16.mxu0 %v14455_v4  ;;  %v2640_v7 = vand.u32 4294901760, %v12739_v13 }
 0x2d0   : > { %v12737_v36 = vsub.f32 %v2451_v20, %v2492_v41 }
 0x2d1   : > { %v2641_v42 = vsub.f32 %v12739_v13, %v2640_v7 }
 0x2d2   : > { %9854 = vmatpush1.bf16.msra.mxu0 %v12382_v8  ;;  %v12712_v8 = vpack.c.bf16 %v2495_v62, %v2492_v41  ;;  %v2633_v11 = vand.u32 4294901760, %v12737_v36  ;;  %v12776_v39 = vpack.c.bf16 %v12739_v13, %v12737_v36  ;;  %v12790_v41 = vsub.f32 %v12523_v40, %v14504_v28 }
 0x2d3   : > { %10575 = vmatprep.subr.bf16.mxu0 %v14455_v4  ;;  %v2642_v46 = vand.u32 4294901760, %v2641_v42  ;;  %v12818_v42 = vsub.f32 %v12536_v56, %v14507_v60  ;;  %v12843_v28 = vsub.f32 %v12559_v0, %v2474_v22  ;;  %v12867_v60 = vsub.f32 %v12576_v1, %v2480_v21 }
 0x2d4   : > { %14497 = vst [vmem:[#allocation20_spill] sm:$0xff] %v12712_v8  ;;  %9875 = vmatpush3.bf16.msra.mxu1 %v12712_v8  ;;  %v2634_v23 = vsub.f32 %v12737_v36, %v2633_v11  ;;  %14501 = vst [vmem:[#allocation24_spill] sm:$0xff] %v12776_v39  ;;  %v2556_v31 = vand.u32 4294901760, %v12790_v41  ;;  %v2599_v21 = vsub.f32 %v12848_v19, %v2598_v32 }
 0x2d5   : > { %2433 = vmatmul.mubr.f32.vlgmr.msra.gmra.mrb[0].mxu0 %v12295_v25  ;;  %9876 = vmatprep.subr.bf16.mxu1 %v14455_v4  ;;  %v2591_v30 = vand.u32 4294901760, %v12843_v28  ;;  %v2605_v1 = vand.u32 4294901760, %v12867_v60 }
 0x2d6   : > { %10577 = vmatpush3.bf16.msra.mxu0 %v12544_v29  ;;  %8981 = vmatprep.mubr.msk.f32.mxu0 %vm11213_vm3, %v14354_v9  ;;  %v2635_v12 = vand.u32 4294901760, %v2634_v23  ;;  %v2557_v53 = vsub.f32 %v12790_v41, %v2556_v31  ;;  %v2570_v23 = vand.u32 4294901760, %v12802_v58 }
 0x2d7   : > { %10578 = vmatprep.subr.bf16.mxu0 %v14455_v4  ;;  %v2592_v35 = vsub.f32 %v12843_v28, %v2591_v30 }
 0x2d8   : > { %9878 = vmatpush3.bf16.msra.mxu1 %v12718_v3  ;;  %v12760_v5 = vpack.c.bf16 %v2642_v46, %v2635_v12  ;;  %v14508_v12 = vand.u32 4294901760, %v12538_v6  ;;  %v2558_v55 = vand.u32 4294901760, %v2557_v53  ;;  %v2571_v56 = vsub.f32 %v12802_v58, %v2570_v23 }
 0x2d9   : > { %9879 = vmatprep.subr.bf16.mxu1 %v14455_v4 }
 0x2da   : > { %10580 = vmatpush3.bf16.msra.mxu0 %v12553_v27  ;;  %v12823_v46 = vsub.f32 %v12538_v6, %v14508_v12  ;;  %v2577_v6 = vand.u32 4294901760, %v12818_v42  ;;  %v12872_v12 = vsub.f32 %v12578_v49, %v2483_v51 }
 0x2db   : > { %10581 = vmatprep.subr.bf16.mxu0 %v14455_v4 }
 0x2dc   : > { %v2578_v22 = vsub.f32 %v12818_v42, %v2577_v6  ;;  %v2612_v51 = vand.u32 4294901760, %v12872_v12 }
 0x2de   : > { %10583 = vmatpush3.bf16.msra.mxu0 %v12570_v33 }
 0x2df   : > { %10584 = vmatprep.subr.bf16.mxu0 %v14455_v4 }
 0x2e2   : > { %10586 = vmatpush3.bf16.msra.mxu0 %v12587_v26 }
 0x2e3   : > { %10587 = vmatprep.subr.bf16.mxu0 %v14455_v4 }
 0x2e6   : > { %10589 = vmatpush3.bf16.msra.mxu0 %v12600_v63 }
 0x2e7   : > { %10590 = vmatprep.subr.bf16.mxu0 %v14455_v4 }
 0x2ea   : > { %10592 = vmatpush3.bf16.msra.mxu0 %v12706_v43 }
 0x2eb   : > { %10593 = vmatprep.subr.bf16.mxu0 %v14455_v4 }
 0x2ee   : > { %10595 = vmatpush3.bf16.msra.mxu0 %v12712_v8 }
 0x2ef   : > { %10596 = vmatprep.subr.bf16.mxu0 %v14455_v4 }
 0x2f2   : > { %10598 = vmatpush3.bf16.msra.mxu0 %v12718_v3 }
 0x2f3   : > { %10599 = vmatprep.subr.bf16.mxu0 %v14455_v4 }
 0x313   : > { %v12704_v52 = vpop.f32.mrb[0].mxu1 }
 0x314   : > { %v463_v25 = vpop.f32.mrb[1].mxu1 }
 0x315   : > { %v14503_v25 = vand.u32 4294901760, %v12521_v2 }
 0x317   : > { %v12785_v20 = vsub.f32 %v12521_v2, %v14503_v25  ;;  %v2584_v25 = vand.u32 4294901760, %v12823_v46 }
 0x319   : > { %v2549_v62 = vand.u32 4294901760, %v12785_v20  ;;  %v2585_v0 = vsub.f32 %v12823_v46, %v2584_v25 }
 0x31b   : > { %v2550_v40 = vsub.f32 %v12785_v20, %v2549_v62 }
 0x31d   : > { %v2551_v24 = vand.u32 4294901760, %v2550_v40 }
 0x3a8   : > { %v2434_v2 = vpop.f32.mrb[0].mxu0 }
 0x3a9   : > { %v12812_v14 = vadd.f32 %v2434_v2, %v12704_v52  ;;  %v2436_v38 = vpop.f32.mrb[1].mxu0  ;;  %v2564_v52 = vsub.f32 %v12797_v18, %v2563_v59  ;;  %v12851_v2 = vpack.c.bf16 %v2558_v55, %v2551_v24 }
 0x3aa   : > { %v2572_v38 = vand.u32 4294901760, %v2571_v56  ;;  %v2586_v56 = vand.u32 4294901760, %v2585_v0 }
 0x3ab   : > { %v12826_v45 = vand.u32 4294901760, %v12812_v14  ;;  %v2565_v40 = vand.u32 4294901760, %v2564_v52  ;;  %v2579_v52 = vand.u32 4294901760, %v2578_v22  ;;  %v2613_v22 = vsub.f32 %v12872_v12, %v2612_v51 }
 0x3ad   : > { %v12833_v15 = vsub.f32 %v12812_v14, %v12826_v45  ;;  %v12874_v55 = vpack.c.bf16 %v2572_v38, %v2565_v40  ;;  %v12888_v49 = vpack.c.bf16 %v2586_v56, %v2579_v52  ;;  %v2593_v40 = vand.u32 4294901760, %v2592_v35 }
 0x3ae   : > { %v2606_v38 = vsub.f32 %v12867_v60, %v2605_v1  ;;  %v2614_v52 = vand.u32 4294901760, %v2613_v22  ;;  %v12915_v56 = vpack.c.bf16 %v12790_v41, %v12785_v20  ;;  %v12975_v22 = vpack.c.bf16 %v2556_v31, %v2549_v62 }
 0x3af   : > { %v2538_v10 = vand.u32 4294901760, %v12833_v15  ;;  %v12995_v20 = vpack.c.bf16 %v2584_v25, %v2577_v6  ;;  %v13003_v41 = vpack.c.bf16 %v2598_v32, %v2591_v30  ;;  %v13011_v62 = vpack.c.bf16 %v2612_v51, %v2605_v1 }
 0x3b0   : > { %14509 = vst [vmem:[#allocation26_spill] sm:$0xff] %v12915_v56  ;;  %14514 = vst [vmem:[#allocation31_spill] sm:$0xff] %v12975_v22  ;;  %v13019_v31 = vpack.c.bf16 %v2626_v50, %v2619_v44 }
 0x3b1   : > { %v2539_v53 = vsub.f32 %v12833_v15, %v2538_v10  ;;  %14516 = vst [vmem:[#allocation33_spill] sm:$0xff] %v12995_v20  ;;  %14517 = vst [vmem:[#allocation34_spill] sm:$0xff] %v13003_v41 }
 0x3b2   : > { %14518 = vst [vmem:[#allocation35_spill] sm:$0xff] %v13011_v62  ;;  %14519 = vst [vmem:[#allocation36_spill] sm:$0xff] %v13019_v31 }
 0x3b3   : > { %v2540_v24 = vand.u32 4294901760, %v2539_v53  ;;  %v2600_v53 = vand.u32 4294901760, %v2599_v21  ;;  %v12922_v21 = vpack.c.bf16 %v12802_v58, %v12797_v18  ;;  %v13027_v18 = vpack.c.bf16 %v2640_v7, %v2633_v11  ;;  %v3777_v58 = vld [vmem:[#allocation5 + $0x80] sm:$0xff] }
 0x3b5   : > { %7932 = vmatmul.mubr.f32.vlgmr.msra.gmra.mrb[2].mxu1 %v2540_v24  ;;  %v12899_v0 = vpack.c.bf16 %v2600_v53, %v2593_v40  ;;  %v2607_v24 = vand.u32 4294901760, %v2606_v38  ;;  %14510 = vst [vmem:[#allocation27_spill] sm:$0xff] %v12922_v21  ;;  %v12930_v40 = vpack.c.bf16 %v12823_v46, %v12818_v42  ;;  %v12936_v53 = vpack.c.bf16 %v12848_v19, %v12843_v28  ;;  %v3779_v46 = vld [vmem:[#allocation5 + $0x90] sm:$0xff]  ;;  %v3781_v28 = vld [vmem:[#allocation5 + $0xa0] sm:$0xff]  ;;  %v3782_v19 = vld [vmem:[#allocation5 + $0xa8] sm:$0xff] }
 0x3b6   : > { %9881 = vmatpush3.bf16.msra.mxu1 %v12851_v2  ;;  %7966 = vmatprep.mubr.msk.f32.mxu1 %vm11213_vm3, %v14354_v9  ;;  %v12942_v38 = vpack.c.bf16 %v12872_v12, %v12867_v60  ;;  %14520 = vst [vmem:[#allocation37_spill] sm:$0xff] %v13027_v18  ;;  %v3815_v30 = vand.u32 4294901760, %v3782_v19  ;;  %v3783_v60 = vld [vmem:[#allocation5 + $0xb0] sm:$0xff]  ;;  %v3784_v12 = vld [vmem:[#allocation5 + $0xb8] sm:$0xff] }
 0x3b7   : > { %9882 = vmatprep.subr.bf16.mxu1 %v14455_v4  ;;  %v12903_v35 = vpack.c.bf16 %v2614_v52, %v2607_v24  ;;  %14511 = vst [vmem:[#allocation28_spill] sm:$0xff] %v12930_v40  ;;  %14512 = vst [vmem:[#allocation29_spill] sm:$0xff] %v12936_v53  ;;  %v12985_v24 = vpack.c.bf16 %v2570_v23, %v2563_v59  ;;  %v3778_v59 = vld [vmem:[#allocation5 + $0x88] sm:$0xff]  ;;  %v3818_v1 = vand.u32 4294901760, %v3783_v60  ;;  %v3821_v51 = vand.u32 4294901760, %v3784_v12 }
 0x3b8   : > { %14513 = vst [vmem:[#allocation30_spill] sm:$0xff] %v12942_v38  ;;  %v3803_v23 = vand.u32 4294901760, %v3778_v59 }
 0x3b9   : > { %14515 = vst [vmem:[#allocation32_spill] sm:$0xff] %v12985_v24  ;;  %v13193_v52 = vpack.c.bf16 %v3821_v51, %v3818_v1 }
 0x3ba   : > { %9884 = vmatpush3.bf16.msra.mxu1 %v12874_v55 }
 0x3bb   : > { %9885 = vmatprep.subr.bf16.mxu1 %v14455_v4 }
 0x3be   : > { %9887 = vmatpush3.bf16.msra.mxu1 %v12888_v49 }
 0x3bf   : > { %9888 = vmatprep.subr.bf16.mxu1 %v14455_v4 }
 0x3c2   : > { %9890 = vmatpush3.bf16.msra.mxu1 %v12899_v0 }
 0x3c3   : > { %9891 = vmatprep.subr.bf16.mxu1 %v14455_v4 }
 0x3c6   : > { %9893 = vmatpush3.bf16.msra.mxu1 %v12903_v35 }
 0x3c7   : > { %9894 = vmatprep.subr.bf16.mxu1 %v14455_v4 }
 0x3ca   : > { %9896 = vmatpush3.bf16.msra.mxu1 %v12756_v48 }
 0x3cb   : > { %9897 = vmatprep.subr.bf16.mxu1 %v14455_v4 }
 0x3ce   : > { %9899 = vmatpush3.bf16.msra.mxu1 %v12760_v5 }
 0x3cf   : > { %9900 = vmatprep.subr.bf16.mxu1 %v14455_v4 }
 0x3d2   : > { %9902 = vmatpush3.bf16.msra.mxu1 %v12768_v61 }
 0x3d3   : > { %9903 = vmatprep.subr.bf16.mxu1 %v14455_v4 }
 0x3d5   : > { %7967 = vmatmul.mubr.f32.vlgmr.msra.gmra.mrb[2].mxu1 %v12826_v45 }
 0x3d6   : > { %9905 = vmatpush3.bf16.msra.mxu1 %v12915_v56  ;;  %8001 = vmatprep.mubr.msk.f32.mxu1 %vm11213_vm3, %v14354_v9 }
 0x3d7   : > { %9906 = vmatprep.subr.bf16.mxu1 %v14455_v4 }
 0x3da   : > { %9908 = vmatpush3.bf16.msra.mxu1 %v12922_v21 }
 0x3db   : > { %9909 = vmatprep.subr.bf16.mxu1 %v14455_v4 }
 0x3de   : > { %9911 = vmatpush3.bf16.msra.mxu1 %v12930_v40 }
 0x3df   : > { %9912 = vmatprep.subr.bf16.mxu1 %v14455_v4 }
 0x3e2   : > { %9914 = vmatpush3.bf16.msra.mxu1 %v12936_v53 }
 0x3e3   : > { %9915 = vmatprep.subr.bf16.mxu1 %v14455_v4 }
 0x3e6   : > { %9917 = vmatpush3.bf16.msra.mxu1 %v12942_v38 }
 0x3e7   : > { %9918 = vmatprep.subr.bf16.mxu1 %v14455_v4 }
 0x3ea   : > { %9920 = vmatpush3.bf16.msra.mxu1 %v12772_v54 }
 0x3eb   : > { %9921 = vmatprep.subr.bf16.mxu1 %v14455_v4 }
 0x3ee   : > { %9923 = vmatpush3.bf16.msra.mxu1 %v12776_v39 }
 0x3ef   : > { %9924 = vmatprep.subr.bf16.mxu1 %v14455_v4 }
 0x3f2   : > { %9926 = vmatpush3.bf16.msra.mxu1 %v12780_v34 }
 0x3f3   : > { %9927 = vmatprep.subr.bf16.mxu1 %v14455_v4 }
 0x3f5   : > { %8002 = vmatmul.mubr.f32.vlgmr.msra.gmra.mrb[2].mxu1 %v12833_v15  ;;  %v3806_v15 = vand.u32 4294901760, %v3779_v46 }
 0x3f6   : > { %9929 = vmatpush3.bf16.msra.mxu1 %v12544_v29  ;;  %8036 = vmatprep.mubr.msk.f32.mxu1 %vm11213_vm3, %v14354_v9 }
 0x3f7   : > { %9930 = vmatprep.subr.bf16.mxu1 %v14455_v4 }
 0x3fa   : > { %9932 = vmatpush3.bf16.msra.mxu1 %v12553_v27 }
 0x3fb   : > { %9933 = vmatprep.subr.bf16.mxu1 %v14455_v4 }
 0x3fe   : > { %9935 = vmatpush3.bf16.msra.mxu1 %v12570_v33 }
 0x3ff   : > { %9936 = vmatprep.subr.bf16.mxu1 %v14455_v4 }
 0x402   : > { %9938 = vmatpush3.bf16.msra.mxu1 %v12587_v26 }
 0x403   : > { %9939 = vmatprep.subr.bf16.mxu1 %v14455_v4 }
 0x406   : > { %9941 = vmatpush3.bf16.msra.mxu1 %v12600_v63 }
 0x407   : > { %9942 = vmatprep.subr.bf16.mxu1 %v14455_v4 }
 0x40a   : > { %9944 = vmatpush3.bf16.msra.mxu1 %v12706_v43 }
 0x40b   : > { %9945 = vmatprep.subr.bf16.mxu1 %v14455_v4 }
 0x40e   : > { %9947 = vmatpush3.bf16.msra.mxu1 %v12712_v8 }
 0x40f   : > { %9948 = vmatprep.subr.bf16.mxu1 %v14455_v4 }
 0x412   : > { %9950 = vmatpush3.bf16.msra.mxu1 %v12718_v3 }
 0x413   : > { %9951 = vmatprep.subr.bf16.mxu1 %v14455_v4 }
 0x415   : > { %8037 = vmatmul.mubr.f32.vlgmr.msra.gmra.mrb[2].mxu1 %v2538_v10  ;;  %v3812_v10 = vand.u32 4294901760, %v3781_v28 }
 0x416   : > { %9953 = vmatpush3.bf16.msra.mxu1 %v12975_v22  ;;  %8071 = vmatprep.mubr.msk.f32.mxu1 %vm11213_vm3, %v14354_v9 }
 0x417   : > { %9954 = vmatprep.subr.bf16.mxu1 %v14455_v4  ;;  %v13189_v32 = vpack.c.bf16 %v3815_v30, %v3812_v10 }
 0x41a   : > { %9956 = vmatpush3.bf16.msra.mxu1 %v12985_v24 }
 0x41b   : > { %9957 = vmatprep.subr.bf16.mxu1 %v14455_v4 }
 0x41e   : > { %9959 = vmatpush3.bf16.msra.mxu1 %v12995_v20 }
 0x41f   : > { %9960 = vmatprep.subr.bf16.mxu1 %v14455_v4 }
 0x422   : > { %9962 = vmatpush3.bf16.msra.mxu1 %v13003_v41 }
 0x423   : > { %9963 = vmatprep.subr.bf16.mxu1 %v14455_v4 }
 0x426   : > { %9965 = vmatpush3.bf16.msra.mxu1 %v13011_v62 }
 0x427   : > { %9966 = vmatprep.subr.bf16.mxu1 %v14455_v4 }
 0x42a   : > { %9968 = vmatpush3.bf16.msra.mxu1 %v13019_v31 }
 0x42b   : > { %9969 = vmatprep.subr.bf16.mxu1 %v14455_v4 }
 0x42e   : > { %9971 = vmatpush3.bf16.msra.mxu1 %v13027_v18 }
 0x42f   : > { %9972 = vmatprep.subr.bf16.mxu1 %v14455_v4 }
 0x432   : > { %9974 = vmatpush3.bf16.msra.mxu1 %v13035_v16 }
 0x433   : > { %9975 = vmatprep.subr.bf16.mxu1 %v14455_v4 }
 0x435   : > { %8072 = vmatmul.mubr.f32.vlgmr.msra.gmra.mrb[2].mxu1 %v12826_v45 }
 0x436   : > { %9977 = vmatpush3.bf16.msra.mxu1 %v12544_v29  ;;  %8106 = vmatprep.mubr.msk.f32.mxu1 %vm11213_vm3, %v14354_v9 }
 0x437   : > { %9978 = vmatprep.subr.bf16.mxu1 %v14455_v4 }
 0x43a   : > { %9980 = vmatpush3.bf16.msra.mxu1 %v12553_v27 }
 0x43b   : > { %9981 = vmatprep.subr.bf16.mxu1 %v14455_v4 }
 0x43e   : > { %9983 = vmatpush3.bf16.msra.mxu1 %v12570_v33 }
 0x43f   : > { %9984 = vmatprep.subr.bf16.mxu1 %v14455_v4 }
 0x442   : > { %9986 = vmatpush3.bf16.msra.mxu1 %v12587_v26 }
 0x443   : > { %9987 = vmatprep.subr.bf16.mxu1 %v14455_v4 }
 0x446   : > { %9989 = vmatpush3.bf16.msra.mxu1 %v12600_v63 }
 0x447   : > { %9990 = vmatprep.subr.bf16.mxu1 %v14455_v4 }
 0x44a   : > { %9992 = vmatpush3.bf16.msra.mxu1 %v12706_v43 }
 0x44b   : > { %9993 = vmatprep.subr.bf16.mxu1 %v14455_v4 }
 0x44e   : > { %9995 = vmatpush3.bf16.msra.mxu1 %v12712_v8 }
 0x44f   : > { %9996 = vmatprep.subr.bf16.mxu1 %v14455_v4 }
 0x452   : > { %9998 = vmatpush3.bf16.msra.mxu1 %v12718_v3 }
 0x453   : > { %9999 = vmatprep.subr.bf16.mxu1 %v14455_v4 }
 0x455   : > { %8107 = vmatmul.mubr.f32.vlgmr.msra.gmra.mrb[2].mxu1 %v12826_v45  ;;  %v3780_v45 = vld [vmem:[#allocation5 + $0x98] sm:$0xff] }
 0x456   : > { %10001 = vmatpush3.bf16.msra.mxu1 %v12544_v29  ;;  %8141 = vmatprep.mubr.msk.f32.mxu1 %vm11213_vm3, %v14354_v9  ;;  %v3809_v6 = vand.u32 4294901760, %v3780_v45 }
 0x457   : > { %10002 = vmatprep.subr.bf16.mxu1 %v14455_v4 }
 0x458   : > { %v13185_v25 = vpack.c.bf16 %v3809_v6, %v3806_v15 }
 0x45a   : > { %10004 = vmatpush3.bf16.msra.mxu1 %v12553_v27 }
 0x45b   : > { %10005 = vmatprep.subr.bf16.mxu1 %v14455_v4 }
 0x45e   : > { %10007 = vmatpush3.bf16.msra.mxu1 %v12570_v33 }
 0x45f   : > { %10008 = vmatprep.subr.bf16.mxu1 %v14455_v4 }
 0x462   : > { %10010 = vmatpush3.bf16.msra.mxu1 %v12587_v26 }
 0x463   : > { %10011 = vmatprep.subr.bf16.mxu1 %v14455_v4 }
 0x466   : > { %10013 = vmatpush3.bf16.msra.mxu1 %v12600_v63 }
 0x467   : > { %10014 = vmatprep.subr.bf16.mxu1 %v14455_v4 }
 0x46a   : > { %10016 = vmatpush3.bf16.msra.mxu1 %v12706_v43 }
 0x46b   : > { %10017 = vmatprep.subr.bf16.mxu1 %v14455_v4 }
 0x46e   : > { %10019 = vmatpush3.bf16.msra.mxu1 %v12712_v8 }
 0x46f   : > { %10020 = vmatprep.subr.bf16.mxu1 %v14455_v4 }
 0x472   : > { %10022 = vmatpush3.bf16.msra.mxu1 %v12718_v3 }
 0x473   : > { %10023 = vmatprep.subr.bf16.mxu1 %v14455_v4 }
 0x528   : > { %v3092_v44 = vpop.f32.mrb[2].mxu1 }
 0x529   : > { %v13079_v50 = vsub.f32 %v12812_v14, %v3092_v44  ;;  %v8108_v36 = vpop.f32.mrb[3].mxu1  ;;  %v3800_v14 = vand.u32 4294901760, %v3777_v58  ;;  %v3786_v44 = vld [vmem:[#allocation5 + $0xc8] sm:$0xff] }
 0x52a   : > { %v3824_v36 = vand.u32 4294901760, %v3785_v57 }
 0x52b   : > { %v3097_v13 = vmul.f32 %v13079_v50, %v13079_v50  ;;  %v13181_v42 = vpack.c.bf16 %v3803_v23, %v3800_v14 }
 0x52d   : > { %v13083_v11 = vand.u32 4294901760, %v3097_v13 }
 0x52f   : > { %v3180_v7 = vsub.f32 %v3097_v13, %v13083_v11  ;;  %v3827_v13 = vand.u32 4294901760, %v3786_v44 }
 0x531   : > { %v3181_v17 = vand.u32 4294901760, %v3180_v7 }
 0x533   : > { %v3182_v47 = vsub.f32 %v3180_v7, %v3181_v17 }
 0x535   : > { %v3183_v37 = vand.u32 4294901760, %v3182_v47 }
 0x537   : > { %8142 = vmatmul.mubr.f32.vlgmr.msra.gmra.mrb[4].mxu1 %v3183_v37 }
 0x538   : > { %10025 = vmatpush3.bf16.msra.mxu1 %v12851_v2  ;;  %8176 = vmatprep.mubr.msk.f32.mxu1 %vm11213_vm3, %v14354_v9 }
 0x539   : > { %10026 = vmatprep.subr.bf16.mxu1 %v14455_v4 }
 0x53c   : > { %10028 = vmatpush3.bf16.msra.mxu1 %v12874_v55 }
 0x53d   : > { %10029 = vmatprep.subr.bf16.mxu1 %v14455_v4 }
 0x540   : > { %10031 = vmatpush3.bf16.msra.mxu1 %v12888_v49 }
 0x541   : > { %10032 = vmatprep.subr.bf16.mxu1 %v14455_v4 }
 0x544   : > { %10034 = vmatpush3.bf16.msra.mxu1 %v12899_v0 }
 0x545   : > { %10035 = vmatprep.subr.bf16.mxu1 %v14455_v4 }
 0x548   : > { %10037 = vmatpush3.bf16.msra.mxu1 %v12903_v35 }
 0x549   : > { %10038 = vmatprep.subr.bf16.mxu1 %v14455_v4 }
 0x54c   : > { %10040 = vmatpush3.bf16.msra.mxu1 %v12756_v48 }
 0x54d   : > { %10041 = vmatprep.subr.bf16.mxu1 %v14455_v4 }
 0x550   : > { %10043 = vmatpush3.bf16.msra.mxu1 %v12760_v5 }
 0x551   : > { %10044 = vmatprep.subr.bf16.mxu1 %v14455_v4 }
 0x554   : > { %10046 = vmatpush3.bf16.msra.mxu1 %v12768_v61 }
 0x555   : > { %10047 = vmatprep.subr.bf16.mxu1 %v14455_v4 }
 0x557   : > { %8177 = vmatmul.mubr.f32.vlgmr.msra.gmra.mrb[4].mxu1 %v13083_v11 }
 0x558   : > { %10049 = vmatpush3.bf16.msra.mxu1 %v12915_v56  ;;  %8211 = vmatprep.mubr.msk.f32.mxu1 %vm11213_vm3, %v14354_v9 }
 0x559   : > { %10050 = vmatprep.subr.bf16.mxu1 %v14455_v4 }
 0x55c   : > { %10052 = vmatpush3.bf16.msra.mxu1 %v12922_v21 }
 0x55d   : > { %10053 = vmatprep.subr.bf16.mxu1 %v14455_v4 }
 0x560   : > { %10055 = vmatpush3.bf16.msra.mxu1 %v12930_v40 }
 0x561   : > { %10056 = vmatprep.subr.bf16.mxu1 %v14455_v4 }
 0x564   : > { %10058 = vmatpush3.bf16.msra.mxu1 %v12936_v53 }
 0x565   : > { %10059 = vmatprep.subr.bf16.mxu1 %v14455_v4 }
 0x568   : > { %10061 = vmatpush3.bf16.msra.mxu1 %v12942_v38 }
 0x569   : > { %10062 = vmatprep.subr.bf16.mxu1 %v14455_v4 }
 0x56c   : > { %10064 = vmatpush3.bf16.msra.mxu1 %v12772_v54 }
 0x56d   : > { %10065 = vmatprep.subr.bf16.mxu1 %v14455_v4 }
 0x570   : > { %10067 = vmatpush3.bf16.msra.mxu1 %v12776_v39 }
 0x571   : > { %10068 = vmatprep.subr.bf16.mxu1 %v14455_v4 }
 0x574   : > { %10070 = vmatpush3.bf16.msra.mxu1 %v12780_v34  ;;  %v7177_v34 = vld [vmem:[%s14293_s5 + $0x1] ss:$0 sm:$0xff] }
 0x575   : > { %10071 = vmatprep.subr.bf16.mxu1 %v14455_v4 }
 0x577   : > { %8212 = vmatmul.mubr.f32.vlgmr.msra.gmra.mrb[4].mxu1 %v3180_v7  ;;  %v3787_v7 = vld [vmem:[#allocation5 + $0xd0] sm:$0xff] }
 0x578   : > { %10073 = vmatpush3.bf16.msra.mxu1 %v12544_v29  ;;  %8246 = vmatprep.mubr.msk.f32.mxu1 %vm11213_vm3, %v14354_v9  ;;  %v3830_v47 = vand.u32 4294901760, %v3787_v7 }
 0x579   : > { %10074 = vmatprep.subr.bf16.mxu1 %v14455_v4 }
 0x57c   : > { %10076 = vmatpush3.bf16.msra.mxu1 %v12553_v27 }
 0x57d   : > { %10077 = vmatprep.subr.bf16.mxu1 %v14455_v4 }
 0x580   : > { %10079 = vmatpush3.bf16.msra.mxu1 %v12570_v33 }
 0x581   : > { %10080 = vmatprep.subr.bf16.mxu1 %v14455_v4 }
 0x584   : > { %10082 = vmatpush3.bf16.msra.mxu1 %v12587_v26 }
 0x585   : > { %10083 = vmatprep.subr.bf16.mxu1 %v14455_v4 }
 0x588   : > { %10085 = vmatpush3.bf16.msra.mxu1 %v12600_v63 }
 0x589   : > { %10086 = vmatprep.subr.bf16.mxu1 %v14455_v4 }
 0x58c   : > { %10088 = vmatpush3.bf16.msra.mxu1 %v12706_v43 }
 0x58d   : > { %10089 = vmatprep.subr.bf16.mxu1 %v14455_v4 }
 0x590   : > { %10091 = vmatpush3.bf16.msra.mxu1 %v12712_v8 }
 0x591   : > { %10092 = vmatprep.subr.bf16.mxu1 %v14455_v4 }
 0x594   : > { %10094 = vmatpush3.bf16.msra.mxu1 %v12718_v3 }
 0x595   : > { %10095 = vmatprep.subr.bf16.mxu1 %v14455_v4 }
 0x597   : > { %8247 = vmatmul.mubr.f32.vlgmr.msra.gmra.mrb[4].mxu1 %v3181_v17  ;;  %v3788_v17 = vld [vmem:[#allocation5 + $0xd8] sm:$0xff] }
 0x598   : > { %10097 = vmatpush3.bf16.msra.mxu1 %v12975_v22  ;;  %8281 = vmatprep.mubr.msk.f32.mxu1 %vm11213_vm3, %v14354_v9  ;;  %v3833_v37 = vand.u32 4294901760, %v3788_v17  ;;  %v13211_v22 = vsub.f32 %v3782_v19, %v3815_v30 }
 0x599   : > { %10098 = vmatprep.subr.bf16.mxu1 %v14455_v4 }
 0x59c   : > { %10100 = vmatpush3.bf16.msra.mxu1 %v12985_v24  ;;  %v13209_v24 = vsub.f32 %v3781_v28, %v3812_v10 }
 0x59d   : > { %10101 = vmatprep.subr.bf16.mxu1 %v14455_v4 }
 0x5a0   : > { %10103 = vmatpush3.bf16.msra.mxu1 %v12995_v20  ;;  %v3791_v20 = vld [vmem:[#allocation5 + $0xf0] sm:$0xff] }
 0x5a1   : > { %10104 = vmatprep.subr.bf16.mxu1 %v14455_v4 }
 0x5a4   : > { %10106 = vmatpush3.bf16.msra.mxu1 %v13003_v41  ;;  %v3790_v41 = vld [vmem:[#allocation5 + $0xe8] sm:$0xff] }
 0x5a5   : > { %10107 = vmatprep.subr.bf16.mxu1 %v14455_v4 }
 0x5a8   : > { %10109 = vmatpush3.bf16.msra.mxu1 %v13011_v62  ;;  %v3789_v62 = vld [vmem:[#allocation5 + $0xe0] sm:$0xff] }
 0x5a9   : > { %10110 = vmatprep.subr.bf16.mxu1 %v14455_v4 }
 0x5ac   : > { %10112 = vmatpush3.bf16.msra.mxu1 %v13019_v31  ;;  %v13207_v31 = vsub.f32 %v3780_v45, %v3809_v6  ;;  %v3836_v45 = vand.u32 4294901760, %v3789_v62  ;;  %v3842_v6 = vand.u32 4294901760, %v3791_v20 }
 0x5ad   : > { %10113 = vmatprep.subr.bf16.mxu1 %v14455_v4 }
 0x5ae   : > { %v13231_v10 = vsub.f32 %v3789_v62, %v3836_v45 }
 0x5b0   : > { %10115 = vmatpush3.bf16.msra.mxu1 %v13027_v18  ;;  %v13205_v18 = vsub.f32 %v3779_v46, %v3806_v15  ;;  %v13225_v46 = vsub.f32 %v3788_v17, %v3833_v37  ;;  %v3839_v15 = vand.u32 4294901760, %v3790_v41 }
 0x5b1   : > { %10116 = vmatprep.subr.bf16.mxu1 %v14455_v4 }
 0x5b2   : > { %v13229_v19 = vpack.c.bf16 %v3839_v15, %v3836_v45  ;;  %v13233_v30 = vsub.f32 %v3790_v41, %v3839_v15  ;;  %v14382_v62 = vand.u32 4294901760, %v13205_v18  ;;  %v14378_v45 = vand.u32 4294901760, %v13209_v24 }
 0x5b3   : > { %v14380_v15 = vand.u32 4294901760, %v13211_v22 }
 0x5b4   : > { %10118 = vmatpush3.bf16.msra.mxu1 %v13035_v16  ;;  %v13203_v16 = vsub.f32 %v3778_v59, %v3803_v23  ;;  %v13219_v59 = vsub.f32 %v3786_v44, %v3827_v13  ;;  %v13223_v23 = vsub.f32 %v3787_v7, %v3830_v47  ;;  %v3908_v7 = vsub.f32 %v13205_v18, %v14382_v62 }
 0x5b5   : > { %10119 = vmatprep.subr.bf16.mxu1 %v14455_v4 }
 0x5b7   : > { %8282 = vmatmul.mubr.f32.vlgmr.msra.gmra.mrb[4].mxu1 %v13083_v11 }
 0x5b8   : > { %10121 = vmatpush3.bf16.msra.mxu1 %v12544_v29  ;;  %8316 = vmatprep.mubr.msk.f32.mxu1 %vm11213_vm3, %v14354_v9 }
 0x5b9   : > { %10122 = vmatprep.subr.bf16.mxu1 %v14455_v4 }
 0x5bc   : > { %10124 = vmatpush3.bf16.msra.mxu1 %v12553_v27  ;;  %v7176_v27 = vld [vmem:[%s14293_s5] ss:$0 sm:$0xff] }
 0x5bd   : > { %10125 = vmatprep.subr.bf16.mxu1 %v14455_v4 }
 0x5c0   : > { %10127 = vmatpush3.bf16.msra.mxu1 %v12570_v33 }
 0x5c1   : > { %10128 = vmatprep.subr.bf16.mxu1 %v14455_v4 }
 0x5c4   : > { %10130 = vmatpush3.bf16.msra.mxu1 %v12587_v26 }
 0x5c5   : > { %10131 = vmatprep.subr.bf16.mxu1 %v14455_v4 }
 0x5c8   : > { %10133 = vmatpush3.bf16.msra.mxu1 %v12600_v63 }
 0x5c9   : > { %10134 = vmatprep.subr.bf16.mxu1 %v14455_v4 }
 0x5cc   : > { %10136 = vmatpush3.bf16.msra.mxu1 %v12706_v43  ;;  %v3792_v43 = vld [vmem:[#allocation5 + $0xf8] sm:$0xff] }
 0x5cd   : > { %10137 = vmatprep.subr.bf16.mxu1 %v14455_v4  ;;  %v3845_v28 = vand.u32 4294901760, %v3792_v43 }
 0x5d0   : > { %10139 = vmatpush3.bf16.msra.mxu1 %v12712_v8  ;;  %v13215_v8 = vsub.f32 %v3784_v12, %v3821_v51  ;;  %v13237_v12 = vsub.f32 %v3792_v43, %v3845_v28  ;;  %v14385_v51 = vand.u32 4294901760, %v13203_v16 }
 0x5d1   : > { %10140 = vmatprep.subr.bf16.mxu1 %v14455_v4 }
 0x5d2   : > { %v3901_v41 = vsub.f32 %v13203_v16, %v14385_v51 }
 0x5d4   : > { %10142 = vmatpush3.bf16.msra.mxu1 %v12718_v3  ;;  %v13213_v3 = vsub.f32 %v3783_v60, %v3818_v1  ;;  %v13235_v60 = vsub.f32 %v3791_v20, %v3842_v6  ;;  %v3902_v20 = vand.u32 4294901760, %v3901_v41 }
 0x5d5   : > { %10143 = vmatprep.subr.bf16.mxu1 %v14455_v4 }
 0x5d6   : > { %v14395_v63 = vand.u32 4294901760, %v13235_v60 }
 0x5d7   : > { %8317 = vmatmul.mubr.f32.vlgmr.msra.gmra.mrb[4].mxu1 %v13083_v11  ;;  %v13197_v11 = vpack.c.bf16 %v3827_v13, %v3824_v36 }
 0x5d8   : > { %8351 = vmatprep.mubr.msk.f32.mxu1 %vm11213_vm3, %v14354_v9  ;;  %10145 = vmatpush3.bf16.msra.mxu1 %v13181_v42  ;;  %v13201_v9 = vsub.f32 %v3777_v58, %v3800_v14  ;;  %v13217_v58 = vsub.f32 %v3785_v57, %v3824_v36  ;;  %v13221_v14 = vpack.c.bf16 %v3833_v37, %v3830_v47  ;;  %v14379_v36 = vand.u32 4294901760, %v13207_v31 }
 0x5d9   : > { %10146 = vmatprep.subr.bf16.mxu1 %v14455_v4  ;;  %v13242_v57 = vpack.c.bf16 %v3845_v28, %v3842_v6  ;;  %v3909_v47 = vand.u32 4294901760, %v3908_v7  ;;  %v3922_v28 = vsub.f32 %v13209_v24, %v14378_v45  ;;  %v14383_v7 = vand.u32 4294901760, %v13215_v8 }
 0x5da   : > { %v14388_v1 = vand.u32 4294901760, %v13201_v9  ;;  %v3915_v17 = vsub.f32 %v13207_v31, %v14379_v36 }
 0x5db   : > { %v3923_v41 = vand.u32 4294901760, %v3922_v28  ;;  %v14386_v28 = vand.u32 4294901760, %v13219_v59 }
 0x5dc   : > { %10148 = vmatpush3.bf16.msra.mxu1 %v13185_v25  ;;  %v3894_v44 = vsub.f32 %v13201_v9, %v14388_v1  ;;  %v3916_v37 = vand.u32 4294901760, %v3915_v17 }
 0x5dd   : > { %10149 = vmatprep.subr.bf16.mxu1 %v14455_v4 }
 0x5de   : > { %v3895_v43 = vand.u32 4294901760, %v3894_v44  ;;  %v13265_v6 = vpack.c.bf16 %v3916_v37, %v3909_v47  ;;  %v3929_v44 = vsub.f32 %v13211_v22, %v14380_v15  ;;  %v3943_v37 = vsub.f32 %v13215_v8, %v14383_v7 }
 0x5df   : > { %v14384_v15 = vand.u32 4294901760, %v13217_v58  ;;  %v14387_v7 = vand.u32 4294901760, %v13223_v23 }
 0x5e0   : > { %10151 = vmatpush3.bf16.msra.mxu1 %v13189_v32  ;;  %v13254_v13 = vpack.c.bf16 %v3902_v20, %v3895_v43  ;;  %v3930_v43 = vand.u32 4294901760, %v3929_v44  ;;  %v14381_v20 = vand.u32 4294901760, %v13213_v3  ;;  %v3944_v36 = vand.u32 4294901760, %v3943_v37 }
 0x5e1   : > { %10152 = vmatprep.subr.bf16.mxu1 %v14455_v4 }
 0x5e2   : > { %v13275_v17 = vpack.c.bf16 %v3930_v43, %v3923_v41  ;;  %v3936_v47 = vsub.f32 %v13213_v3, %v14381_v20  ;;  %v3950_v41 = vsub.f32 %v13217_v58, %v14384_v15  ;;  %v3957_v43 = vsub.f32 %v13219_v59, %v14386_v28 }
 0x5e3   : > { %v14392_v28 = vand.u32 4294901760, %v13231_v10 }
 0x5e4   : > { %10154 = vmatpush3.bf16.msra.mxu1 %v13193_v52  ;;  %v3937_v45 = vand.u32 4294901760, %v3936_v47  ;;  %v3951_v20 = vand.u32 4294901760, %v3950_v41  ;;  %v3958_v62 = vand.u32 4294901760, %v3957_v43  ;;  %v14391_v47 = vand.u32 4294901760, %v13225_v46 }
 0x5e5   : > { %10155 = vmatprep.subr.bf16.mxu1 %v14455_v4  ;;  %v14397_v41 = vand.u32 4294901760, %v13233_v30 }
 0x5e6   : > { %v13285_v44 = vpack.c.bf16 %v3944_v36, %v3937_v45  ;;  %v13295_v37 = vpack.c.bf16 %v3958_v62, %v3951_v20  ;;  %v3964_v36 = vsub.f32 %v13223_v23, %v14387_v7  ;;  %v3971_v45 = vsub.f32 %v13225_v46, %v14391_v47 }
 0x5e7   : > { %v3978_v62 = vsub.f32 %v13231_v10, %v14392_v28  ;;  %v3985_v20 = vsub.f32 %v13233_v30, %v14397_v41  ;;  %v3992_v47 = vsub.f32 %v13235_v60, %v14395_v63  ;;  %v10204_v63 = vpack.c.bf16 %v13219_v59, %v13217_v58 }
 0x5e8   : > { %10157 = vmatpush3.bf16.msra.mxu1 %v13197_v11  ;;  %v3965_v15 = vand.u32 4294901760, %v3964_v36  ;;  %v3972_v51 = vand.u32 4294901760, %v3971_v45  ;;  %v14396_v36 = vand.u32 4294901760, %v13237_v12 }
 0x5e9   : > { %10158 = vmatprep.subr.bf16.mxu1 %v14455_v4  ;;  %v3979_v7 = vand.u32 4294901760, %v3978_v62  ;;  %v3986_v1 = vand.u32 4294901760, %v3985_v20  ;;  %v10192_v62 = vpack.c.bf16 %v13203_v16, %v13201_v9  ;;  %v10195_v20 = vpack.c.bf16 %v13207_v31, %v13205_v18 }
 0x5ea   : > { %v10183_v43 = vpack.c.bf16 %v3972_v51, %v3965_v15  ;;  %v3999_v51 = vsub.f32 %v13237_v12, %v14396_v36  ;;  %v3993_v15 = vand.u32 4294901760, %v3992_v47  ;;  %v10207_v47 = vpack.c.bf16 %v13225_v46, %v13223_v23 }
 0x5eb   : > { %v10186_v45 = vpack.c.bf16 %v3986_v1, %v3979_v7  ;;  %v10198_v1 = vpack.c.bf16 %v13211_v22, %v13209_v24  ;;  %v10201_v7 = vpack.c.bf16 %v13215_v8, %v13213_v3 }
 0x5ec   : > { %10160 = vmatpush3.bf16.msra.mxu1 %v13221_v14  ;;  %v4000_v28 = vand.u32 4294901760, %v3999_v51  ;;  %v10213_v51 = vpack.c.bf16 %v13237_v12, %v13235_v60 }
 0x5ed   : > { %10161 = vmatprep.subr.bf16.mxu1 %v14455_v4 }
 0x5ee   : > { %v10189_v26 = vpack.c.bf16 %v4000_v28, %v3993_v15  ;;  %v10210_v28 = vpack.c.bf16 %v13233_v30, %v13231_v10 }
 0x5f0   : > { %10163 = vmatpush3.bf16.msra.mxu1 %v13229_v19 }
 0x5f1   : > { %10164 = vmatprep.subr.bf16.mxu1 %v14455_v4 }
 0x5f4   : > { %10166 = vmatpush3.bf16.msra.mxu1 %v13242_v57 }
 0x5f5   : > { %10167 = vmatprep.subr.bf16.mxu1 %v14455_v4 }
 0x6aa   : > { %v3735_v15 = vpop.f32.mrb[4].mxu1 }
 0x6ab   : > { %v10864_v36 = vadd.f32 1e-06, %v3735_v15  ;;  %v8318_v41 = vpop.f32.mrb[5].mxu1 }
 0x6ad   : > { %11047 = vrsqrt.f32 %v10864_v36 }
 0x6b7   : > { %v11048_v33 = vpop.eup %11047 }
 0x6b8   : > { %v3740_v29 = vmul.f32 %v11048_v33, %v13079_v50 }
 0x6ba   : > { %v3746_v39 = vmul.f32 %v7176_v27, %v3740_v29 }
 0x6bc   : > { %v3752_v54 = vadd.f32 %v7177_v34, %v3746_v39  ;;  %v14523_v34 = vmov 0.0  }
 0x6be   : > { %v3753_v38 = vmax.f32 %v3752_v54, 0.0 }
 0x6c0   : > { %v3755_v53 = vrot.slane %v3753_v38, 7 }
 0x6c2   : > { %v13342_v40 = vsel %vm3757_vm4, 0.0, %v3755_v53  ;;  %v3759_v41 = vsel %vm3757_vm4, %v3755_v53, 0.0  ;;  %v14527_v53 = vand.u32 4294901760, %v13207_v31 }
 0x6c3   : > { %v3795_v36 = vrot.slane %v13342_v40, 1  ;;  %v3796_v15 = vrot.slane %v3759_v41, 1  ;;  %v5098_v21 = vrot.slane %v13342_v40, 2  ;;  %v5099_v56 = vrot.slane %v3759_v41, 2  ;;  %v3769_v41 = vld [vmem:[#allocation5 + $0x48] sm:$0xff] }
 0x6c5   : > { %v3797_v33 = vsel %vm356_vm0, %v3795_v36, %v3796_v15  ;;  %v13350_v61 = vsel %vm1748_vm2, %v5098_v21, %v5099_v56  ;;  %v14526_v21 = vand.u32 4294901760, %v13205_v18  ;;  %v14531_v18 = vand.u32 4294901760, %v13215_v8 }
 0x6c6   : > { %v13347_v50 = vand.u32 4294901760, %v3797_v33  ;;  %v14536_v8 = vand.u32 4294901760, %v13231_v10 }
 0x6c7   : > { %v10243_v38 = vpack.c.bf16 %v14527_v53, %v14526_v21  ;;  %v13485_v21 = vld [vmem:[#allocation5 + $0x68] sm:$0xff]  ;;  %v13488_v53 = vand.u32 4294901760, %v13342_v40 }
 0x6c8   : > { %v3881_v29 = vsub.f32 %v3797_v33, %v13347_v50  ;;  %v4468_v33 = vand.u32 4294901760, %v3769_v41 }
 0x6ca   : > { %v3882_v27 = vand.u32 4294901760, %v3881_v29 }
 0x6cc   : > { %v3883_v54 = vsub.f32 %v3881_v29, %v3882_v27 }
 0x6ce   : > { %v3884_v39 = vand.u32 4294901760, %v3883_v54 }
 0x6d0   : > { %8352 = vmatmul.mubr.f32.vlgmr.msra.gmra.mrb[6].mxu1 %v3884_v39 }
 0x6d1   : > { %10169 = vmatpush3.bf16.msra.mxu1 %v13254_v13  ;;  %8386 = vmatprep.mubr.msk.f32.mxu1 %vm11213_vm3, %v14523_v34 }
 0x6d2   : > { %10170 = vmatprep.subr.bf16.mxu1 %v14455_v4 }
 0x6d5   : > { %10172 = vmatpush3.bf16.msra.mxu1 %v13265_v6  ;;  %v14530_v6 = vand.u32 4294901760, %v13213_v3  ;;  %v14537_v3 = vand.u32 4294901760, %v13233_v30 }
 0x6d6   : > { %10173 = vmatprep.subr.bf16.mxu1 %v14455_v4 }
 0x6d7   : > { %v10249_v31 = vpack.c.bf16 %v14531_v18, %v14530_v6 }
 0x6d9   : > { %10175 = vmatpush3.bf16.msra.mxu1 %v13275_v17  ;;  %v14532_v17 = vand.u32 4294901760, %v13217_v58  ;;  %v14538_v58 = vand.u32 4294901760, %v13235_v60  ;;  %v3765_v60 = vld [vmem:[#allocation5 + $0x28] sm:$0xff] }
 0x6da   : > { %10176 = vmatprep.subr.bf16.mxu1 %v14455_v4 }
 0x6dd   : > { %10178 = vmatpush3.bf16.msra.mxu1 %v13285_v44  ;;  %v14533_v44 = vand.u32 4294901760, %v13219_v59  ;;  %v14539_v59 = vand.u32 4294901760, %v13237_v12 }
 0x6de   : > { %10179 = vmatprep.subr.bf16.mxu1 %v14455_v4 }
 0x6e1   : > { %10181 = vmatpush3.bf16.msra.mxu1 %v13295_v37  ;;  %v10252_v37 = vpack.c.bf16 %v14533_v44, %v14532_v17  ;;  %v13502_v17 = vld [vmem:[#allocation5 + $0x70] sm:$0xff]  ;;  %v13504_v44 = vld [vmem:[#allocation5 + $0x78] sm:$0xff] }
 0x6e2   : > { %10182 = vmatprep.subr.bf16.mxu1 %v14455_v4 }
 0x6e5   : > { %10184 = vmatpush3.bf16.msra.mxu1 %v10183_v43 }
 0x6e6   : > { %10185 = vmatprep.subr.bf16.mxu1 %v14455_v4 }
 0x6e9   : > { %10187 = vmatpush3.bf16.msra.mxu1 %v10186_v45  ;;  %v10258_v45 = vpack.c.bf16 %v14537_v3, %v14536_v8 }
 0x6ea   : > { %10188 = vmatprep.subr.bf16.mxu1 %v14455_v4 }
 0x6ed   : > { %10190 = vmatpush3.bf16.msra.mxu1 %v10189_v26  ;;  %v14524_v26 = vand.u32 4294901760, %v13201_v9  ;;  %v14528_v9 = vand.u32 4294901760, %v13209_v24  ;;  %v14535_v24 = vand.u32 4294901760, %v13225_v46  ;;  %v3762_v46 = vld [vmem:[#allocation5 + $0x10] sm:$0xff] }
 0x6ee   : > { %10191 = vmatprep.subr.bf16.mxu1 %v14455_v4 }
 0x6f0   : > { %8387 = vmatmul.mubr.f32.vlgmr.msra.gmra.mrb[6].mxu1 %v13347_v50 }
 0x6f1   : > { %10193 = vmatpush3.bf16.msra.mxu1 %v10192_v62  ;;  %8421 = vmatprep.mubr.msk.f32.mxu1 %vm11213_vm3, %v14523_v34  ;;  %v10261_v62 = vpack.c.bf16 %v14539_v59, %v14538_v58  ;;  %v4483_v58 = vand.u32 4294901760, %v13502_v17  ;;  %v4486_v59 = vand.u32 4294901760, %v13504_v44 }
 0x6f2   : > { %10194 = vmatprep.subr.bf16.mxu1 %v14455_v4 }
 0x6f5   : > { %10196 = vmatpush3.bf16.msra.mxu1 %v10195_v20  ;;  %v4456_v20 = vand.u32 4294901760, %v3765_v60 }
 0x6f6   : > { %10197 = vmatprep.subr.bf16.mxu1 %v14455_v4 }
 0x6f9   : > { %10199 = vmatpush3.bf16.msra.mxu1 %v10198_v1  ;;  %v3767_v1 = vld [vmem:[#allocation5 + $0x38] sm:$0xff] }
 0x6fa   : > { %10200 = vmatprep.subr.bf16.mxu1 %v14455_v4 }
 0x6fd   : > { %10202 = vmatpush3.bf16.msra.mxu1 %v10201_v7 }
 0x6fe   : > { %10203 = vmatprep.subr.bf16.mxu1 %v14455_v4 }
 0x701   : > { %10205 = vmatpush3.bf16.msra.mxu1 %v10204_v63  ;;  %v14525_v63 = vand.u32 4294901760, %v13203_v16  ;;  %v14529_v16 = vand.u32 4294901760, %v13211_v22  ;;  %v14534_v22 = vand.u32 4294901760, %v13223_v23 }
 0x702   : > { %10206 = vmatprep.subr.bf16.mxu1 %v14455_v4 }
 0x703   : > { %v10240_v56 = vpack.c.bf16 %v14525_v63, %v14524_v26  ;;  %v10246_v13 = vpack.c.bf16 %v14529_v16, %v14528_v9  ;;  %v10255_v43 = vpack.c.bf16 %v14535_v24, %v14534_v22 }
 0x705   : > { %10208 = vmatpush3.bf16.msra.mxu1 %v10207_v47 }
 0x706   : > { %10209 = vmatprep.subr.bf16.mxu1 %v14455_v4 }
 0x709   : > { %10211 = vmatpush3.bf16.msra.mxu1 %v10210_v28  ;;  %v4462_v28 = vand.u32 4294901760, %v3767_v1 }
 0x70a   : > { %10212 = vmatprep.subr.bf16.mxu1 %v14455_v4 }
 0x70d   : > { %10214 = vmatpush3.bf16.msra.mxu1 %v10213_v51  ;;  %v3768_v51 = vld [vmem:[#allocation5 + $0x40] sm:$0xff] }
 0x70e   : > { %10215 = vmatprep.subr.bf16.mxu1 %v14455_v4  ;;  %v4465_v15 = vand.u32 4294901760, %v3768_v51 }
 0x710   : > { %8422 = vmatmul.mubr.f32.vlgmr.msra.gmra.mrb[6].mxu1 %v3881_v29  ;;  %v3771_v29 = vld [vmem:[#allocation5 + $0x58] sm:$0xff]  ;;  %v13480_v39 = vpack.c.bf16 %v4468_v33, %v4465_v15 }
 0x711   : > { %10217 = vmatpush3.bf16.msra.mxu1 %v13181_v42  ;;  %8456 = vmatprep.mubr.msk.f32.mxu1 %vm11213_vm3, %v14523_v34  ;;  %v4474_v63 = vand.u32 4294901760, %v3771_v29 }
 0x712   : > { %10218 = vmatprep.subr.bf16.mxu1 %v14455_v4 }
 0x715   : > { %10220 = vmatpush3.bf16.msra.mxu1 %v13185_v25 }
 0x716   : > { %10221 = vmatprep.subr.bf16.mxu1 %v14455_v4 }
 0x719   : > { %10223 = vmatpush3.bf16.msra.mxu1 %v13189_v32 }
 0x71a   : > { %10224 = vmatprep.subr.bf16.mxu1 %v14455_v4 }
 0x71d   : > { %10226 = vmatpush3.bf16.msra.mxu1 %v13193_v52 }
 0x71e   : > { %10227 = vmatprep.subr.bf16.mxu1 %v14455_v4 }
 0x721   : > { %10229 = vmatpush3.bf16.msra.mxu1 %v13197_v11 }
 0x722   : > { %10230 = vmatprep.subr.bf16.mxu1 %v14455_v4 }
 0x725   : > { %10232 = vmatpush3.bf16.msra.mxu1 %v13221_v14 }
 0x726   : > { %10233 = vmatprep.subr.bf16.mxu1 %v14455_v4 }
 0x729   : > { %10235 = vmatpush3.bf16.msra.mxu1 %v13229_v19 }
 0x72a   : > { %10236 = vmatprep.subr.bf16.mxu1 %v14455_v4 }
 0x72d   : > { %10238 = vmatpush3.bf16.msra.mxu1 %v13242_v57 }
 0x72e   : > { %10239 = vmatprep.subr.bf16.mxu1 %v14455_v4 }
 0x730   : > { %8457 = vmatmul.mubr.f32.vlgmr.msra.gmra.mrb[6].mxu1 %v3882_v27 }
 0x731   : > { %10241 = vmatpush3.bf16.msra.mxu1 %v10240_v56  ;;  %8491 = vmatprep.mubr.msk.f32.mxu1 %vm11213_vm3, %v14523_v34  ;;  %v13483_v56 = vld [vmem:[#allocation5 + $0x60] sm:$0xff] }
 0x732   : > { %10242 = vmatprep.subr.bf16.mxu1 %v14455_v4  ;;  %v4477_v18 = vand.u32 4294901760, %v13483_v56 }
 0x735   : > { %10244 = vmatpush3.bf16.msra.mxu1 %v10243_v38 }
 0x736   : > { %10245 = vmatprep.subr.bf16.mxu1 %v14455_v4 }
 0x739   : > { %10247 = vmatpush3.bf16.msra.mxu1 %v10246_v13 }
 0x73a   : > { %10248 = vmatprep.subr.bf16.mxu1 %v14455_v4 }
 0x73d   : > { %10250 = vmatpush3.bf16.msra.mxu1 %v10249_v31  ;;  %v4480_v31 = vand.u32 4294901760, %v13485_v21 }
 0x73e   : > { %10251 = vmatprep.subr.bf16.mxu1 %v14455_v4 }
 0x741   : > { %10253 = vmatpush3.bf16.msra.mxu1 %v10252_v37  ;;  %v13508_v37 = vsub.f32 %v13342_v40, %v13488_v53  ;;  %v13523_v40 = vpack.c.bf16 %v4480_v31, %v4477_v18 }
 0x742   : > { %10254 = vmatprep.subr.bf16.mxu1 %v14455_v4 }
 0x745   : > { %10256 = vmatpush3.bf16.msra.mxu1 %v10255_v43 }
 0x746   : > { %10257 = vmatprep.subr.bf16.mxu1 %v14455_v4 }
 0x749   : > { %10259 = vmatpush3.bf16.msra.mxu1 %v10258_v45  ;;  %v13520_v45 = vsub.f32 %v3765_v60, %v4456_v20 }
 0x74a   : > { %10260 = vmatprep.subr.bf16.mxu1 %v14455_v4 }
 0x74d   : > { %10262 = vmatpush3.bf16.msra.mxu1 %v10261_v62  ;;  %v4523_v62 = vand.u32 4294901760, %v13508_v37 }
 0x74e   : > { %10263 = vmatprep.subr.bf16.mxu1 %v14455_v4 }
 0x74f   : > { %v4524_v60 = vsub.f32 %v13508_v37, %v4523_v62 }
 0x750   : > { %8492 = vmatmul.mubr.f32.vlgmr.msra.gmra.mrb[6].mxu1 %v13347_v50 }
 0x751   : > { %10265 = vmatpush3.bf16.msra.mxu1 %v13181_v42  ;;  %8526 = vmatprep.mubr.msk.f32.mxu1 %vm11213_vm3, %v14523_v34  ;;  %v3760_v42 = vld [vmem:[#allocation5] sm:$0xff] }
 0x752   : > { %10266 = vmatprep.subr.bf16.mxu1 %v14455_v4  ;;  %v4441_v23 = vand.u32 4294901760, %v3760_v42 }
 0x754   : > { %v13475_v27 = vsub.f32 %v3760_v42, %v4441_v23 }
 0x755   : > { %10268 = vmatpush3.bf16.msra.mxu1 %v13185_v25  ;;  %v3761_v25 = vld [vmem:[#allocation5 + $0x8] sm:$0xff] }
 0x756   : > { %10269 = vmatprep.subr.bf16.mxu1 %v14455_v4  ;;  %v4534_v16 = vand.u32 4294901760, %v13475_v27 }
 0x758   : > { %v4535_v24 = vsub.f32 %v13475_v27, %v4534_v16 }
 0x759   : > { %10271 = vmatpush3.bf16.msra.mxu1 %v13189_v32  ;;  %v4444_v32 = vand.u32 4294901760, %v3761_v25 }
 0x75a   : > { %10272 = vmatprep.subr.bf16.mxu1 %v14455_v4 }
 0x75b   : > { %v13457_v10 = vpack.c.bf16 %v4444_v32, %v4441_v23  ;;  %v13477_v54 = vsub.f32 %v3761_v25, %v4444_v32  ;;  %v4536_v25 = vand.u32 4294901760, %v4535_v24 }
 0x75d   : > { %10274 = vmatpush3.bf16.msra.mxu1 %v13193_v52  ;;  %v3763_v52 = vld [vmem:[#allocation5 + $0x18] sm:$0xff]  ;;  %v4541_v13 = vand.u32 4294901760, %v13477_v54 }
 0x75e   : > { %10275 = vmatprep.subr.bf16.mxu1 %v14455_v4  ;;  %v4450_v30 = vand.u32 4294901760, %v3763_v52 }
 0x75f   : > { %v4542_v43 = vsub.f32 %v13477_v54, %v4541_v13 }
 0x760   : > { %v13492_v9 = vsub.f32 %v3763_v52, %v4450_v30  ;;  %v13537_v52 = vsub.f32 %v3767_v1, %v4462_v28 }
 0x761   : > { %10277 = vmatpush3.bf16.msra.mxu1 %v13197_v11  ;;  %v4447_v11 = vand.u32 4294901760, %v3762_v46  ;;  %v4543_v23 = vand.u32 4294901760, %v4542_v43 }
 0x762   : > { %10278 = vmatprep.subr.bf16.mxu1 %v14455_v4  ;;  %v4555_v3 = vand.u32 4294901760, %v13492_v9 }
 0x763   : > { %v13490_v38 = vsub.f32 %v3762_v46, %v4447_v11 }
 0x764   : > { %v4556_v46 = vsub.f32 %v13492_v9, %v4555_v3 }
 0x765   : > { %10280 = vmatpush3.bf16.msra.mxu1 %v13221_v14  ;;  %v3764_v14 = vld [vmem:[#allocation5 + $0x20] sm:$0xff]  ;;  %v4548_v8 = vand.u32 4294901760, %v13490_v38 }
 0x766   : > { %10281 = vmatprep.subr.bf16.mxu1 %v14455_v4  ;;  %v4453_v12 = vand.u32 4294901760, %v3764_v14 }
 0x767   : > { %v4549_v32 = vsub.f32 %v13490_v38, %v4548_v8 }
 0x768   : > { %v13468_v7 = vpack.c.bf16 %v4456_v20, %v4453_v12  ;;  %v13510_v22 = vsub.f32 %v3764_v14, %v4453_v12  ;;  %v14422_v14 = vand.u32 4294901760, %v13520_v45  ;;  %v13548_v12 = vsub.f32 %v3768_v51, %v4465_v15 }
 0x769   : > { %10283 = vmatpush3.bf16.msra.mxu1 %v13229_v19  ;;  %v13462_v19 = vpack.c.bf16 %v4450_v30, %v4447_v11  ;;  %v13540_v11 = vpack.c.bf16 %v4486_v59, %v4483_v58  ;;  %v13550_v20 = vsub.f32 %v3769_v41, %v4468_v33  ;;  %v4550_v1 = vand.u32 4294901760, %v4549_v32 }
 0x76a   : > { %10284 = vmatprep.subr.bf16.mxu1 %v14455_v4  ;;  %v14423_v30 = vand.u32 4294901760, %v13510_v22  ;;  %v4570_v24 = vsub.f32 %v13520_v45, %v14422_v14  ;;  %v4583_v51 = vand.u32 4294901760, %v13537_v52  ;;  %v4525_v15 = vand.u32 4294901760, %v4524_v60 }
 0x76b   : > { %v13564_v33 = vsub.f32 %v3771_v29, %v4474_v63  ;;  %v14424_v32 = vand.u32 4294901760, %v13550_v20  ;;  %v13578_v29 = vsub.f32 %v13483_v56, %v4477_v18  ;;  %v13593_v18 = vsub.f32 %v13502_v17, %v4483_v58 }
 0x76c   : > { %v4571_v14 = vand.u32 4294901760, %v4570_v24 }
 0x76d   : > { %10286 = vmatpush3.bf16.msra.mxu1 %v13242_v57  ;;  %v3766_v57 = vld [vmem:[#allocation5 + $0x30] sm:$0xff] }
 0x76e   : > { %10287 = vmatprep.subr.bf16.mxu1 %v14455_v4  ;;  %v4459_v47 = vand.u32 4294901760, %v3766_v57 }
 0x770   : > { %8527 = vmatmul.mubr.f32.vlgmr.msra.gmra.mrb[6].mxu1 %v13347_v50  ;;  %v13472_v36 = vpack.c.bf16 %v4462_v28, %v4459_v47  ;;  %v3770_v50 = vld [vmem:[#allocation5 + $0x50] sm:$0xff]  ;;  %v13529_v42 = vsub.f32 %v3766_v57, %v4459_v47  ;;  %v10312_v57 = vpack.c.bf16 %v4543_v23, %v4536_v25  ;;  %v4557_v47 = vand.u32 4294901760, %v4556_v46 }
 0x771   : > { %10289 = vmatpush3.bf16.msra.mxu1 %v13457_v10  ;;  %8561 = vmatprep.mubr.msk.f32.mxu1 %vm11213_vm3, %v14523_v34  ;;  %v4471_v26 = vand.u32 4294901760, %v3770_v50  ;;  %v4563_v28 = vsub.f32 %v13510_v22, %v14423_v30  ;;  %v4590_v23 = vand.u32 4294901760, %v13548_v12 }
 0x772   : > { %10290 = vmatprep.subr.bf16.mxu1 %v14455_v4  ;;  %v4576_v43 = vand.u32 4294901760, %v13529_v42  ;;  %v10315_v25 = vpack.c.bf16 %v4557_v47, %v4550_v1  ;;  %v13589_v1 = vsub.f32 %v13485_v21, %v4480_v31  ;;  %v13602_v31 = vsub.f32 %v13504_v44, %v4486_v59 }
 0x773   : > { %v13497_v6 = vpack.c.bf16 %v4474_v63, %v4471_v26  ;;  %v13562_v41 = vsub.f32 %v3770_v50, %v4471_v26  ;;  %v4564_v46 = vand.u32 4294901760, %v4563_v28  ;;  %v4584_v50 = vsub.f32 %v13537_v52, %v4583_v51 }
 0x774   : > { %v4577_v30 = vsub.f32 %v13529_v42, %v4576_v43  ;;  %v4591_v26 = vsub.f32 %v13548_v12, %v4590_v23  ;;  %v4598_v63 = vsub.f32 %v13550_v20, %v14424_v32  ;;  %v4625_v17 = vand.u32 4294901760, %v13589_v1 }
 0x775   : > { %10292 = vmatpush3.bf16.msra.mxu1 %v13462_v19  ;;  %v4604_v60 = vand.u32 4294901760, %v13562_v41  ;;  %v10318_v47 = vpack.c.bf16 %v4571_v14, %v4564_v46  ;;  %v4585_v56 = vand.u32 4294901760, %v4584_v50  ;;  %v4618_v14 = vand.u32 4294901760, %v13578_v29 }
 0x776   : > { %10293 = vmatprep.subr.bf16.mxu1 %v14455_v4  ;;  %v4578_v28 = vand.u32 4294901760, %v4577_v30  ;;  %v4592_v24 = vand.u32 4294901760, %v4591_v26  ;;  %v4626_v44 = vsub.f32 %v13589_v1, %v4625_v17  ;;  %v4632_v59 = vand.u32 4294901760, %v13593_v18 }
 0x777   : > { %v4605_v32 = vsub.f32 %v13562_v41, %v4604_v60  ;;  %v4619_v50 = vsub.f32 %v13578_v29, %v4618_v14  ;;  %v4639_v26 = vand.u32 4294901760, %v13602_v31 }
 0x778   : > { %v10321_v30 = vpack.c.bf16 %v4585_v56, %v4578_v28  ;;  %v4633_v28 = vsub.f32 %v13593_v18, %v4632_v59 }
 0x779   : > { %10295 = vmatpush3.bf16.msra.mxu1 %v13468_v7  ;;  %v4640_v56 = vsub.f32 %v13602_v31, %v4639_v26 }
 0x77a   : > { %10296 = vmatprep.subr.bf16.mxu1 %v14455_v4 }
 0x77d   : > { %10298 = vmatpush3.bf16.msra.mxu1 %v13472_v36 }
 0x77e   : > { %10299 = vmatprep.subr.bf16.mxu1 %v14455_v4 }
 0x781   : > { %10301 = vmatpush3.bf16.msra.mxu1 %v13480_v39 }
 0x782   : > { %10302 = vmatprep.subr.bf16.mxu1 %v14455_v4 }
 0x785   : > { %10304 = vmatpush3.bf16.msra.mxu1 %v13497_v6 }
 0x786   : > { %10305 = vmatprep.subr.bf16.mxu1 %v14455_v4 }
 0x789   : > { %10307 = vmatpush3.bf16.msra.mxu1 %v13523_v40 }
 0x78a   : > { %10308 = vmatprep.subr.bf16.mxu1 %v14455_v4 }
 0x78d   : > { %10310 = vmatpush3.bf16.msra.mxu1 %v13540_v11 }
 0x78e   : > { %10311 = vmatprep.subr.bf16.mxu1 %v14455_v4 }
 0x790   : > { %8562 = vmatmul.mubr.f32.vlgmr.msra.gmra.mrb[6].mxu1 %v4525_v15  ;;  %v4599_v15 = vand.u32 4294901760, %v4598_v63 }
 0x791   : > { %10313 = vmatpush3.bf16.msra.mxu1 %v10312_v57  ;;  %8596 = vmatprep.mubr.msk.f32.mxu1 %vm11213_vm3, %v14523_v34  ;;  %v4611_v57 = vand.u32 4294901760, %v13564_v33 }
 0x792   : > { %10314 = vmatprep.subr.bf16.mxu1 %v14455_v4  ;;  %v10324_v58 = vpack.c.bf16 %v4599_v15, %v4592_v24  ;;  %v4634_v15 = vand.u32 4294901760, %v4633_v28  ;;  %v10384_v28 = vpack.c.bf16 %v4541_v13, %v4534_v16 }
 0x793   : > { %v4612_v21 = vsub.f32 %v13564_v33, %v4611_v57 }
 0x795   : > { %10316 = vmatpush3.bf16.msra.mxu1 %v10315_v25  ;;  %v4606_v25 = vand.u32 4294901760, %v4605_v32  ;;  %v4613_v46 = vand.u32 4294901760, %v4612_v21  ;;  %v4627_v32 = vand.u32 4294901760, %v4626_v44  ;;  %v4641_v21 = vand.u32 4294901760, %v4640_v56 }
 0x796   : > { %10317 = vmatprep.subr.bf16.mxu1 %v14455_v4  ;;  %v10348_v44 = vpack.c.bf16 %v13550_v20, %v13548_v12  ;;  %v10387_v56 = vpack.c.bf16 %v4555_v3, %v4548_v8  ;;  %v10405_v8 = vpack.c.bf16 %v4639_v26, %v4632_v59 }
 0x797   : > { %v10327_v63 = vpack.c.bf16 %v4613_v46, %v4606_v25  ;;  %v10339_v25 = vpack.c.bf16 %v13492_v9, %v13490_v38  ;;  %v10342_v46 = vpack.c.bf16 %v13520_v45, %v13510_v22  ;;  %v10393_v38 = vpack.c.bf16 %v4583_v51, %v4576_v43  ;;  %v5089_v43 = vld [vmem:[#allocation5 + $0x138] sm:$0xff] }
 0x798   : > { %v14542_v9 = vand.u32 4294901760, %v13550_v20 }
 0x799   : > { %10319 = vmatpush3.bf16.msra.mxu1 %v10318_v47  ;;  %v4620_v47 = vand.u32 4294901760, %v4619_v50  ;;  %v10345_v50 = vpack.c.bf16 %v13537_v52, %v13529_v42  ;;  %v5087_v52 = vld [vmem:[#allocation5 + $0x128] sm:$0xff] }
 0x79a   : > { %10320 = vmatprep.subr.bf16.mxu1 %v14455_v4  ;;  %v10396_v13 = vpack.c.bf16 %v14542_v9, %v4590_v23  ;;  %v5118_v20 = vand.u32 4294901760, %v5087_v52  ;;  %v5091_v23 = vld [vmem:[#allocation5 + $0x148] sm:$0xff] }
 0x79b   : > { %v10330_v24 = vpack.c.bf16 %v4627_v32, %v4620_v47  ;;  %v10354_v47 = vpack.c.bf16 %v13589_v1, %v13578_v29  ;;  %v10357_v32 = vpack.c.bf16 %v13602_v31, %v13593_v18  ;;  %v5092_v1 = vld [vmem:[#allocation5 + $0x150] sm:$0xff]  ;;  %v5093_v18 = vld [vmem:[#allocation5 + $0x158] sm:$0xff] }
 0x79c   : > { %v5133_v59 = vand.u32 4294901760, %v5092_v1  ;;  %v5136_v26 = vand.u32 4294901760, %v5093_v18  ;;  %v13797_v9 = vsub.f32 %v5087_v52, %v5118_v20 }
 0x79d   : > { %10322 = vmatpush3.bf16.msra.mxu1 %v10321_v30  ;;  %v10333_v30 = vpack.c.bf16 %v4641_v21, %v4634_v15  ;;  %v13762_v15 = vld [vmem:[#allocation5 + $0x168] sm:$0xff]  ;;  %v13765_v21 = vand.u32 4294901760, %v13350_v61 }
 0x79e   : > { %10323 = vmatprep.subr.bf16.mxu1 %v14455_v4 }
 0x7a1   : > { %10325 = vmatpush3.bf16.msra.mxu1 %v10324_v58  ;;  %v10336_v58 = vpack.c.bf16 %v13477_v54, %v13475_v27  ;;  %v14540_v27 = vand.u32 4294901760, %v13510_v22  ;;  %v14541_v54 = vand.u32 4294901760, %v13520_v45  ;;  %v10402_v22 = vpack.c.bf16 %v4625_v17, %v4618_v14  ;;  %v5084_v45 = vld [vmem:[#allocation5 + $0x110] sm:$0xff] }
 0x7a2   : > { %10326 = vmatprep.subr.bf16.mxu1 %v14455_v4 }
 0x7a3   : > { %v10390_v16 = vpack.c.bf16 %v14541_v54, %v14540_v27 }
 0x7a5   : > { %10328 = vmatpush3.bf16.msra.mxu1 %v10327_v63  ;;  %v10351_v63 = vpack.c.bf16 %v13564_v33, %v13562_v41  ;;  %v5124_v33 = vand.u32 4294901760, %v5089_v43 }
 0x7a6   : > { %10329 = vmatprep.subr.bf16.mxu1 %v14455_v4 }
 0x7a9   : > { %10331 = vmatpush3.bf16.msra.mxu1 %v10330_v24  ;;  %v13760_v24 = vld [vmem:[#allocation5 + $0x160] sm:$0xff] }
 0x7aa   : > { %10332 = vmatprep.subr.bf16.mxu1 %v14455_v4 }
 0x7ad   : > { %10334 = vmatpush3.bf16.msra.mxu1 %v10333_v30 }
 0x7ae   : > { %10335 = vmatprep.subr.bf16.mxu1 %v14455_v4 }
 0x7b0   : > { %8597 = vmatmul.mubr.f32.vlgmr.msra.gmra.mrb[6].mxu1 %v13488_v53 }
 0x7b1   : > { %10337 = vmatpush3.bf16.msra.mxu1 %v10336_v58  ;;  %8631 = vmatprep.mubr.msk.f32.mxu1 %vm11213_vm3, %v14523_v34 }
 0x7b2   : > { %10338 = vmatprep.subr.bf16.mxu1 %v14455_v4 }
 0x7b5   : > { %10340 = vmatpush3.bf16.msra.mxu1 %v10339_v25 }
 0x7b6   : > { %10341 = vmatprep.subr.bf16.mxu1 %v14455_v4 }
 0x7b9   : > { %10343 = vmatpush3.bf16.msra.mxu1 %v10342_v46 }
 0x7ba   : > { %10344 = vmatprep.subr.bf16.mxu1 %v14455_v4 }
 0x7bd   : > { %10346 = vmatpush3.bf16.msra.mxu1 %v10345_v50  ;;  %v13774_v50 = vpack.c.bf16 %v5136_v26, %v5133_v59 }
 0x7be   : > { %10347 = vmatprep.subr.bf16.mxu1 %v14455_v4 }
 0x7c1   : > { %10349 = vmatpush3.bf16.msra.mxu1 %v10348_v44  ;;  %v5139_v44 = vand.u32 4294901760, %v13760_v24 }
 0x7c2   : > { %10350 = vmatprep.subr.bf16.mxu1 %v14455_v4 }
 0x7c5   : > { %10352 = vmatpush3.bf16.msra.mxu1 %v10351_v63  ;;  %v5142_v63 = vand.u32 4294901760, %v13762_v15 }
 0x7c6   : > { %10353 = vmatprep.subr.bf16.mxu1 %v14455_v4 }
 0x7c9   : > { %10355 = vmatpush3.bf16.msra.mxu1 %v10354_v47  ;;  %v13779_v47 = vld [vmem:[#allocation5 + $0x170] sm:$0xff] }
 0x7ca   : > { %10356 = vmatprep.subr.bf16.mxu1 %v14455_v4 }
 0x7cd   : > { %10358 = vmatpush3.bf16.msra.mxu1 %v10357_v32  ;;  %v13781_v32 = vld [vmem:[#allocation5 + $0x178] sm:$0xff] }
 0x7ce   : > { %10359 = vmatprep.subr.bf16.mxu1 %v14455_v4 }
 0x7d0   : > { %8632 = vmatmul.mubr.f32.vlgmr.msra.gmra.mrb[6].mxu1 %v13508_v37  ;;  %v10399_v37 = vpack.c.bf16 %v4611_v57, %v4604_v60  ;;  %v5130_v57 = vand.u32 4294901760, %v5091_v23 }
 0x7d1   : > { %10361 = vmatpush3.bf16.msra.mxu1 %v13457_v10  ;;  %8666 = vmatprep.mubr.msk.f32.mxu1 %vm11213_vm3, %v14523_v34 }
 0x7d2   : > { %10362 = vmatprep.subr.bf16.mxu1 %v14455_v4 }
 0x7d5   : > { %10364 = vmatpush3.bf16.msra.mxu1 %v13462_v19 }
 0x7d6   : > { %10365 = vmatprep.subr.bf16.mxu1 %v14455_v4 }
 0x7d9   : > { %10367 = vmatpush3.bf16.msra.mxu1 %v13468_v7 }
 0x7da   : > { %10368 = vmatprep.subr.bf16.mxu1 %v14455_v4 }
 0x7dd   : > { %10370 = vmatpush3.bf16.msra.mxu1 %v13472_v36 }
 0x7de   : > { %10371 = vmatprep.subr.bf16.mxu1 %v14455_v4 }
 0x7e1   : > { %10373 = vmatpush3.bf16.msra.mxu1 %v13480_v39 }
 0x7e2   : > { %10374 = vmatprep.subr.bf16.mxu1 %v14455_v4 }
 0x7e5   : > { %10376 = vmatpush3.bf16.msra.mxu1 %v13497_v6 }
 0x7e6   : > { %10377 = vmatprep.subr.bf16.mxu1 %v14455_v4 }
 0x7e9   : > { %10379 = vmatpush3.bf16.msra.mxu1 %v13523_v40 }
 0x7ea   : > { %10380 = vmatprep.subr.bf16.mxu1 %v14455_v4 }
 0x7ed   : > { %10382 = vmatpush3.bf16.msra.mxu1 %v13540_v11 }
 0x7ee   : > { %10383 = vmatprep.subr.bf16.mxu1 %v14455_v4 }
 0x7f0   : > { %8667 = vmatmul.mubr.f32.vlgmr.msra.gmra.mrb[6].mxu1 %v4523_v62 }
 0x7f1   : > { %10385 = vmatpush3.bf16.msra.mxu1 %v10384_v28  ;;  %8701 = vmatprep.mubr.msk.f32.mxu1 %vm11213_vm3, %v14523_v34  ;;  %v13785_v28 = vsub.f32 %v13350_v61, %v13765_v21  ;;  %v13800_v61 = vpack.c.bf16 %v5142_v63, %v5139_v44 }
 0x7f2   : > { %10386 = vmatprep.subr.bf16.mxu1 %v14455_v4 }
 0x7f5   : > { %10388 = vmatpush3.bf16.msra.mxu1 %v10387_v56 }
 0x7f6   : > { %10389 = vmatprep.subr.bf16.mxu1 %v14455_v4 }
 0x7f9   : > { %10391 = vmatpush3.bf16.msra.mxu1 %v10390_v16 }
 0x7fa   : > { %10392 = vmatprep.subr.bf16.mxu1 %v14455_v4 }
 0x7fd   : > { %10394 = vmatpush3.bf16.msra.mxu1 %v10393_v38 }
 0x7fe   : > { %10395 = vmatprep.subr.bf16.mxu1 %v14455_v4 }
 0x801   : > { %10397 = vmatpush3.bf16.msra.mxu1 %v10396_v13  ;;  %v5145_v13 = vand.u32 4294901760, %v13779_v47 }
 0x802   : > { %10398 = vmatprep.subr.bf16.mxu1 %v14455_v4 }
 0x805   : > { %10400 = vmatpush3.bf16.msra.mxu1 %v10399_v37  ;;  %v5148_v37 = vand.u32 4294901760, %v13781_v32 }
 0x806   : > { %10401 = vmatprep.subr.bf16.mxu1 %v14455_v4 }
 0x809   : > { %10403 = vmatpush3.bf16.msra.mxu1 %v10402_v22  ;;  %v5185_v22 = vand.u32 4294901760, %v13785_v28 }
 0x80a   : > { %10404 = vmatprep.subr.bf16.mxu1 %v14455_v4 }
 0x80d   : > { %10406 = vmatpush3.bf16.msra.mxu1 %v10405_v8 }
 0x80e   : > { %10407 = vmatprep.subr.bf16.mxu1 %v14455_v4 }
 0x810   : > { %8702 = vmatmul.mubr.f32.vlgmr.msra.gmra.mrb[6].mxu1 %v13488_v53 }
 0x811   : > { %10409 = vmatpush3.bf16.msra.mxu1 %v13457_v10  ;;  %8736 = vmatprep.mubr.msk.f32.mxu1 %vm11213_vm3, %v14523_v34  ;;  %v5082_v10 = vld [vmem:[#allocation5 + $0x100] sm:$0xff] }
 0x812   : > { %10410 = vmatprep.subr.bf16.mxu1 %v14455_v4  ;;  %v5103_v3 = vand.u32 4294901760, %v5082_v10 }
 0x814   : > { %v13752_v31 = vsub.f32 %v5082_v10, %v5103_v3 }
 0x815   : > { %10412 = vmatpush3.bf16.msra.mxu1 %v13462_v19  ;;  %v5083_v19 = vld [vmem:[#allocation5 + $0x108] sm:$0xff] }
 0x816   : > { %10413 = vmatprep.subr.bf16.mxu1 %v14455_v4  ;;  %v5196_v25 = vand.u32 4294901760, %v13752_v31 }
 0x818   : > { %v5197_v27 = vsub.f32 %v13752_v31, %v5196_v25 }
 0x819   : > { %10415 = vmatpush3.bf16.msra.mxu1 %v13468_v7  ;;  %v5106_v7 = vand.u32 4294901760, %v5083_v19 }
 0x81a   : > { %10416 = vmatprep.subr.bf16.mxu1 %v14455_v4  ;;  %v5198_v10 = vand.u32 4294901760, %v5197_v27 }
 0x81b   : > { %v13734_v62 = vpack.c.bf16 %v5106_v7, %v5103_v3  ;;  %v13754_v14 = vsub.f32 %v5083_v19, %v5106_v7 }
 0x81d   : > { %10418 = vmatpush3.bf16.msra.mxu1 %v13472_v36  ;;  %v5085_v36 = vld [vmem:[#allocation5 + $0x118] sm:$0xff]  ;;  %v5203_v46 = vand.u32 4294901760, %v13754_v14 }
 0x81e   : > { %10419 = vmatprep.subr.bf16.mxu1 %v14455_v4  ;;  %v5112_v42 = vand.u32 4294901760, %v5085_v36 }
 0x81f   : > { %v5204_v54 = vsub.f32 %v13754_v14, %v5203_v46 }
 0x820   : > { %v13769_v58 = vsub.f32 %v5085_v36, %v5112_v42  ;;  %v13817_v36 = vpack.c.bf16 %v5148_v37, %v5145_v13 }
 0x821   : > { %10421 = vmatpush3.bf16.msra.mxu1 %v13480_v39  ;;  %v5109_v39 = vand.u32 4294901760, %v5084_v45  ;;  %v5205_v19 = vand.u32 4294901760, %v5204_v54 }
 0x822   : > { %10422 = vmatprep.subr.bf16.mxu1 %v14455_v4  ;;  %v5217_v38 = vand.u32 4294901760, %v13769_v58 }
 0x823   : > { %v13767_v30 = vsub.f32 %v5084_v45, %v5109_v39  ;;  %v13814_v45 = vsub.f32 %v5089_v43, %v5124_v33 }
 0x824   : > { %v5218_v7 = vsub.f32 %v13769_v58, %v5217_v38 }
 0x825   : > { %10424 = vmatpush3.bf16.msra.mxu1 %v13497_v6  ;;  %v5086_v6 = vld [vmem:[#allocation5 + $0x120] sm:$0xff]  ;;  %v5210_v16 = vand.u32 4294901760, %v13767_v30 }
 0x826   : > { %10425 = vmatprep.subr.bf16.mxu1 %v14455_v4  ;;  %v5115_v12 = vand.u32 4294901760, %v5086_v6  ;;  %v5219_v43 = vand.u32 4294901760, %v5218_v7 }
 0x827   : > { %v5211_v3 = vsub.f32 %v13767_v30, %v5210_v16 }
 0x828   : > { %v13745_v51 = vpack.c.bf16 %v5118_v20, %v5115_v12  ;;  %v13787_v56 = vsub.f32 %v5086_v6, %v5115_v12  ;;  %v5186_v6 = vsub.f32 %v13785_v28, %v5185_v22  ;;  %v13827_v12 = vsub.f32 %v5091_v23, %v5130_v57 }
 0x829   : > { %10427 = vmatpush3.bf16.msra.mxu1 %v13523_v40  ;;  %v13739_v40 = vpack.c.bf16 %v5112_v42, %v5109_v39  ;;  %v14425_v42 = vand.u32 4294901760, %v13797_v9  ;;  %v10456_v20 = vpack.c.bf16 %v5205_v19, %v5198_v10  ;;  %v13839_v23 = vsub.f32 %v5092_v1, %v5133_v59 }
 0x82a   : > { %10428 = vmatprep.subr.bf16.mxu1 %v14455_v4  ;;  %v5224_v39 = vand.u32 4294901760, %v13787_v56  ;;  %v14426_v19 = vand.u32 4294901760, %v13827_v12 }
 0x82d   : > { %10430 = vmatpush3.bf16.msra.mxu1 %v13540_v11  ;;  %v5088_v11 = vld [vmem:[#allocation5 + $0x130] sm:$0xff] }
 0x82e   : > { %10431 = vmatprep.subr.bf16.mxu1 %v14455_v4  ;;  %v5121_v41 = vand.u32 4294901760, %v5088_v11 }
 0x830   : > { %8737 = vmatmul.mubr.f32.vlgmr.msra.gmra.mrb[6].mxu1 %v13488_v53  ;;  %v5090_v53 = vld [vmem:[#allocation5 + $0x140] sm:$0xff]  ;;  %v13749_v29 = vpack.c.bf16 %v5124_v33, %v5121_v41  ;;  %v13806_v8 = vsub.f32 %v5088_v11, %v5121_v41  ;;  %v5212_v11 = vand.u32 4294901760, %v5211_v3  ;;  %v5225_v41 = vsub.f32 %v13787_v56, %v5224_v39 }
 0x831   : > { %10433 = vmatpush3.bf16.msra.mxu1 %v13734_v62  ;;  %8771 = vmatprep.mubr.msk.f32.mxu1 %vm11213_vm3, %v14523_v34  ;;  %v5127_v60 = vand.u32 4294901760, %v5090_v53  ;;  %v5232_v33 = vsub.f32 %v13797_v9, %v14425_v42 }
 0x832   : > { %10434 = vmatprep.subr.bf16.mxu1 %v14455_v4  ;;  %v5238_v27 = vand.u32 4294901760, %v13806_v8  ;;  %v10459_v54 = vpack.c.bf16 %v5219_v43, %v5212_v11  ;;  %v5226_v3 = vand.u32 4294901760, %v5225_v41  ;;  %v13866_v11 = vsub.f32 %v13762_v15, %v5142_v63 }
 0x833   : > { %v13757_v17 = vpack.c.bf16 %v5130_v57, %v5127_v60  ;;  %v13825_v52 = vsub.f32 %v5090_v53, %v5127_v60  ;;  %v5245_v53 = vand.u32 4294901760, %v13814_v45  ;;  %v5187_v60 = vand.u32 4294901760, %v5186_v6 }
 0x834   : > { %v13841_v57 = vsub.f32 %v5093_v18, %v5136_v26  ;;  %v5233_v7 = vand.u32 4294901760, %v5232_v33  ;;  %v5239_v42 = vsub.f32 %v13806_v8, %v5238_v27  ;;  %v13855_v18 = vsub.f32 %v13760_v24, %v5139_v44 }
 0x835   : > { %10436 = vmatpush3.bf16.msra.mxu1 %v13739_v40  ;;  %v5252_v10 = vand.u32 4294901760, %v13825_v52  ;;  %v5246_v1 = vsub.f32 %v13814_v45, %v5245_v53  ;;  %v5260_v26 = vsub.f32 %v13827_v12, %v14426_v19  ;;  %v5266_v6 = vand.u32 4294901760, %v13839_v23 }
 0x836   : > { %10437 = vmatprep.subr.bf16.mxu1 %v14455_v4  ;;  %v10462_v43 = vpack.c.bf16 %v5233_v7, %v5226_v3  ;;  %v5240_v41 = vand.u32 4294901760, %v5239_v42  ;;  %v13870_v44 = vsub.f32 %v13779_v47, %v5145_v13  ;;  %v13879_v63 = vsub.f32 %v13781_v32, %v5148_v37 }
 0x837   : > { %v5253_v59 = vsub.f32 %v13825_v52, %v5252_v10  ;;  %v5247_v24 = vand.u32 4294901760, %v5246_v1  ;;  %v5267_v19 = vsub.f32 %v13839_v23, %v5266_v6  ;;  %v5287_v47 = vand.u32 4294901760, %v13866_v11 }
 0x838   : > { %v5294_v37 = vand.u32 4294901760, %v13870_v44 }
 0x839   : > { %10439 = vmatpush3.bf16.msra.mxu1 %v13745_v51  ;;  %v5254_v33 = vand.u32 4294901760, %v5253_v59  ;;  %v10465_v42 = vpack.c.bf16 %v5247_v24, %v5240_v41  ;;  %v5268_v3 = vand.u32 4294901760, %v5267_v19  ;;  %v5288_v32 = vsub.f32 %v13866_v11, %v5287_v47 }
 0x83a   : > { %10440 = vmatprep.subr.bf16.mxu1 %v14455_v4  ;;  %v5301_v59 = vand.u32 4294901760, %v13879_v63  ;;  %v5295_v41 = vsub.f32 %v13870_v44, %v5294_v37 }
 0x83b   : > { %v5289_v19 = vand.u32 4294901760, %v5288_v32  ;;  %v10492_v32 = vpack.c.bf16 %v13827_v12, %v13825_v52  ;;  %v14554_v52 = vld [vmem:[#allocation16_spill] sm:$0xff] }
 0x83c   : > { %v5302_v24 = vsub.f32 %v13879_v63, %v5301_v59 }
 0x83d   : > { %10442 = vmatpush3.bf16.msra.mxu1 %v13749_v29 }
 0x83e   : > { %10443 = vmatprep.subr.bf16.mxu1 %v14455_v4 }
 0x841   : > { %10445 = vmatpush3.bf16.msra.mxu1 %v13757_v17 }
 0x842   : > { %10446 = vmatprep.subr.bf16.mxu1 %v14455_v4 }
 0x845   : > { %10448 = vmatpush3.bf16.msra.mxu1 %v13774_v50 }
 0x846   : > { %10449 = vmatprep.subr.bf16.mxu1 %v14455_v4 }
 0x849   : > { %10451 = vmatpush3.bf16.msra.mxu1 %v13800_v61 }
 0x84a   : > { %10452 = vmatprep.subr.bf16.mxu1 %v14455_v4 }
 0x84d   : > { %10454 = vmatpush3.bf16.msra.mxu1 %v13817_v36 }
 0x84e   : > { %10455 = vmatprep.subr.bf16.mxu1 %v14455_v4 }
 0x850   : > { %8772 = vmatmul.mubr.f32.vlgmr.msra.gmra.mrb[6].mxu1 %v5187_v60  ;;  %v5261_v60 = vand.u32 4294901760, %v5260_v26 }
 0x851   : > { %10457 = vmatpush3.bf16.msra.mxu1 %v10456_v20  ;;  %8806 = vmatprep.mubr.msk.f32.mxu1 %vm11213_vm3, %v14523_v34  ;;  %v5273_v20 = vand.u32 4294901760, %v13841_v57 }
 0x852   : > { %10458 = vmatprep.subr.bf16.mxu1 %v14455_v4  ;;  %v10468_v13 = vpack.c.bf16 %v5261_v60, %v5254_v33  ;;  %v5296_v60 = vand.u32 4294901760, %v5295_v41  ;;  %v10528_v41 = vpack.c.bf16 %v5203_v46, %v5196_v25 }
 0x853   : > { %v5274_v15 = vsub.f32 %v13841_v57, %v5273_v20  ;;  %v10543_v46 = vpack.c.bf16 %v5273_v20, %v5266_v6  ;;  %v14562_v6 = vld [vmem:[#allocation31_spill] sm:$0xff]  ;;  %v14563_v20 = vld [vmem:[#allocation32_spill] sm:$0xff] }
 0x855   : > { %10460 = vmatpush3.bf16.msra.mxu1 %v10459_v54  ;;  %v5280_v54 = vand.u32 4294901760, %v13855_v18  ;;  %v5275_v7 = vand.u32 4294901760, %v5274_v15  ;;  %v5303_v15 = vand.u32 4294901760, %v5302_v24  ;;  %v10531_v24 = vpack.c.bf16 %v5217_v38, %v5210_v16  ;;  %v14546_v38 = vld [vmem:[#allocation26_spill] sm:$0xff] }
 0x856   : > { %10461 = vmatprep.subr.bf16.mxu1 %v14455_v4 }
 0x857   : > { %v5281_v1 = vsub.f32 %v13855_v18, %v5280_v54  ;;  %v10471_v26 = vpack.c.bf16 %v5275_v7, %v5268_v3  ;;  %v10483_v3 = vpack.c.bf16 %v13769_v58, %v13767_v30  ;;  %v10486_v7 = vpack.c.bf16 %v13797_v9, %v13787_v56 }
 0x858   : > { %v10537_v30 = vpack.c.bf16 %v5245_v53, %v5238_v27  ;;  %v14544_v58 = vand.u32 4294901760, %v13827_v12  ;;  %v10549_v56 = vpack.c.bf16 %v5301_v59, %v5294_v37  ;;  %v14555_v12 = vld [vmem:[#allocation17_spill] sm:$0xff]  ;;  %v14556_v27 = vld [vmem:[#allocation14_spill] sm:$0xff]  ;;  %v14557_v53 = vld [vmem:[#allocation15_spill] sm:$0xff] }
 0x859   : > { %10463 = vmatpush3.bf16.msra.mxu1 %v10462_v43  ;;  %v5282_v43 = vand.u32 4294901760, %v5281_v1  ;;  %v10489_v1 = vpack.c.bf16 %v13814_v45, %v13806_v8  ;;  %v14550_v8 = vld [vmem:[#allocation30_spill] sm:$0xff]  ;;  %v14551_v45 = vld [vmem:[#allocation23_spill] sm:$0xff] }
 0x85a   : > { %10464 = vmatprep.subr.bf16.mxu1 %v14455_v4  ;;  %v10540_v25 = vpack.c.bf16 %v14544_v58, %v5252_v10  ;;  %v14560_v10 = vld [vmem:[#allocation20_spill] sm:$0xff]  ;;  %v14569_v37 = vld [vmem:[#allocation38_spill] sm:$0xff] }
 0x85b   : > { %v10474_v33 = vpack.c.bf16 %v5289_v19, %v5282_v43  ;;  %v10498_v43 = vpack.c.bf16 %v13866_v11, %v13855_v18  ;;  %v10501_v19 = vpack.c.bf16 %v13879_v63, %v13870_v44  ;;  %v14561_v18 = vld [vmem:[#allocation21_spill] sm:$0xff]  ;;  %v14565_v44 = vld [vmem:[#allocation34_spill] sm:$0xff]  ;;  %v14566_v63 = vld [vmem:[#allocation35_spill] sm:$0xff] }
 0x85c   : > { %v14564_v11 = vld [vmem:[#allocation33_spill] sm:$0xff] }
 0x85d   : > { %10466 = vmatpush3.bf16.msra.mxu1 %v10465_v42  ;;  %v10477_v42 = vpack.c.bf16 %v5303_v15, %v5296_v60 }
 0x85e   : > { %10467 = vmatprep.subr.bf16.mxu1 %v14455_v4 }
 0x861   : > { %10469 = vmatpush3.bf16.msra.mxu1 %v10468_v13  ;;  %v10480_v13 = vpack.c.bf16 %v13754_v14, %v13752_v31  ;;  %v14543_v31 = vand.u32 4294901760, %v13797_v9  ;;  %v14547_v9 = vld [vmem:[#allocation27_spill] sm:$0xff] }
 0x862   : > { %10470 = vmatprep.subr.bf16.mxu1 %v14455_v4 }
 0x863   : > { %v10534_v14 = vpack.c.bf16 %v14543_v31, %v5224_v39  ;;  %v14553_v39 = vld [vmem:[#allocation25_spill] sm:$0xff] }
 0x865   : > { %10472 = vmatpush3.bf16.msra.mxu1 %v10471_v26  ;;  %v10495_v26 = vpack.c.bf16 %v13841_v57, %v13839_v23  ;;  %v14558_v23 = vld [vmem:[#allocation18_spill] sm:$0xff]  ;;  %v14559_v57 = vld [vmem:[#allocation19_spill] sm:$0xff] }
 0x866   : > { %10473 = vmatprep.subr.bf16.mxu1 %v14455_v4 }
 0x869   : > { %10475 = vmatpush3.bf16.msra.mxu1 %v10474_v33 }
 0x86a   : > { %10476 = vmatprep.subr.bf16.mxu1 %v14455_v4 }
 0x86d   : > { %10478 = vmatpush3.bf16.msra.mxu1 %v10477_v42 }
 0x86e   : > { %10479 = vmatprep.subr.bf16.mxu1 %v14455_v4 }
 0x870   : > { %8807 = vmatmul.mubr.f32.vlgmr.msra.gmra.mrb[6].mxu1 %v13765_v21 }
 0x871   : > { %10481 = vmatpush3.bf16.msra.mxu1 %v10480_v13  ;;  %8841 = vmatprep.mubr.msk.f32.mxu1 %vm11213_vm3, %v14523_v34 }
 0x872   : > { %10482 = vmatprep.subr.bf16.mxu1 %v14455_v4 }
 0x875   : > { %10484 = vmatpush3.bf16.msra.mxu1 %v10483_v3 }
 0x876   : > { %10485 = vmatprep.subr.bf16.mxu1 %v14455_v4 }
 0x879   : > { %10487 = vmatpush3.bf16.msra.mxu1 %v10486_v7 }
 0x87a   : > { %10488 = vmatprep.subr.bf16.mxu1 %v14455_v4 }
 0x87d   : > { %10490 = vmatpush3.bf16.msra.mxu1 %v10489_v1 }
 0x87e   : > { %10491 = vmatprep.subr.bf16.mxu1 %v14455_v4 }
 0x881   : > { %10493 = vmatpush3.bf16.msra.mxu1 %v10492_v32 }
 0x882   : > { %10494 = vmatprep.subr.bf16.mxu1 %v14455_v4 }
 0x885   : > { %10496 = vmatpush3.bf16.msra.mxu1 %v10495_v26 }
 0x886   : > { %10497 = vmatprep.subr.bf16.mxu1 %v14455_v4 }
 0x889   : > { %10499 = vmatpush3.bf16.msra.mxu1 %v10498_v43 }
 0x88a   : > { %10500 = vmatprep.subr.bf16.mxu1 %v14455_v4 }
 0x88d   : > { %10502 = vmatpush3.bf16.msra.mxu1 %v10501_v19 }
 0x88e   : > { %10503 = vmatprep.subr.bf16.mxu1 %v14455_v4 }
 0x890   : > { %8842 = vmatmul.mubr.f32.vlgmr.msra.gmra.mrb[6].mxu1 %v13785_v28  ;;  %v10546_v28 = vpack.c.bf16 %v5287_v47, %v5280_v54  ;;  %v14567_v54 = vld [vmem:[#allocation36_spill] sm:$0xff]  ;;  %v14568_v47 = vld [vmem:[#allocation37_spill] sm:$0xff] }
 0x891   : > { %10505 = vmatpush3.bf16.msra.mxu1 %v13734_v62  ;;  %8876 = vmatprep.mubr.msk.f32.mxu1 %vm11213_vm3, %v14523_v34 }
 0x892   : > { %10506 = vmatprep.subr.bf16.mxu1 %v14455_v4 }
 0x895   : > { %10508 = vmatpush3.bf16.msra.mxu1 %v13739_v40 }
 0x896   : > { %10509 = vmatprep.subr.bf16.mxu1 %v14455_v4 }
 0x899   : > { %10511 = vmatpush3.bf16.msra.mxu1 %v13745_v51 }
 0x89a   : > { %10512 = vmatprep.subr.bf16.mxu1 %v14455_v4 }
 0x89d   : > { %10514 = vmatpush3.bf16.msra.mxu1 %v13749_v29 }
 0x89e   : > { %10515 = vmatprep.subr.bf16.mxu1 %v14455_v4 }
 0x8a1   : > { %10517 = vmatpush3.bf16.msra.mxu1 %v13757_v17 }
 0x8a2   : > { %10518 = vmatprep.subr.bf16.mxu1 %v14455_v4 }
 0x8a5   : > { %10520 = vmatpush3.bf16.msra.mxu1 %v13774_v50 }
 0x8a6   : > { %10521 = vmatprep.subr.bf16.mxu1 %v14455_v4 }
 0x8a9   : > { %10523 = vmatpush3.bf16.msra.mxu1 %v13800_v61 }
 0x8aa   : > { %10524 = vmatprep.subr.bf16.mxu1 %v14455_v4 }
 0x8ad   : > { %10526 = vmatpush3.bf16.msra.mxu1 %v13817_v36 }
 0x8ae   : > { %10527 = vmatprep.subr.bf16.mxu1 %v14455_v4 }
 0x8b0   : > { %8877 = vmatmul.mubr.f32.vlgmr.msra.gmra.mrb[6].mxu1 %v5185_v22  ;;  %v14549_v22 = vld [vmem:[#allocation29_spill] sm:$0xff] }
 0x8b1   : > { %10529 = vmatpush3.bf16.msra.mxu1 %v10528_v41  ;;  %8911 = vmatprep.mubr.msk.f32.mxu1 %vm11213_vm3, %v14523_v34 }
 0x8b2   : > { %10530 = vmatprep.subr.bf16.mxu1 %v14455_v4 }
 0x8b5   : > { %10532 = vmatpush3.bf16.msra.mxu1 %v10531_v24 }
 0x8b6   : > { %10533 = vmatprep.subr.bf16.mxu1 %v14455_v4 }
 0x8b9   : > { %10535 = vmatpush3.bf16.msra.mxu1 %v10534_v14 }
 0x8ba   : > { %10536 = vmatprep.subr.bf16.mxu1 %v14455_v4 }
 0x8bd   : > { %10538 = vmatpush3.bf16.msra.mxu1 %v10537_v30 }
 0x8be   : > { %10539 = vmatprep.subr.bf16.mxu1 %v14455_v4 }
 0x8c1   : > { %10541 = vmatpush3.bf16.msra.mxu1 %v10540_v25 }
 0x8c2   : > { %10542 = vmatprep.subr.bf16.mxu1 %v14455_v4 }
 0x8c5   : > { %10544 = vmatpush3.bf16.msra.mxu1 %v10543_v46 }
 0x8c6   : > { %10545 = vmatprep.subr.bf16.mxu1 %v14455_v4 }
 0x8c9   : > { %10547 = vmatpush3.bf16.msra.mxu1 %v10546_v28 }
 0x8ca   : > { %10548 = vmatprep.subr.bf16.mxu1 %v14455_v4 }
 0x8cd   : > { %10550 = vmatpush3.bf16.msra.mxu1 %v10549_v56 }
 0x8ce   : > { %10551 = vmatprep.subr.bf16.mxu1 %v14455_v4 }
 0x8d0   : > { %8912 = vmatmul.mubr.f32.vlgmr.msra.gmra.mrb[6].mxu1 %v13765_v21 }
 0x8d1   : > { %10553 = vmatpush3.bf16.msra.mxu1 %v13734_v62  ;;  %8946 = vmatprep.mubr.msk.f32.mxu1 %vm11213_vm3, %v14523_v34 }
 0x8d2   : > { %10554 = vmatprep.subr.bf16.mxu1 %v14455_v4 }
 0x8d5   : > { %10556 = vmatpush3.bf16.msra.mxu1 %v13739_v40 }
 0x8d6   : > { %10557 = vmatprep.subr.bf16.mxu1 %v14455_v4 }
 0x8d9   : > { %10559 = vmatpush3.bf16.msra.mxu1 %v13745_v51 }
 0x8da   : > { %10560 = vmatprep.subr.bf16.mxu1 %v14455_v4 }
 0x8dd   : > { %10562 = vmatpush3.bf16.msra.mxu1 %v13749_v29 }
 0x8de   : > { %10563 = vmatprep.subr.bf16.mxu1 %v14455_v4 }
 0x8e1   : > { %10565 = vmatpush3.bf16.msra.mxu1 %v13757_v17 }
 0x8e2   : > { %10566 = vmatprep.subr.bf16.mxu1 %v14455_v4 }
 0x8e5   : > { %10568 = vmatpush3.bf16.msra.mxu1 %v13774_v50 }
 0x8e6   : > { %10569 = vmatprep.subr.bf16.mxu1 %v14455_v4 }
 0x8e9   : > { %10571 = vmatpush3.bf16.msra.mxu1 %v13800_v61  ;;  %v14548_v61 = vld [vmem:[#allocation28_spill] sm:$0xff] }
 0x8ea   : > { %10572 = vmatprep.subr.bf16.mxu1 %v14455_v4 }
 0x8ed   : > { %10574 = vmatpush3.bf16.msra.mxu1 %v13817_v36  ;;  %v14552_v36 = vld [vmem:[#allocation24_spill] sm:$0xff] }
 0x8f0   : > { %8947 = vmatmul.mubr.f32.vlgmr.msra.gmra.mrb[6].mxu1 %v13765_v21  ;;  %v14545_v21 = vld [vmem:[#allocation22_spill] sm:$0xff] }
 0x9c3   : > { %v14012_v62 = vpop.f32.mrb[6].mxu1 }
 0x9c4   : > { %v14015_v40 = vand.u32 4294901760, %v14012_v62  ;;  %v8948_v51 = vpop.f32.mrb[7].mxu1 }
 0x9c6   : > { %v5826_v29 = vsub.f32 %v14012_v62, %v14015_v40 }
 0x9c8   : > { %v5827_v17 = vand.u32 4294901760, %v5826_v29 }
 0x9ca   : > { %v5828_v50 = vsub.f32 %v5826_v29, %v5827_v17 }
 0x9cc   : > { %v5829_v16 = vand.u32 4294901760, %v5828_v50 }
 0x9ce   : > { %8982 = vmatmul.mubr.f32.vlgmr.msra.gmra.mrb[2].mxu0 %v5829_v16 }
 0x9cf   : > { %10601 = vmatpush3.bf16.msra.mxu0 %v12851_v2  ;;  %9016 = vmatprep.mubr.msk.f32.mxu0 %vm11213_vm3, %v14523_v34 }
 0x9d0   : > { %10602 = vmatprep.subr.bf16.mxu0 %v14455_v4 }
 0x9d3   : > { %10604 = vmatpush3.bf16.msra.mxu0 %v12874_v55 }
 0x9d4   : > { %10605 = vmatprep.subr.bf16.mxu0 %v14455_v4 }
 0x9d7   : > { %10607 = vmatpush3.bf16.msra.mxu0 %v12888_v49 }
 0x9d8   : > { %10608 = vmatprep.subr.bf16.mxu0 %v14455_v4 }
 0x9db   : > { %10610 = vmatpush3.bf16.msra.mxu0 %v12899_v0 }
 0x9dc   : > { %10611 = vmatprep.subr.bf16.mxu0 %v14455_v4 }
 0x9df   : > { %10613 = vmatpush3.bf16.msra.mxu0 %v12903_v35 }
 0x9e0   : > { %10614 = vmatprep.subr.bf16.mxu0 %v14455_v4 }
 0x9e3   : > { %10616 = vmatpush3.bf16.msra.mxu0 %v12756_v48 }
 0x9e4   : > { %10617 = vmatprep.subr.bf16.mxu0 %v14455_v4 }
 0x9e7   : > { %10619 = vmatpush3.bf16.msra.mxu0 %v12760_v5 }
 0x9e8   : > { %10620 = vmatprep.subr.bf16.mxu0 %v14455_v4 }
 0x9eb   : > { %10622 = vmatpush3.bf16.msra.mxu0 %v14545_v21 }
 0x9ec   : > { %10623 = vmatprep.subr.bf16.mxu0 %v14455_v4 }
 0x9ee   : > { %9017 = vmatmul.mubr.f32.vlgmr.msra.gmra.mrb[2].mxu0 %v14015_v40 }
 0x9ef   : > { %10625 = vmatpush3.bf16.msra.mxu0 %v14546_v38  ;;  %9051 = vmatprep.mubr.msk.f32.mxu0 %vm11213_vm3, %v14523_v34 }
 0x9f0   : > { %10626 = vmatprep.subr.bf16.mxu0 %v14455_v4 }
 0x9f3   : > { %10628 = vmatpush3.bf16.msra.mxu0 %v14547_v9 }
 0x9f4   : > { %10629 = vmatprep.subr.bf16.mxu0 %v14455_v4 }
 0x9f7   : > { %10631 = vmatpush3.bf16.msra.mxu0 %v14548_v61 }
 0x9f8   : > { %10632 = vmatprep.subr.bf16.mxu0 %v14455_v4 }
 0x9fb   : > { %10634 = vmatpush3.bf16.msra.mxu0 %v14549_v22 }
 0x9fc   : > { %10635 = vmatprep.subr.bf16.mxu0 %v14455_v4 }
 0x9ff   : > { %10637 = vmatpush3.bf16.msra.mxu0 %v14550_v8 }
 0xa00   : > { %10638 = vmatprep.subr.bf16.mxu0 %v14455_v4 }
 0xa03   : > { %10640 = vmatpush3.bf16.msra.mxu0 %v14551_v45 }
 0xa04   : > { %10641 = vmatprep.subr.bf16.mxu0 %v14455_v4 }
 0xa07   : > { %10643 = vmatpush3.bf16.msra.mxu0 %v14552_v36 }
 0xa08   : > { %10644 = vmatprep.subr.bf16.mxu0 %v14455_v4 }
 0xa0b   : > { %10646 = vmatpush3.bf16.msra.mxu0 %v14553_v39 }
 0xa0c   : > { %10647 = vmatprep.subr.bf16.mxu0 %v14455_v4 }
 0xa0e   : > { %9052 = vmatmul.mubr.f32.vlgmr.msra.gmra.mrb[2].mxu0 %v5826_v29 }
 0xa0f   : > { %10649 = vmatpush3.bf16.msra.mxu0 %v14554_v52  ;;  %9086 = vmatprep.mubr.msk.f32.mxu0 %vm11213_vm3, %v14523_v34 }
 0xa10   : > { %10650 = vmatprep.subr.bf16.mxu0 %v14455_v4 }
 0xa13   : > { %10652 = vmatpush3.bf16.msra.mxu0 %v14555_v12 }
 0xa14   : > { %10653 = vmatprep.subr.bf16.mxu0 %v14455_v4 }
 0xa17   : > { %10655 = vmatpush3.bf16.msra.mxu0 %v14556_v27 }
 0xa18   : > { %10656 = vmatprep.subr.bf16.mxu0 %v14455_v4 }
 0xa1b   : > { %10658 = vmatpush3.bf16.msra.mxu0 %v14557_v53 }
 0xa1c   : > { %10659 = vmatprep.subr.bf16.mxu0 %v14455_v4 }
 0xa1f   : > { %10661 = vmatpush3.bf16.msra.mxu0 %v14558_v23 }
 0xa20   : > { %10662 = vmatprep.subr.bf16.mxu0 %v14455_v4 }
 0xa23   : > { %10664 = vmatpush3.bf16.msra.mxu0 %v14559_v57 }
 0xa24   : > { %10665 = vmatprep.subr.bf16.mxu0 %v14455_v4 }
 0xa27   : > { %10667 = vmatpush3.bf16.msra.mxu0 %v14560_v10 }
 0xa28   : > { %10668 = vmatprep.subr.bf16.mxu0 %v14455_v4 }
 0xa2b   : > { %10670 = vmatpush3.bf16.msra.mxu0 %v14561_v18 }
 0xa2c   : > { %10671 = vmatprep.subr.bf16.mxu0 %v14455_v4 }
 0xa2e   : > { %9087 = vmatmul.mubr.f32.vlgmr.msra.gmra.mrb[2].mxu0 %v5827_v17 }
 0xa2f   : > { %10673 = vmatpush3.bf16.msra.mxu0 %v14562_v6  ;;  %9121 = vmatprep.mubr.msk.f32.mxu0 %vm11213_vm3, %v14523_v34 }
 0xa30   : > { %10674 = vmatprep.subr.bf16.mxu0 %v14455_v4 }
 0xa33   : > { %10676 = vmatpush3.bf16.msra.mxu0 %v14563_v20 }
 0xa34   : > { %10677 = vmatprep.subr.bf16.mxu0 %v14455_v4 }
 0xa37   : > { %10679 = vmatpush3.bf16.msra.mxu0 %v14564_v11 }
 0xa38   : > { %10680 = vmatprep.subr.bf16.mxu0 %v14455_v4 }
 0xa3b   : > { %10682 = vmatpush3.bf16.msra.mxu0 %v14565_v44 }
 0xa3c   : > { %10683 = vmatprep.subr.bf16.mxu0 %v14455_v4 }
 0xa3f   : > { %10685 = vmatpush3.bf16.msra.mxu0 %v14566_v63 }
 0xa40   : > { %10686 = vmatprep.subr.bf16.mxu0 %v14455_v4 }
 0xa43   : > { %10688 = vmatpush3.bf16.msra.mxu0 %v14567_v54 }
 0xa44   : > { %10689 = vmatprep.subr.bf16.mxu0 %v14455_v4 }
 0xa47   : > { %10691 = vmatpush3.bf16.msra.mxu0 %v14568_v47 }
 0xa48   : > { %10692 = vmatprep.subr.bf16.mxu0 %v14455_v4 }
 0xa4b   : > { %10694 = vmatpush3.bf16.msra.mxu0 %v14569_v37 }
 0xa4c   : > { %10695 = vmatprep.subr.bf16.mxu0 %v14455_v4 }
 0xa4e   : > { %9122 = vmatmul.mubr.f32.vlgmr.msra.gmra.mrb[2].mxu0 %v14015_v40 }
 0xa4f   : > { %10697 = vmatpush3.bf16.msra.mxu0 %v14554_v52  ;;  %9156 = vmatprep.mubr.msk.f32.mxu0 %vm11213_vm3, %v14523_v34 }
 0xa50   : > { %10698 = vmatprep.subr.bf16.mxu0 %v14455_v4 }
 0xa53   : > { %10700 = vmatpush3.bf16.msra.mxu0 %v14555_v12 }
 0xa54   : > { %10701 = vmatprep.subr.bf16.mxu0 %v14455_v4 }
 0xa57   : > { %10703 = vmatpush3.bf16.msra.mxu0 %v14556_v27 }
 0xa58   : > { %10704 = vmatprep.subr.bf16.mxu0 %v14455_v4 }
 0xa5b   : > { %10706 = vmatpush3.bf16.msra.mxu0 %v14557_v53 }
 0xa5c   : > { %10707 = vmatprep.subr.bf16.mxu0 %v14455_v4 }
 0xa5f   : > { %10709 = vmatpush3.bf16.msra.mxu0 %v14558_v23 }
 0xa60   : > { %10710 = vmatprep.subr.bf16.mxu0 %v14455_v4 }
 0xa63   : > { %10712 = vmatpush3.bf16.msra.mxu0 %v14559_v57 }
 0xa64   : > { %10713 = vmatprep.subr.bf16.mxu0 %v14455_v4 }
 0xa67   : > { %10715 = vmatpush3.bf16.msra.mxu0 %v14560_v10 }
 0xa68   : > { %10716 = vmatprep.subr.bf16.mxu0 %v14455_v4 }
 0xa6b   : > { %10718 = vmatpush3.bf16.msra.mxu0 %v14561_v18 }
 0xa6c   : > { %10719 = vmatprep.subr.bf16.mxu0 %v14455_v4 }
 0xa6e   : > { %9157 = vmatmul.mubr.f32.vlgmr.msra.gmra.mrb[2].mxu0 %v14015_v40 }
 0xa6f   : > { %10721 = vmatpush3.bf16.msra.mxu0 %v14554_v52  ;;  %9191 = vmatprep.mubr.msk.f32.mxu0 %vm11213_vm3, %v14523_v34 }
 0xa70   : > { %10722 = vmatprep.subr.bf16.mxu0 %v14455_v4 }
 0xa73   : > { %10724 = vmatpush3.bf16.msra.mxu0 %v14555_v12 }
 0xa74   : > { %10725 = vmatprep.subr.bf16.mxu0 %v14455_v4 }
 0xa77   : > { %10727 = vmatpush3.bf16.msra.mxu0 %v14556_v27 }
 0xa78   : > { %10728 = vmatprep.subr.bf16.mxu0 %v14455_v4 }
 0xa7b   : > { %10730 = vmatpush3.bf16.msra.mxu0 %v14557_v53 }
 0xa7c   : > { %10731 = vmatprep.subr.bf16.mxu0 %v14455_v4 }
 0xa7f   : > { %10733 = vmatpush3.bf16.msra.mxu0 %v14558_v23 }
 0xa80   : > { %10734 = vmatprep.subr.bf16.mxu0 %v14455_v4 }
 0xa83   : > { %10736 = vmatpush3.bf16.msra.mxu0 %v14559_v57 }
 0xa84   : > { %10737 = vmatprep.subr.bf16.mxu0 %v14455_v4 }
 0xa87   : > { %10739 = vmatpush3.bf16.msra.mxu0 %v14560_v10 }
 0xa88   : > { %10740 = vmatprep.subr.bf16.mxu0 %v14455_v4 }
 0xa8b   : > { %10742 = vmatpush3.bf16.msra.mxu0 %v14561_v18 }
 0xa8c   : > { %10743 = vmatprep.subr.bf16.mxu0 %v14455_v4 }
 0xb41   : > { %v6381_v59 = vpop.f32.mrb[2].mxu0 }
 0xb42   : > { %v14131_v33 = vsub.f32 %v14012_v62, %v6381_v59  ;;  %v9158_v60 = vpop.f32.mrb[3].mxu0 }
 0xb44   : > { %v6386_v15 = vmul.f32 %v14131_v33, %v14131_v33 }
 0xb46   : > { %v14135_v42 = vand.u32 4294901760, %v6386_v15 }
 0xb48   : > { %v6469_v13 = vsub.f32 %v6386_v15, %v14135_v42 }
 0xb4a   : > { %v6470_v3 = vand.u32 4294901760, %v6469_v13 }
 0xb4c   : > { %v6471_v7 = vsub.f32 %v6469_v13, %v6470_v3 }
 0xb4e   : > { %v6472_v1 = vand.u32 4294901760, %v6471_v7 }
 0xb50   : > { %9192 = vmatmul.mubr.f32.vlgmr.msra.gmra.mrb[4].mxu0 %v6472_v1 }
 0xb51   : > { %10745 = vmatpush3.bf16.msra.mxu0 %v12851_v2  ;;  %9226 = vmatprep.mubr.msk.f32.mxu0 %vm11213_vm3, %v14523_v34 }
 0xb52   : > { %10746 = vmatprep.subr.bf16.mxu0 %v14455_v4 }
 0xb55   : > { %10748 = vmatpush3.bf16.msra.mxu0 %v12874_v55 }
 0xb56   : > { %10749 = vmatprep.subr.bf16.mxu0 %v14455_v4 }
 0xb59   : > { %10751 = vmatpush3.bf16.msra.mxu0 %v12888_v49  ;;  %v7178_v49 = vld [vmem:[%s14293_s5 + $0x2] ss:$0 sm:$0xff] }
 0xb5a   : > { %10752 = vmatprep.subr.bf16.mxu0 %v14455_v4 }
 0xb5d   : > { %10754 = vmatpush3.bf16.msra.mxu0 %v12899_v0 }
 0xb5e   : > { %10755 = vmatprep.subr.bf16.mxu0 %v14455_v4 }
 0xb61   : > { %10757 = vmatpush3.bf16.msra.mxu0 %v12903_v35 }
 0xb62   : > { %10758 = vmatprep.subr.bf16.mxu0 %v14455_v4 }
 0xb65   : > { %10760 = vmatpush3.bf16.msra.mxu0 %v12756_v48 }
 0xb66   : > { %10761 = vmatprep.subr.bf16.mxu0 %v14455_v4 }
 0xb69   : > { %10763 = vmatpush3.bf16.msra.mxu0 %v12760_v5 }
 0xb6a   : > { %10764 = vmatprep.subr.bf16.mxu0 %v14455_v4 }
 0xb6d   : > { %10766 = vmatpush3.bf16.msra.mxu0 %v14545_v21 }
 0xb6e   : > { %10767 = vmatprep.subr.bf16.mxu0 %v14455_v4 }
 0xb70   : > { %9227 = vmatmul.mubr.f32.vlgmr.msra.gmra.mrb[4].mxu0 %v14135_v42 }
 0xb71   : > { %10769 = vmatpush3.bf16.msra.mxu0 %v14546_v38  ;;  %9261 = vmatprep.mubr.msk.f32.mxu0 %vm11213_vm3, %v14523_v34 }
 0xb72   : > { %10770 = vmatprep.subr.bf16.mxu0 %v14455_v4 }
 0xb75   : > { %10772 = vmatpush3.bf16.msra.mxu0 %v14547_v9 }
 0xb76   : > { %10773 = vmatprep.subr.bf16.mxu0 %v14455_v4 }
 0xb79   : > { %10775 = vmatpush3.bf16.msra.mxu0 %v14548_v61 }
 0xb7a   : > { %10776 = vmatprep.subr.bf16.mxu0 %v14455_v4 }
 0xb7d   : > { %10778 = vmatpush3.bf16.msra.mxu0 %v14549_v22 }
 0xb7e   : > { %10779 = vmatprep.subr.bf16.mxu0 %v14455_v4 }
 0xb81   : > { %10781 = vmatpush3.bf16.msra.mxu0 %v14550_v8 }
 0xb82   : > { %10782 = vmatprep.subr.bf16.mxu0 %v14455_v4 }
 0xb85   : > { %10784 = vmatpush3.bf16.msra.mxu0 %v14551_v45 }
 0xb86   : > { %10785 = vmatprep.subr.bf16.mxu0 %v14455_v4 }
 0xb89   : > { %10787 = vmatpush3.bf16.msra.mxu0 %v14552_v36 }
 0xb8a   : > { %10788 = vmatprep.subr.bf16.mxu0 %v14455_v4 }
 0xb8d   : > { %10790 = vmatpush3.bf16.msra.mxu0 %v14553_v39 }
 0xb8e   : > { %10791 = vmatprep.subr.bf16.mxu0 %v14455_v4 }
 0xb90   : > { %9262 = vmatmul.mubr.f32.vlgmr.msra.gmra.mrb[4].mxu0 %v6469_v13 }
 0xb91   : > { %10793 = vmatpush3.bf16.msra.mxu0 %v14554_v52  ;;  %9296 = vmatprep.mubr.msk.f32.mxu0 %vm11213_vm3, %v14523_v34 }
 0xb92   : > { %10794 = vmatprep.subr.bf16.mxu0 %v14455_v4 }
 0xb95   : > { %10796 = vmatpush3.bf16.msra.mxu0 %v14555_v12 }
 0xb96   : > { %10797 = vmatprep.subr.bf16.mxu0 %v14455_v4 }
 0xb99   : > { %10799 = vmatpush3.bf16.msra.mxu0 %v14556_v27 }
 0xb9a   : > { %10800 = vmatprep.subr.bf16.mxu0 %v14455_v4 }
 0xb9d   : > { %10802 = vmatpush3.bf16.msra.mxu0 %v14557_v53 }
 0xb9e   : > { %10803 = vmatprep.subr.bf16.mxu0 %v14455_v4 }
 0xba1   : > { %10805 = vmatpush3.bf16.msra.mxu0 %v14558_v23 }
 0xba2   : > { %10806 = vmatprep.subr.bf16.mxu0 %v14455_v4 }
 0xba5   : > { %10808 = vmatpush3.bf16.msra.mxu0 %v14559_v57 }
 0xba6   : > { %10809 = vmatprep.subr.bf16.mxu0 %v14455_v4 }
 0xba9   : > { %10811 = vmatpush3.bf16.msra.mxu0 %v14560_v10 }
 0xbaa   : > { %10812 = vmatprep.subr.bf16.mxu0 %v14455_v4 }
 0xbad   : > { %10814 = vmatpush3.bf16.msra.mxu0 %v14561_v18 }
 0xbae   : > { %10815 = vmatprep.subr.bf16.mxu0 %v14455_v4 }
 0xbb0   : > { %9297 = vmatmul.mubr.f32.vlgmr.msra.gmra.mrb[4].mxu0 %v6470_v3 }
 0xbb1   : > { %10817 = vmatpush3.bf16.msra.mxu0 %v14562_v6  ;;  %9331 = vmatprep.mubr.msk.f32.mxu0 %vm11213_vm3, %v14523_v34 }
 0xbb2   : > { %10818 = vmatprep.subr.bf16.mxu0 %v14455_v4 }
 0xbb5   : > { %10820 = vmatpush3.bf16.msra.mxu0 %v14563_v20 }
 0xbb6   : > { %10821 = vmatprep.subr.bf16.mxu0 %v14455_v4 }
 0xbb9   : > { %10823 = vmatpush3.bf16.msra.mxu0 %v14564_v11 }
 0xbba   : > { %10824 = vmatprep.subr.bf16.mxu0 %v14455_v4 }
 0xbbd   : > { %10826 = vmatpush3.bf16.msra.mxu0 %v14565_v44 }
 0xbbe   : > { %10827 = vmatprep.subr.bf16.mxu0 %v14455_v4 }
 0xbc1   : > { %10829 = vmatpush3.bf16.msra.mxu0 %v14566_v63 }
 0xbc2   : > { %10830 = vmatprep.subr.bf16.mxu0 %v14455_v4 }
 0xbc5   : > { %10832 = vmatpush3.bf16.msra.mxu0 %v14567_v54 }
 0xbc6   : > { %10833 = vmatprep.subr.bf16.mxu0 %v14455_v4 }
 0xbc9   : > { %10835 = vmatpush3.bf16.msra.mxu0 %v14568_v47 }
 0xbca   : > { %10836 = vmatprep.subr.bf16.mxu0 %v14455_v4 }
 0xbcd   : > { %10838 = vmatpush3.bf16.msra.mxu0 %v14569_v37 }
 0xbce   : > { %10839 = vmatprep.subr.bf16.mxu0 %v14455_v4 }
 0xbd0   : > { %9332 = vmatmul.mubr.f32.vlgmr.msra.gmra.mrb[4].mxu0 %v14135_v42 }
 0xbd1   : > { %10841 = vmatpush3.bf16.msra.mxu0 %v14554_v52  ;;  %9366 = vmatprep.mubr.msk.f32.mxu0 %vm11213_vm3, %v14523_v34  ;;  %v7042_v34 = vld [vmem:[%s310_s23] sm:$0xff] }
 0xbd2   : > { %10842 = vmatprep.subr.bf16.mxu0 %v14455_v4 }
 0xbd5   : > { %10844 = vmatpush3.bf16.msra.mxu0 %v14555_v12 }
 0xbd6   : > { %10845 = vmatprep.subr.bf16.mxu0 %v14455_v4 }
 0xbd9   : > { %10847 = vmatpush3.bf16.msra.mxu0 %v14556_v27 }
 0xbda   : > { %10848 = vmatprep.subr.bf16.mxu0 %v14455_v4 }
 0xbdd   : > { %10850 = vmatpush3.bf16.msra.mxu0 %v14557_v53 }
 0xbde   : > { %10851 = vmatprep.subr.bf16.mxu0 %v14455_v4 }
 0xbe1   : > { %10853 = vmatpush3.bf16.msra.mxu0 %v14558_v23 }
 0xbe2   : > { %10854 = vmatprep.subr.bf16.mxu0 %v14455_v4 }
 0xbe5   : > { %10856 = vmatpush3.bf16.msra.mxu0 %v14559_v57 }
 0xbe6   : > { %10857 = vmatprep.subr.bf16.mxu0 %v14455_v4 }
 0xbe9   : > { %10859 = vmatpush3.bf16.msra.mxu0 %v14560_v10 }
 0xbea   : > { %10860 = vmatprep.subr.bf16.mxu0 %v14455_v4  ;;  %v7179_v4 = vld [vmem:[%s14293_s5 + $0x3] ss:$0 sm:$0xff] }
 0xbed   : > { %10862 = vmatpush3.bf16.msra.mxu0 %v14561_v18 }
 0xbf0   : > { %9367 = vmatmul.mubr.f32.vlgmr.msra.gmra.mrb[4].mxu0 %v14135_v42 }
 0xcc3   : > { %v7024_v48 = vpop.f32.mrb[4].mxu0 }
 0xcc4   : > { %v10865_v5 = vadd.f32 1e-06, %v7024_v48  ;;  %v9368_v2 = vpop.f32.mrb[5].mxu0 }
 0xcc6   : > { %11049 = vrsqrt.f32 %v10865_v5 }
 0xcd0   : > { %v11050_v55 = vpop.eup %11049 }
 0xcd1   : > { %v7029_v0 = vmul.f32 %v11050_v55, %v14131_v33 }
 0xcd3   : > { %v7035_v35 = vmul.f32 %v7178_v49, %v7029_v0 }
 0xcd5   : > { %v7041_v32 = vadd.f32 %v7179_v4, %v7035_v35 }
 0xcd7   : > { %v7043_v26 = vadd.f32 %v7042_v34, %v7041_v32 }
 0xcd9   : > { %v7044_v43 = vmax.f32 %v7043_v26, 0.0 }
 0xcdb   : > { %7045 = vst [vmem:[%s301_s28] sm:$0xff] %v7044_v43 }
 0xcdc   : > { %11148 = shalt.err (!%p11145_p9)
}
 0xcdd   : > { %s11149_s20 = scalar_lea.hbm %s14246_s18, 128  ;;  %s11153_s14 = scalar_lea.hbm %s14294_s6, 256 }
 0xcde   : > { %p11150_p2 = scmp.ne.s32.totalorder %s14246_s18, %s11149_s20  ;;  %p11154_p5 = scmp.lt.u32.totalorder %s14246_s18, %s14294_s6 }
 0xcdf   : > { %p11155_p10 = scmp.lt.u32.totalorder %s11153_s14, %s11149_s20  ;;  %p11157_p4 = scmp.lt.u32.totalorder %s11149_s20, %s14246_s18 }
 0xce0   : > { %p11151_p0 = pnand %p11150_p2, %p14570_p7 }
 0xce1   : > { %p11156_p12 = por %p11155_p10, %p11154_p5 }
 0xce2   : > { %p11152_p3 = pneg %p11151_p0 }
 0xce3   : > { %p11158_p8 = por %p11157_p4, %p11156_p12 }
 0xce5   : > { %p11159_p11 = pnand %p11158_p8, %p11152_p3 }
 0xce7   : > { %11162 = shalt.err (!%p11159_p11)
}
 0xce8   : > { %10984 = dma.vmem_to_hbm [thread:$0]  (%p14570_p7), %s14248_s15, 128, %s14246_s18, %s7047_s19  }
 0xce9 PF: > { %p11006_p13 = scmp.ge.s32.totalorder %s11205_s24, 2  ;;  %s7072_s16 = sand.u32 1, %s11193_s21  }
 0xcea   : > { %p14571_p1 = scmp.ne.s32.totalorder %s14430_s8, 0  ;;  %s7073_s9 = scalar_lea.sflag [#allocation4], %s7072_s16 }
 0xcec   : > { %p10997_p6 = pnand %p11006_p13, %p14571_p1 }
 0xcee   : > { %11188 = dma.done.wait (!%p10997_p6), %s7073_s9, 128  }
 0xcef   : > { %11190 = vsyncadd (!%p10997_p6), %s7073_s9, 4294967168  ;;  %s14572_s28 = sld [smem:[#allocation12_spill]]  ;;  %s14573_s23 = sld [smem:[#allocation13_spill]] }
 0xcf0   : > { %p18_p9 = scmp.ge.s32.totalorder %s11276_s27, 4   ;;  %s14574_s21 = smov %s11197_s22 }
 0xcf1   : > { %s14576_s24 = smov %s11276_s27 }
 0xcf2   :  { %20 = sbr.rel (!%p18_p9) target bundleno = 5 (0x5), region = 99 }
 0xcf5   : > { %s14575_s22 = smov %s14572_s28 }
 0xcf9   :  { %7078 = vsyncpa [#allocation3], 1 }
 0xcfa   :  { %7080 = vsyncpa [#allocation3 + $0x1], 1 }
 0xcfb   :  { %7081 = vsyncpa [#allocation6], 1 }
 0xcfc   :  { %7082 = vsyncpa [#allocation4], 1 }
 0xcfd   :  { %7084 = vsyncpa [#allocation4 + $0x1], 1 }

</bundles_post_ra>
